<compile_context>
chip_gen: v7x
topology: tpu7x:2x2x1
jax: 0.10.0
libtpu: 0.0.40
codegen_flags: <defaults>
</compile_context>

<pallas_src>
import numpy as np
import jax
import jax.numpy as jnp
from jax.experimental import pallas as pl
from jax.experimental.pallas import tpu as pltpu

# ---------------- configuration (model_size == '1k') ------------------------
D_MODEL = 4           # embedding_dim
NUM_HEADS = 2         # sLSTM heads
HEAD_DIM = D_MODEL // NUM_HEADS
CONV_K = 4            # conv1d_kernel_size
FFN_DIM = 64          # round_up(1.3 * d_model, 64) as in xlstm FeedForwardConfig
DENSE1 = 30
DENSE2 = 20
LN_EPS = 1e-5
LANES = 128           # packed-weight buffer lane width


# --------------------------- in-kernel helpers -------------------------------
def _vpu_matmul(x, w):
    """(M, K) @ (K, N) as K broadcast-FMAs with a pairwise tree reduction (K small, static)."""
    terms = [x[:, k:k + 1] * w[k:k + 1, :] for k in range(w.shape[0])]
    while len(terms) > 1:
        nxt = [terms[i] + terms[i + 1] for i in range(0, len(terms) - 1, 2)]
        if len(terms) % 2 == 1:
            nxt.append(terms[-1])
        terms = nxt
    return terms[0]


def _layernorm(x, w):
    """Weight-only LayerNorm over the last axis (as in the xlstm components)."""
    mean = jnp.mean(x, axis=-1, keepdims=True)
    var = jnp.mean((x - mean) ** 2, axis=-1, keepdims=True)
    return (x - mean) * jax.lax.rsqrt(var + LN_EPS) * w


def _erf(x):
    # Abramowitz & Stegun 7.1.26 rational approximation (|abs err| < 1.5e-7):
    # exact-GELU's erf built only from ops with guaranteed Mosaic lowerings.
    a1, a2, a3, a4, a5 = 0.254829592, -0.284496736, 1.421413741, -1.453152027, 1.061405429
    p = 0.3275911
    ax = jnp.abs(x)
    t = 1.0 / (1.0 + p * ax)
    poly = t * (a1 + t * (a2 + t * (a3 + t * (a4 + t * a5))))
    y = 1.0 - poly * jnp.exp(-ax * ax)
    return jnp.where(x < 0.0, -y, y)


def _gelu_exact(x):
    return 0.5 * x * (1.0 + _erf(x * float(1.0 / np.sqrt(2.0))))


# ----------------------- packed-weight buffer layout -------------------------
def _param_shapes(num_features):
    H = D_MODEL
    return (
        ("in_w", (num_features, H)),
        ("in_b", (1, H)),
        ("blk_nw", (1, H)),
        ("conv_w_rev", (CONV_K, H)),
        ("conv_b", (1, H)),
        ("w_gates", (2 * H, 4 * H)),      # [i|f|z|o] columns; rows = [conv branch ; pre-conv branch]
        ("b_gates", (1, 4 * H)),          # cell bias, gate-major [i|f|z|o]
        ("r", (H, 4 * H)),                # block-diag recurrence, gate-major columns
        ("gn_w", (1, H)),
        ("head_avg", (H, H)),
        ("ffn_nw", (1, H)),
        ("ffn_gate_up", (H, 2 * FFN_DIM)),
        ("ffn_down_p", (LANES, LANES)),   # (FFN_DIM, H) zero-padded to an MXU-friendly tile
        ("post_nw", (1, H)),
        ("d1_w", (H, DENSE1)),
        ("d1_b", (1, DENSE1)),
        ("d2_w_p", (LANES, LANES)),       # (DENSE1, DENSE2) zero-padded to an MXU-friendly tile
        ("d2_b", (1, DENSE2)),
        ("out_w_row", (1, DENSE2)),
        ("out_b", (1, 1)),
    )


def _layout(num_features):
    """name -> (row offset, natural shape); every segment starts on an 8-row boundary."""
    off, layout = 0, {}
    for name, shape in _param_shapes(num_features):
        layout[name] = (off, shape)
        off += -(-shape[0] // 8) * 8
    return layout, off


# ------------------------------ fused kernel ---------------------------------
def _make_kernel(layout, B, S):
    H = D_MODEL
    K = CONV_K

    def kernel(x_ref, w_ref, out_ref):
        def wview(name, full_lanes=False):
            off, (r, c) = layout[name]
            if full_lanes:
                return w_ref[off:off + r, :]          # (r, 128) zero-padded view
            return w_ref[off:off + r, 0:c]

        in_w, in_b = wview("in_w"), wview("in_b")
        blk_nw = wview("blk_nw")
        conv_wr, conv_b = wview("conv_w_rev"), wview("conv_b")
        w_gates, b_gates = wview("w_gates"), wview("b_gates")
        r_w = wview("r")
        gn_w, head_avg = wview("gn_w"), wview("head_avg")
        ffn_nw = wview("ffn_nw")
        ffn_gate_up = wview("ffn_gate_up")
        ffn_down_p = wview("ffn_down_p")
        post_nw = wview("post_nw")
        d1_w, d1_b = wview("d1_w", True), wview("d1_b", True)
        d2_w_p, d2_b = wview("d2_w_p"), wview("d2_b", True)
        out_w_row, out_b = wview("out_w_row", True), wview("out_b")

        # ---- per-batch pre-recurrence: in-proj -> pre-LN -> causal conv + SiLU -> gate pre-acts
        row_ids = jax.lax.broadcasted_iota(jnp.int32, (S, H), 0)
        res_list, pre_list = [], []
        for b in range(B):                               # B is a small static constant
            xb = x_ref[b * S:(b + 1) * S, :]
            h_b = _vpu_matmul(xb, in_w) + in_b           # input projection, (S, H)
            res_list.append(h_b)                         # sLSTM-block residual (stays in vregs)
            hn_b = _layernorm(h_b, blk_nw)
            # causal depthwise conv: conv[t] = sum_j w_rev[j] * hn[t-j]  (roll + row mask, no pad buffer)
            conv = hn_b * conv_wr[0:1, :]
            for j in range(1, K):
                shifted = pltpu.roll(hn_b, j, axis=0)
                shifted = jnp.where(row_ids >= j, shifted, 0.0)
                conv = conv + shifted * conv_wr[j:j + 1, :]
            conv = conv + conv_b
            xc_b = conv * jax.nn.sigmoid(conv)           # SiLU
            # [i|f|z|o] pre-activations (cell bias folded): i/f read conv branch, z/o pre-conv branch
            pre_list.append(_vpu_matmul(jnp.concatenate([xc_b, hn_b], axis=1), w_gates) + b_gates)

        # per-timestep (B, 4H) gate rows, pre-split before the loop (off the serial path)
        pre_t = [jnp.concatenate([pre_list[b][t:t + 1, :] for b in range(B)], axis=0)
                 for t in range(S)]

        # ---- exponentially gated sLSTM recurrence (vanilla backend), batched over B, unrolled over S
        y = jnp.zeros((B, H), jnp.float32)
        c = jnp.zeros((B, H), jnp.float32)
        n = jnp.zeros((B, H), jnp.float32)
        m = jnp.zeros((B, H), jnp.float32)
        ys = []
        for t in range(S):
            raw = pre_t[t] + _vpu_matmul(y, r_w)         # one (B,H)@(H,4H) per step
            i_raw, f_raw = raw[:, 0:H], raw[:, H:2 * H]
            z_raw, o_raw = raw[:, 2 * H:3 * H], raw[:, 3 * H:4 * H]
            log_f = jnp.minimum(f_raw, 0.0) - jnp.log(1.0 + jnp.exp(-jnp.abs(f_raw)))
            logfplusm = m + log_f
            m_new = i_raw if t == 0 else jnp.maximum(i_raw, logfplusm)
            i_gate = jnp.exp(i_raw - m_new)
            f_gate = jnp.exp(logfplusm - m_new)
            c = f_gate * c + i_gate * jnp.tanh(z_raw)
            n = f_gate * n + i_gate
            # n >= 1 from t=0 onward: the t==0 stabilizer choice forces i_gate == 1 (n_0 = 1),
            # and later max(i_raw, logfplusm) keeps one of i_gate/f_gate at 1 -> approx recip safe.
            y = jax.nn.sigmoid(o_raw) * c * pl.reciprocal(n, approx=True)
            m = m_new
            ys.append(y)

        # gather recurrence outputs into (B*S, H) batch-major rows (matches residual/output order)
        y_all = jnp.concatenate(
            [jnp.concatenate([ys[t][b:b + 1, :] for t in range(S)], axis=0) for b in range(B)],
            axis=0)
        res = jnp.concatenate(res_list, axis=0)

        # ---- per-head GroupNorm (weight only) + residual, on the flat (B*S, H) layout
        mean = _vpu_matmul(y_all, head_avg)
        diff = y_all - mean
        var = _vpu_matmul(diff * diff, head_avg)
        h = res + diff * jax.lax.rsqrt(var + LN_EPS) * gn_w

        # ---- gated exact-GELU feed-forward (pre-norm) + residual
        hn = _layernorm(h, ffn_nw)
        gate_up = _vpu_matmul(hn, ffn_gate_up)                           # (B*S, 2*FFN)
        gated = _gelu_exact(gate_up[:, 0:FFN_DIM]) * gate_up[:, FFN_DIM:2 * FFN_DIM]
        gated_p = jnp.concatenate(
            [gated, jnp.zeros((B * S, LANES - FFN_DIM), jnp.float32)], axis=1)
        down = jnp.dot(gated_p, ffn_down_p, preferred_element_type=jnp.float32)   # MXU, (16,128)@(128,128)
        h = h + down[:, 0:H]

        # ---- post-blocks LayerNorm + dense head (lane-padded; K=30 contraction on the MXU)
        h = _layernorm(h, post_nw)
        h1 = jnp.maximum(_vpu_matmul(h, d1_w) + d1_b, 0.0)               # (B*S, 128), cols >= 30 are 0
        h2 = jnp.maximum(
            jnp.dot(h1, d2_w_p, preferred_element_type=jnp.float32) + d2_b, 0.0)  # MXU
        out = jnp.sum(h2 * out_w_row, axis=-1, keepdims=True) + out_b    # (B*S, 1) lane reduction
        out_ref[...] = jnp.broadcast_to(out, (B * S, LANES))             # lane-dense store

    return kernel


# --------------------------- parameter construction -------------------------
def init_params(key, num_features):
    """Deterministic stand-in parameters, packed into a single (rows, 128) f32 buffer."""
    ks = iter(jax.random.split(key, 32))

    def nrm(shape, s=0.1):
        return np.asarray(jax.random.normal(next(ks), shape), np.float32) * np.float32(s)

    H, NH, DH = D_MODEL, NUM_HEADS, HEAD_DIM

    def blockdiag(per_head):                       # (NH, DH, DH) -> dense (H, H)
        m = np.zeros((H, H), np.float32)
        for hh in range(NH):
            m[hh * DH:(hh + 1) * DH, hh * DH:(hh + 1) * DH] = per_head[hh]
        return m

    def recurrent_dense(r_head):                   # (NH, DH, 4, DH) -> (H, 4H), gate-major columns
        m = np.zeros((H, 4 * H), np.float32)
        for hh in range(NH):
            for g in range(4):
                m[hh * DH:(hh + 1) * DH, g * H + hh * DH:g * H + (hh + 1) * DH] = r_head[hh, :, g, :]
        return m

    # head-wise gate projections, combined into one (2H, 4H) matrix
    w_i = blockdiag(nrm((NH, DH, DH), 0.3))
    w_f = blockdiag(nrm((NH, DH, DH), 0.3))
    w_z = blockdiag(nrm((NH, DH, DH), 0.3))
    w_o = blockdiag(nrm((NH, DH, DH), 0.3))
    w_gates = np.zeros((2 * H, 4 * H), np.float32)
    w_gates[0:H, 0:H] = w_i          # i gate reads the conv(+SiLU) branch
    w_gates[0:H, H:2 * H] = w_f      # f gate reads the conv(+SiLU) branch
    w_gates[H:2 * H, 2 * H:3 * H] = w_z   # z gate reads the pre-conv branch
    w_gates[H:2 * H, 3 * H:4 * H] = w_o   # o gate reads the pre-conv branch

    # TODO(synk): 'powerlaw_blockdependent' forget-gate bias init approximated with a linspace stand-in.
    f_bias = np.linspace(1.0, 3.0, H, dtype=np.float32)
    b_gates = np.zeros((1, 4 * H), np.float32)
    b_gates[0, H:2 * H] = f_bias

    conv_w = nrm((CONV_K, H))
    ffn_down_p = np.zeros((LANES, LANES), np.float32)
    d2_w_p = np.zeros((LANES, LANES), np.float32)

    vals = {
        "in_w": nrm((num_features, H)),
        "in_b": nrm((1, H), 0.01),
        "blk_nw": 1.0 + nrm((1, H), 0.02),
        "conv_w_rev": conv_w[::-1].copy(),        # tap j multiplies hn[t - j]
        "conv_b": nrm((1, H), 0.01),
        "w_gates": w_gates,
        "b_gates": b_gates,
        "r": recurrent_dense(nrm((NH, DH, 4, DH), 0.2)),
        "gn_w": 1.0 + nrm((1, H), 0.02),
        "head_avg": np.kron(np.eye(NH, dtype=np.float32),
                            np.full((DH, DH), 1.0 / DH, np.float32)),
        "ffn_nw": 1.0 + nrm((1, H), 0.02),
        "ffn_gate_up": np.concatenate([nrm((H, FFN_DIM)), nrm((H, FFN_DIM))], axis=1),
        "ffn_down_p": ffn_down_p,
        "post_nw": 1.0 + nrm((1, H), 0.02),
        "d1_w": nrm((H, DENSE1)),
        "d1_b": nrm((1, DENSE1), 0.01),
        "d2_w_p": d2_w_p,
        "d2_b": nrm((1, DENSE2), 0.01),
        "out_w_row": nrm((DENSE2, 1)).T.copy(),
        "out_b": nrm((1, 1), 0.01),
    }
    vals["ffn_down_p"][0:FFN_DIM, 0:H] = nrm((FFN_DIM, H))
    vals["d2_w_p"][0:DENSE1, 0:DENSE2] = nrm((DENSE1, DENSE2))

    layout, rows = _layout(num_features)
    packed = np.zeros((rows, LANES), np.float32)
    for name, shape in _param_shapes(num_features):
        off, _ = layout[name]
        arr = vals[name]
        assert arr.shape == shape, (name, arr.shape, shape)
        packed[off:off + shape[0], 0:shape[1]] = arr
    return jnp.asarray(packed)


# --------------------------------- forward ----------------------------------
def xlstm_forward(packed, x):
    """x: (B, S, num_features) float32 -> (B, S, 1).  One fused, grid-less pallas_call."""
    B, S, F = x.shape
    layout, _ = _layout(F)
    out = pl.pallas_call(
        _make_kernel(layout, B, S),
        out_shape=jax.ShapeDtypeStruct((B * S, LANES), jnp.float32),
    )(x.reshape(B * S, F), packed)
    return out[:, :1].reshape(B, S, 1)


if __name__ == "__main__":
    B, S, NUM_FEATURES = 2, 8, 6
    x = jax.random.normal(jax.random.PRNGKey(0), (B, S, NUM_FEATURES), jnp.float32)
    packed = init_params(jax.random.PRNGKey(1), NUM_FEATURES)
    out = jax.jit(xlstm_forward)(packed, x)
    jax.block_until_ready(out)
    assert out.shape == (B, S, 1)
    assert bool(jnp.all(jnp.isfinite(out)))
    print("KERNEL_OK")
</pallas_src>

<mosaic_0001>
module attributes {stable_mosaic.version = 11 : i64} {
  func.func @kernel(%arg0: memref<16x6xf32, #tpu.memory_space<vmem>>, %arg1: memref<400x128xf32, #tpu.memory_space<vmem>>, %arg2: memref<16x128xf32, #tpu.memory_space<vmem>>) attributes {dimension_semantics = [], scalar_prefetch = 0 : i64, scratch_operands = 0 : i64, tpu.core_type = #tpu.core_type<tc>} {
    %c0 = arith.constant 0 : index
    %c0_0 = arith.constant 0 : index
    %0 = vector.load %arg1[%c0, %c0_0] : memref<400x128xf32, #tpu.memory_space<vmem>>, vector<6x4xf32>
    %c8 = arith.constant 8 : index
    %c0_1 = arith.constant 0 : index
    %1 = vector.load %arg1[%c8, %c0_1] : memref<400x128xf32, #tpu.memory_space<vmem>>, vector<1x4xf32>
    %c16 = arith.constant 16 : index
    %c0_2 = arith.constant 0 : index
    %2 = vector.load %arg1[%c16, %c0_2] : memref<400x128xf32, #tpu.memory_space<vmem>>, vector<1x4xf32>
    %c24 = arith.constant 24 : index
    %c0_3 = arith.constant 0 : index
    %3 = vector.load %arg1[%c24, %c0_3] : memref<400x128xf32, #tpu.memory_space<vmem>>, vector<4x4xf32>
    %c32 = arith.constant 32 : index
    %c0_4 = arith.constant 0 : index
    %4 = vector.load %arg1[%c32, %c0_4] : memref<400x128xf32, #tpu.memory_space<vmem>>, vector<1x4xf32>
    %c40 = arith.constant 40 : index
    %c0_5 = arith.constant 0 : index
    %5 = vector.load %arg1[%c40, %c0_5] : memref<400x128xf32, #tpu.memory_space<vmem>>, vector<8x16xf32>
    %c48 = arith.constant 48 : index
    %c0_6 = arith.constant 0 : index
    %6 = vector.load %arg1[%c48, %c0_6] : memref<400x128xf32, #tpu.memory_space<vmem>>, vector<1x16xf32>
    %c56 = arith.constant 56 : index
    %c0_7 = arith.constant 0 : index
    %7 = vector.load %arg1[%c56, %c0_7] : memref<400x128xf32, #tpu.memory_space<vmem>>, vector<4x16xf32>
    %c64 = arith.constant 64 : index
    %c0_8 = arith.constant 0 : index
    %8 = vector.load %arg1[%c64, %c0_8] : memref<400x128xf32, #tpu.memory_space<vmem>>, vector<1x4xf32>
    %c72 = arith.constant 72 : index
    %c0_9 = arith.constant 0 : index
    %9 = vector.load %arg1[%c72, %c0_9] : memref<400x128xf32, #tpu.memory_space<vmem>>, vector<4x4xf32>
    %c80 = arith.constant 80 : index
    %c0_10 = arith.constant 0 : index
    %10 = vector.load %arg1[%c80, %c0_10] : memref<400x128xf32, #tpu.memory_space<vmem>>, vector<1x4xf32>
    %c88 = arith.constant 88 : index
    %c0_11 = arith.constant 0 : index
    %11 = vector.load %arg1[%c88, %c0_11] : memref<400x128xf32, #tpu.memory_space<vmem>>, vector<4x128xf32>
    %c96 = arith.constant 96 : index
    %c0_12 = arith.constant 0 : index
    %12 = vector.load %arg1[%c96, %c0_12] : memref<400x128xf32, #tpu.memory_space<vmem>>, vector<128x128xf32>
    %c224 = arith.constant 224 : index
    %c0_13 = arith.constant 0 : index
    %13 = vector.load %arg1[%c224, %c0_13] : memref<400x128xf32, #tpu.memory_space<vmem>>, vector<1x4xf32>
    %c232 = arith.constant 232 : index
    %c0_14 = arith.constant 0 : index
    %14 = vector.load %arg1[%c232, %c0_14] : memref<400x128xf32, #tpu.memory_space<vmem>>, vector<4x128xf32>
    %c240 = arith.constant 240 : index
    %c0_15 = arith.constant 0 : index
    %15 = vector.load %arg1[%c240, %c0_15] : memref<400x128xf32, #tpu.memory_space<vmem>>, vector<1x128xf32>
    %c248 = arith.constant 248 : index
    %c0_16 = arith.constant 0 : index
    %16 = vector.load %arg1[%c248, %c0_16] : memref<400x128xf32, #tpu.memory_space<vmem>>, vector<128x128xf32>
    %c376 = arith.constant 376 : index
    %c0_17 = arith.constant 0 : index
    %17 = vector.load %arg1[%c376, %c0_17] : memref<400x128xf32, #tpu.memory_space<vmem>>, vector<1x128xf32>
    %c384 = arith.constant 384 : index
    %c0_18 = arith.constant 0 : index
    %18 = vector.load %arg1[%c384, %c0_18] : memref<400x128xf32, #tpu.memory_space<vmem>>, vector<1x128xf32>
    %c392 = arith.constant 392 : index
    %c0_19 = arith.constant 0 : index
    %19 = vector.load %arg1[%c392, %c0_19] : memref<400x128xf32, #tpu.memory_space<vmem>>, vector<1x1xf32>
    %20 = tpu.iota {dimensions = array<i32: 0>} : vector<8x4xi32>
    %c0_20 = arith.constant 0 : index
    %c0_21 = arith.constant 0 : index
    %21 = vector.load %arg0[%c0_20, %c0_21] : memref<16x6xf32, #tpu.memory_space<vmem>>, vector<8x6xf32>
    %22 = vector.extract_strided_slice %21 {offsets = [0, 0], sizes = [8, 1], strides = [1, 1]} : vector<8x6xf32> to vector<8x1xf32>
    %23 = vector.extract_strided_slice %0 {offsets = [0, 0], sizes = [1, 4], strides = [1, 1]} : vector<6x4xf32> to vector<1x4xf32>
    %24 = vector.broadcast %22 : vector<8x1xf32> to vector<8x4xf32>
    %25 = vector.broadcast %23 : vector<1x4xf32> to vector<8x4xf32>
    %26 = arith.mulf %24, %25 : vector<8x4xf32>
    %27 = vector.extract_strided_slice %21 {offsets = [0, 1], sizes = [8, 1], strides = [1, 1]} : vector<8x6xf32> to vector<8x1xf32>
    %28 = vector.extract_strided_slice %0 {offsets = [1, 0], sizes = [1, 4], strides = [1, 1]} : vector<6x4xf32> to vector<1x4xf32>
    %29 = vector.broadcast %27 : vector<8x1xf32> to vector<8x4xf32>
    %30 = vector.broadcast %28 : vector<1x4xf32> to vector<8x4xf32>
    %31 = arith.mulf %29, %30 : vector<8x4xf32>
    %32 = vector.extract_strided_slice %21 {offsets = [0, 2], sizes = [8, 1], strides = [1, 1]} : vector<8x6xf32> to vector<8x1xf32>
    %33 = vector.extract_strided_slice %0 {offsets = [2, 0], sizes = [1, 4], strides = [1, 1]} : vector<6x4xf32> to vector<1x4xf32>
    %34 = vector.broadcast %32 : vector<8x1xf32> to vector<8x4xf32>
    %35 = vector.broadcast %33 : vector<1x4xf32> to vector<8x4xf32>
    %36 = arith.mulf %34, %35 : vector<8x4xf32>
    %37 = vector.extract_strided_slice %21 {offsets = [0, 3], sizes = [8, 1], strides = [1, 1]} : vector<8x6xf32> to vector<8x1xf32>
    %38 = vector.extract_strided_slice %0 {offsets = [3, 0], sizes = [1, 4], strides = [1, 1]} : vector<6x4xf32> to vector<1x4xf32>
    %39 = vector.broadcast %37 : vector<8x1xf32> to vector<8x4xf32>
    %40 = vector.broadcast %38 : vector<1x4xf32> to vector<8x4xf32>
    %41 = arith.mulf %39, %40 : vector<8x4xf32>
    %42 = vector.extract_strided_slice %21 {offsets = [0, 4], sizes = [8, 1], strides = [1, 1]} : vector<8x6xf32> to vector<8x1xf32>
    %43 = vector.extract_strided_slice %0 {offsets = [4, 0], sizes = [1, 4], strides = [1, 1]} : vector<6x4xf32> to vector<1x4xf32>
    %44 = vector.broadcast %42 : vector<8x1xf32> to vector<8x4xf32>
    %45 = vector.broadcast %43 : vector<1x4xf32> to vector<8x4xf32>
    %46 = arith.mulf %44, %45 : vector<8x4xf32>
    %47 = vector.extract_strided_slice %21 {offsets = [0, 5], sizes = [8, 1], strides = [1, 1]} : vector<8x6xf32> to vector<8x1xf32>
    %48 = vector.extract_strided_slice %0 {offsets = [5, 0], sizes = [1, 4], strides = [1, 1]} : vector<6x4xf32> to vector<1x4xf32>
    %49 = vector.broadcast %47 : vector<8x1xf32> to vector<8x4xf32>
    %50 = vector.broadcast %48 : vector<1x4xf32> to vector<8x4xf32>
    %51 = arith.mulf %49, %50 : vector<8x4xf32>
    %52 = arith.addf %26, %31 : vector<8x4xf32>
    %53 = arith.addf %36, %41 : vector<8x4xf32>
    %54 = arith.addf %46, %51 : vector<8x4xf32>
    %55 = arith.addf %52, %53 : vector<8x4xf32>
    %56 = arith.addf %55, %54 : vector<8x4xf32>
    %57 = vector.broadcast %1 : vector<1x4xf32> to vector<8x4xf32>
    %58 = arith.addf %56, %57 : vector<8x4xf32>
    %cst = arith.constant dense<0.000000e+00> : vector<8xf32>
    %59 = vector.multi_reduction <add>, %58, %cst [1] : vector<8x4xf32> to vector<8xf32>
    %60 = vector.shape_cast %59 : vector<8xf32> to vector<8x1xf32>
    %cst_22 = arith.constant 4.000000e+00 : f32
    %61 = vector.broadcast %cst_22 : f32 to vector<8x1xf32>
    %62 = arith.divf %60, %61 : vector<8x1xf32>
    %63 = vector.broadcast %62 : vector<8x1xf32> to vector<8x4xf32>
    %64 = arith.subf %58, %63 : vector<8x4xf32>
    %65 = arith.mulf %64, %64 : vector<8x4xf32>
    %cst_23 = arith.constant dense<0.000000e+00> : vector<8xf32>
    %66 = vector.multi_reduction <add>, %65, %cst_23 [1] : vector<8x4xf32> to vector<8xf32>
    %67 = vector.shape_cast %66 : vector<8xf32> to vector<8x1xf32>
    %cst_24 = arith.constant 4.000000e+00 : f32
    %68 = vector.broadcast %cst_24 : f32 to vector<8x1xf32>
    %69 = arith.divf %67, %68 : vector<8x1xf32>
    %70 = vector.broadcast %62 : vector<8x1xf32> to vector<8x4xf32>
    %71 = arith.subf %58, %70 : vector<8x4xf32>
    %cst_25 = arith.constant 9.99999974E-6 : f32
    %72 = vector.broadcast %cst_25 : f32 to vector<8x1xf32>
    %73 = arith.addf %69, %72 : vector<8x1xf32>
    %74 = math.rsqrt %73 : vector<8x1xf32>
    %75 = vector.broadcast %74 : vector<8x1xf32> to vector<8x4xf32>
    %76 = arith.mulf %71, %75 : vector<8x4xf32>
    %77 = vector.broadcast %2 : vector<1x4xf32> to vector<8x4xf32>
    %78 = arith.mulf %76, %77 : vector<8x4xf32>
    %79 = vector.extract_strided_slice %3 {offsets = [0, 0], sizes = [1, 4], strides = [1, 1]} : vector<4x4xf32> to vector<1x4xf32>
    %80 = vector.broadcast %79 : vector<1x4xf32> to vector<8x4xf32>
    %81 = arith.mulf %78, %80 : vector<8x4xf32>
    %c1_i32 = arith.constant 1 : i32
    %82 = tpu.dynamic_rotate %78 by %c1_i32 dim 0 : vector<8x4xf32>, i32 -> vector<8x4xf32>
    %c1_i32_26 = arith.constant 1 : i32
    %83 = vector.broadcast %c1_i32_26 : i32 to vector<8x4xi32>
    %84 = arith.cmpi sge, %20, %83 : vector<8x4xi32>
    %cst_27 = arith.constant 0.000000e+00 : f32
    %85 = vector.broadcast %cst_27 : f32 to vector<8x4xf32>
    %86 = arith.select %84, %82, %85 : vector<8x4xi1>, vector<8x4xf32>
    %87 = vector.extract_strided_slice %3 {offsets = [1, 0], sizes = [1, 4], strides = [1, 1]} : vector<4x4xf32> to vector<1x4xf32>
    %88 = vector.broadcast %87 : vector<1x4xf32> to vector<8x4xf32>
    %89 = arith.mulf %86, %88 : vector<8x4xf32>
    %90 = arith.addf %81, %89 : vector<8x4xf32>
    %c2_i32 = arith.constant 2 : i32
    %91 = tpu.dynamic_rotate %78 by %c2_i32 dim 0 : vector<8x4xf32>, i32 -> vector<8x4xf32>
    %c2_i32_28 = arith.constant 2 : i32
    %92 = vector.broadcast %c2_i32_28 : i32 to vector<8x4xi32>
    %93 = arith.cmpi sge, %20, %92 : vector<8x4xi32>
    %cst_29 = arith.constant 0.000000e+00 : f32
    %94 = vector.broadcast %cst_29 : f32 to vector<8x4xf32>
    %95 = arith.select %93, %91, %94 : vector<8x4xi1>, vector<8x4xf32>
    %96 = vector.extract_strided_slice %3 {offsets = [2, 0], sizes = [1, 4], strides = [1, 1]} : vector<4x4xf32> to vector<1x4xf32>
    %97 = vector.broadcast %96 : vector<1x4xf32> to vector<8x4xf32>
    %98 = arith.mulf %95, %97 : vector<8x4xf32>
    %99 = arith.addf %90, %98 : vector<8x4xf32>
    %c3_i32 = arith.constant 3 : i32
    %100 = tpu.dynamic_rotate %78 by %c3_i32 dim 0 : vector<8x4xf32>, i32 -> vector<8x4xf32>
    %c3_i32_30 = arith.constant 3 : i32
    %101 = vector.broadcast %c3_i32_30 : i32 to vector<8x4xi32>
    %102 = arith.cmpi sge, %20, %101 : vector<8x4xi32>
    %cst_31 = arith.constant 0.000000e+00 : f32
    %103 = vector.broadcast %cst_31 : f32 to vector<8x4xf32>
    %104 = arith.select %102, %100, %103 : vector<8x4xi1>, vector<8x4xf32>
    %105 = vector.extract_strided_slice %3 {offsets = [3, 0], sizes = [1, 4], strides = [1, 1]} : vector<4x4xf32> to vector<1x4xf32>
    %106 = vector.broadcast %105 : vector<1x4xf32> to vector<8x4xf32>
    %107 = arith.mulf %104, %106 : vector<8x4xf32>
    %108 = arith.addf %99, %107 : vector<8x4xf32>
    %109 = vector.broadcast %4 : vector<1x4xf32> to vector<8x4xf32>
    %110 = arith.addf %108, %109 : vector<8x4xf32>
    %111 = arith.negf %110 : vector<8x4xf32>
    %112 = math.exp %111 : vector<8x4xf32>
    %cst_32 = arith.constant 1.000000e+00 : f32
    %113 = vector.broadcast %cst_32 : f32 to vector<8x4xf32>
    %114 = arith.addf %113, %112 : vector<8x4xf32>
    %115 = arith.divf %113, %114 : vector<8x4xf32>
    %116 = arith.mulf %110, %115 : vector<8x4xf32>
    %117 = tpu.concatenate %116, %78 in 1 : vector<8x4xf32>, vector<8x4xf32> -> vector<8x8xf32>
    %118 = vector.extract_strided_slice %117 {offsets = [0, 0], sizes = [8, 1], strides = [1, 1]} : vector<8x8xf32> to vector<8x1xf32>
    %119 = vector.extract_strided_slice %5 {offsets = [0, 0], sizes = [1, 16], strides = [1, 1]} : vector<8x16xf32> to vector<1x16xf32>
    %120 = vector.broadcast %118 : vector<8x1xf32> to vector<8x16xf32>
    %121 = vector.broadcast %119 : vector<1x16xf32> to vector<8x16xf32>
    %122 = arith.mulf %120, %121 : vector<8x16xf32>
    %123 = vector.extract_strided_slice %117 {offsets = [0, 1], sizes = [8, 1], strides = [1, 1]} : vector<8x8xf32> to vector<8x1xf32>
    %124 = vector.extract_strided_slice %5 {offsets = [1, 0], sizes = [1, 16], strides = [1, 1]} : vector<8x16xf32> to vector<1x16xf32>
    %125 = vector.broadcast %123 : vector<8x1xf32> to vector<8x16xf32>
    %126 = vector.broadcast %124 : vector<1x16xf32> to vector<8x16xf32>
    %127 = arith.mulf %125, %126 : vector<8x16xf32>
    %128 = vector.extract_strided_slice %117 {offsets = [0, 2], sizes = [8, 1], strides = [1, 1]} : vector<8x8xf32> to vector<8x1xf32>
    %129 = vector.extract_strided_slice %5 {offsets = [2, 0], sizes = [1, 16], strides = [1, 1]} : vector<8x16xf32> to vector<1x16xf32>
    %130 = vector.broadcast %128 : vector<8x1xf32> to vector<8x16xf32>
    %131 = vector.broadcast %129 : vector<1x16xf32> to vector<8x16xf32>
    %132 = arith.mulf %130, %131 : vector<8x16xf32>
    %133 = vector.extract_strided_slice %117 {offsets = [0, 3], sizes = [8, 1], strides = [1, 1]} : vector<8x8xf32> to vector<8x1xf32>
    %134 = vector.extract_strided_slice %5 {offsets = [3, 0], sizes = [1, 16], strides = [1, 1]} : vector<8x16xf32> to vector<1x16xf32>
    %135 = vector.broadcast %133 : vector<8x1xf32> to vector<8x16xf32>
    %136 = vector.broadcast %134 : vector<1x16xf32> to vector<8x16xf32>
    %137 = arith.mulf %135, %136 : vector<8x16xf32>
    %138 = vector.extract_strided_slice %117 {offsets = [0, 4], sizes = [8, 1], strides = [1, 1]} : vector<8x8xf32> to vector<8x1xf32>
    %139 = vector.extract_strided_slice %5 {offsets = [4, 0], sizes = [1, 16], strides = [1, 1]} : vector<8x16xf32> to vector<1x16xf32>
    %140 = vector.broadcast %138 : vector<8x1xf32> to vector<8x16xf32>
    %141 = vector.broadcast %139 : vector<1x16xf32> to vector<8x16xf32>
    %142 = arith.mulf %140, %141 : vector<8x16xf32>
    %143 = vector.extract_strided_slice %117 {offsets = [0, 5], sizes = [8, 1], strides = [1, 1]} : vector<8x8xf32> to vector<8x1xf32>
    %144 = vector.extract_strided_slice %5 {offsets = [5, 0], sizes = [1, 16], strides = [1, 1]} : vector<8x16xf32> to vector<1x16xf32>
    %145 = vector.broadcast %143 : vector<8x1xf32> to vector<8x16xf32>
    %146 = vector.broadcast %144 : vector<1x16xf32> to vector<8x16xf32>
    %147 = arith.mulf %145, %146 : vector<8x16xf32>
    %148 = vector.extract_strided_slice %117 {offsets = [0, 6], sizes = [8, 1], strides = [1, 1]} : vector<8x8xf32> to vector<8x1xf32>
    %149 = vector.extract_strided_slice %5 {offsets = [6, 0], sizes = [1, 16], strides = [1, 1]} : vector<8x16xf32> to vector<1x16xf32>
    %150 = vector.broadcast %148 : vector<8x1xf32> to vector<8x16xf32>
    %151 = vector.broadcast %149 : vector<1x16xf32> to vector<8x16xf32>
    %152 = arith.mulf %150, %151 : vector<8x16xf32>
    %153 = vector.extract_strided_slice %117 {offsets = [0, 7], sizes = [8, 1], strides = [1, 1]} : vector<8x8xf32> to vector<8x1xf32>
    %154 = vector.extract_strided_slice %5 {offsets = [7, 0], sizes = [1, 16], strides = [1, 1]} : vector<8x16xf32> to vector<1x16xf32>
    %155 = vector.broadcast %153 : vector<8x1xf32> to vector<8x16xf32>
    %156 = vector.broadcast %154 : vector<1x16xf32> to vector<8x16xf32>
    %157 = arith.mulf %155, %156 : vector<8x16xf32>
    %158 = arith.addf %122, %127 : vector<8x16xf32>
    %159 = arith.addf %132, %137 : vector<8x16xf32>
    %160 = arith.addf %142, %147 : vector<8x16xf32>
    %161 = arith.addf %152, %157 : vector<8x16xf32>
    %162 = arith.addf %158, %159 : vector<8x16xf32>
    %163 = arith.addf %160, %161 : vector<8x16xf32>
    %164 = arith.addf %162, %163 : vector<8x16xf32>
    %165 = vector.broadcast %6 : vector<1x16xf32> to vector<8x16xf32>
    %166 = arith.addf %164, %165 : vector<8x16xf32>
    %c8_33 = arith.constant 8 : index
    %c0_34 = arith.constant 0 : index
    %167 = vector.load %arg0[%c8_33, %c0_34] : memref<16x6xf32, #tpu.memory_space<vmem>>, vector<8x6xf32>
    %168 = vector.extract_strided_slice %167 {offsets = [0, 0], sizes = [8, 1], strides = [1, 1]} : vector<8x6xf32> to vector<8x1xf32>
    %169 = vector.extract_strided_slice %0 {offsets = [0, 0], sizes = [1, 4], strides = [1, 1]} : vector<6x4xf32> to vector<1x4xf32>
    %170 = vector.broadcast %168 : vector<8x1xf32> to vector<8x4xf32>
    %171 = vector.broadcast %169 : vector<1x4xf32> to vector<8x4xf32>
    %172 = arith.mulf %170, %171 : vector<8x4xf32>
    %173 = vector.extract_strided_slice %167 {offsets = [0, 1], sizes = [8, 1], strides = [1, 1]} : vector<8x6xf32> to vector<8x1xf32>
    %174 = vector.extract_strided_slice %0 {offsets = [1, 0], sizes = [1, 4], strides = [1, 1]} : vector<6x4xf32> to vector<1x4xf32>
    %175 = vector.broadcast %173 : vector<8x1xf32> to vector<8x4xf32>
    %176 = vector.broadcast %174 : vector<1x4xf32> to vector<8x4xf32>
    %177 = arith.mulf %175, %176 : vector<8x4xf32>
    %178 = vector.extract_strided_slice %167 {offsets = [0, 2], sizes = [8, 1], strides = [1, 1]} : vector<8x6xf32> to vector<8x1xf32>
    %179 = vector.extract_strided_slice %0 {offsets = [2, 0], sizes = [1, 4], strides = [1, 1]} : vector<6x4xf32> to vector<1x4xf32>
    %180 = vector.broadcast %178 : vector<8x1xf32> to vector<8x4xf32>
    %181 = vector.broadcast %179 : vector<1x4xf32> to vector<8x4xf32>
    %182 = arith.mulf %180, %181 : vector<8x4xf32>
    %183 = vector.extract_strided_slice %167 {offsets = [0, 3], sizes = [8, 1], strides = [1, 1]} : vector<8x6xf32> to vector<8x1xf32>
    %184 = vector.extract_strided_slice %0 {offsets = [3, 0], sizes = [1, 4], strides = [1, 1]} : vector<6x4xf32> to vector<1x4xf32>
    %185 = vector.broadcast %183 : vector<8x1xf32> to vector<8x4xf32>
    %186 = vector.broadcast %184 : vector<1x4xf32> to vector<8x4xf32>
    %187 = arith.mulf %185, %186 : vector<8x4xf32>
    %188 = vector.extract_strided_slice %167 {offsets = [0, 4], sizes = [8, 1], strides = [1, 1]} : vector<8x6xf32> to vector<8x1xf32>
    %189 = vector.extract_strided_slice %0 {offsets = [4, 0], sizes = [1, 4], strides = [1, 1]} : vector<6x4xf32> to vector<1x4xf32>
    %190 = vector.broadcast %188 : vector<8x1xf32> to vector<8x4xf32>
    %191 = vector.broadcast %189 : vector<1x4xf32> to vector<8x4xf32>
    %192 = arith.mulf %190, %191 : vector<8x4xf32>
    %193 = vector.extract_strided_slice %167 {offsets = [0, 5], sizes = [8, 1], strides = [1, 1]} : vector<8x6xf32> to vector<8x1xf32>
    %194 = vector.extract_strided_slice %0 {offsets = [5, 0], sizes = [1, 4], strides = [1, 1]} : vector<6x4xf32> to vector<1x4xf32>
    %195 = vector.broadcast %193 : vector<8x1xf32> to vector<8x4xf32>
    %196 = vector.broadcast %194 : vector<1x4xf32> to vector<8x4xf32>
    %197 = arith.mulf %195, %196 : vector<8x4xf32>
    %198 = arith.addf %172, %177 : vector<8x4xf32>
    %199 = arith.addf %182, %187 : vector<8x4xf32>
    %200 = arith.addf %192, %197 : vector<8x4xf32>
    %201 = arith.addf %198, %199 : vector<8x4xf32>
    %202 = arith.addf %201, %200 : vector<8x4xf32>
    %203 = vector.broadcast %1 : vector<1x4xf32> to vector<8x4xf32>
    %204 = arith.addf %202, %203 : vector<8x4xf32>
    %cst_35 = arith.constant dense<0.000000e+00> : vector<8xf32>
    %205 = vector.multi_reduction <add>, %204, %cst_35 [1] : vector<8x4xf32> to vector<8xf32>
    %206 = vector.shape_cast %205 : vector<8xf32> to vector<8x1xf32>
    %cst_36 = arith.constant 4.000000e+00 : f32
    %207 = vector.broadcast %cst_36 : f32 to vector<8x1xf32>
    %208 = arith.divf %206, %207 : vector<8x1xf32>
    %209 = vector.broadcast %208 : vector<8x1xf32> to vector<8x4xf32>
    %210 = arith.subf %204, %209 : vector<8x4xf32>
    %211 = arith.mulf %210, %210 : vector<8x4xf32>
    %cst_37 = arith.constant dense<0.000000e+00> : vector<8xf32>
    %212 = vector.multi_reduction <add>, %211, %cst_37 [1] : vector<8x4xf32> to vector<8xf32>
    %213 = vector.shape_cast %212 : vector<8xf32> to vector<8x1xf32>
    %cst_38 = arith.constant 4.000000e+00 : f32
    %214 = vector.broadcast %cst_38 : f32 to vector<8x1xf32>
    %215 = arith.divf %213, %214 : vector<8x1xf32>
    %216 = vector.broadcast %208 : vector<8x1xf32> to vector<8x4xf32>
    %217 = arith.subf %204, %216 : vector<8x4xf32>
    %cst_39 = arith.constant 9.99999974E-6 : f32
    %218 = vector.broadcast %cst_39 : f32 to vector<8x1xf32>
    %219 = arith.addf %215, %218 : vector<8x1xf32>
    %220 = math.rsqrt %219 : vector<8x1xf32>
    %221 = vector.broadcast %220 : vector<8x1xf32> to vector<8x4xf32>
    %222 = arith.mulf %217, %221 : vector<8x4xf32>
    %223 = vector.broadcast %2 : vector<1x4xf32> to vector<8x4xf32>
    %224 = arith.mulf %222, %223 : vector<8x4xf32>
    %225 = vector.extract_strided_slice %3 {offsets = [0, 0], sizes = [1, 4], strides = [1, 1]} : vector<4x4xf32> to vector<1x4xf32>
    %226 = vector.broadcast %225 : vector<1x4xf32> to vector<8x4xf32>
    %227 = arith.mulf %224, %226 : vector<8x4xf32>
    %c1_i32_40 = arith.constant 1 : i32
    %228 = tpu.dynamic_rotate %224 by %c1_i32_40 dim 0 : vector<8x4xf32>, i32 -> vector<8x4xf32>
    %c1_i32_41 = arith.constant 1 : i32
    %229 = vector.broadcast %c1_i32_41 : i32 to vector<8x4xi32>
    %230 = arith.cmpi sge, %20, %229 : vector<8x4xi32>
    %cst_42 = arith.constant 0.000000e+00 : f32
    %231 = vector.broadcast %cst_42 : f32 to vector<8x4xf32>
    %232 = arith.select %230, %228, %231 : vector<8x4xi1>, vector<8x4xf32>
    %233 = vector.extract_strided_slice %3 {offsets = [1, 0], sizes = [1, 4], strides = [1, 1]} : vector<4x4xf32> to vector<1x4xf32>
    %234 = vector.broadcast %233 : vector<1x4xf32> to vector<8x4xf32>
    %235 = arith.mulf %232, %234 : vector<8x4xf32>
    %236 = arith.addf %227, %235 : vector<8x4xf32>
    %c2_i32_43 = arith.constant 2 : i32
    %237 = tpu.dynamic_rotate %224 by %c2_i32_43 dim 0 : vector<8x4xf32>, i32 -> vector<8x4xf32>
    %c2_i32_44 = arith.constant 2 : i32
    %238 = vector.broadcast %c2_i32_44 : i32 to vector<8x4xi32>
    %239 = arith.cmpi sge, %20, %238 : vector<8x4xi32>
    %cst_45 = arith.constant 0.000000e+00 : f32
    %240 = vector.broadcast %cst_45 : f32 to vector<8x4xf32>
    %241 = arith.select %239, %237, %240 : vector<8x4xi1>, vector<8x4xf32>
    %242 = vector.extract_strided_slice %3 {offsets = [2, 0], sizes = [1, 4], strides = [1, 1]} : vector<4x4xf32> to vector<1x4xf32>
    %243 = vector.broadcast %242 : vector<1x4xf32> to vector<8x4xf32>
    %244 = arith.mulf %241, %243 : vector<8x4xf32>
    %245 = arith.addf %236, %244 : vector<8x4xf32>
    %c3_i32_46 = arith.constant 3 : i32
    %246 = tpu.dynamic_rotate %224 by %c3_i32_46 dim 0 : vector<8x4xf32>, i32 -> vector<8x4xf32>
    %c3_i32_47 = arith.constant 3 : i32
    %247 = vector.broadcast %c3_i32_47 : i32 to vector<8x4xi32>
    %248 = arith.cmpi sge, %20, %247 : vector<8x4xi32>
    %cst_48 = arith.constant 0.000000e+00 : f32
    %249 = vector.broadcast %cst_48 : f32 to vector<8x4xf32>
    %250 = arith.select %248, %246, %249 : vector<8x4xi1>, vector<8x4xf32>
    %251 = vector.extract_strided_slice %3 {offsets = [3, 0], sizes = [1, 4], strides = [1, 1]} : vector<4x4xf32> to vector<1x4xf32>
    %252 = vector.broadcast %251 : vector<1x4xf32> to vector<8x4xf32>
    %253 = arith.mulf %250, %252 : vector<8x4xf32>
    %254 = arith.addf %245, %253 : vector<8x4xf32>
    %255 = vector.broadcast %4 : vector<1x4xf32> to vector<8x4xf32>
    %256 = arith.addf %254, %255 : vector<8x4xf32>
    %257 = arith.negf %256 : vector<8x4xf32>
    %258 = math.exp %257 : vector<8x4xf32>
    %cst_49 = arith.constant 1.000000e+00 : f32
    %259 = vector.broadcast %cst_49 : f32 to vector<8x4xf32>
    %260 = arith.addf %259, %258 : vector<8x4xf32>
    %261 = arith.divf %259, %260 : vector<8x4xf32>
    %262 = arith.mulf %256, %261 : vector<8x4xf32>
    %263 = tpu.concatenate %262, %224 in 1 : vector<8x4xf32>, vector<8x4xf32> -> vector<8x8xf32>
    %264 = vector.extract_strided_slice %263 {offsets = [0, 0], sizes = [8, 1], strides = [1, 1]} : vector<8x8xf32> to vector<8x1xf32>
    %265 = vector.extract_strided_slice %5 {offsets = [0, 0], sizes = [1, 16], strides = [1, 1]} : vector<8x16xf32> to vector<1x16xf32>
    %266 = vector.broadcast %264 : vector<8x1xf32> to vector<8x16xf32>
    %267 = vector.broadcast %265 : vector<1x16xf32> to vector<8x16xf32>
    %268 = arith.mulf %266, %267 : vector<8x16xf32>
    %269 = vector.extract_strided_slice %263 {offsets = [0, 1], sizes = [8, 1], strides = [1, 1]} : vector<8x8xf32> to vector<8x1xf32>
    %270 = vector.extract_strided_slice %5 {offsets = [1, 0], sizes = [1, 16], strides = [1, 1]} : vector<8x16xf32> to vector<1x16xf32>
    %271 = vector.broadcast %269 : vector<8x1xf32> to vector<8x16xf32>
    %272 = vector.broadcast %270 : vector<1x16xf32> to vector<8x16xf32>
    %273 = arith.mulf %271, %272 : vector<8x16xf32>
    %274 = vector.extract_strided_slice %263 {offsets = [0, 2], sizes = [8, 1], strides = [1, 1]} : vector<8x8xf32> to vector<8x1xf32>
    %275 = vector.extract_strided_slice %5 {offsets = [2, 0], sizes = [1, 16], strides = [1, 1]} : vector<8x16xf32> to vector<1x16xf32>
    %276 = vector.broadcast %274 : vector<8x1xf32> to vector<8x16xf32>
    %277 = vector.broadcast %275 : vector<1x16xf32> to vector<8x16xf32>
    %278 = arith.mulf %276, %277 : vector<8x16xf32>
    %279 = vector.extract_strided_slice %263 {offsets = [0, 3], sizes = [8, 1], strides = [1, 1]} : vector<8x8xf32> to vector<8x1xf32>
    %280 = vector.extract_strided_slice %5 {offsets = [3, 0], sizes = [1, 16], strides = [1, 1]} : vector<8x16xf32> to vector<1x16xf32>
    %281 = vector.broadcast %279 : vector<8x1xf32> to vector<8x16xf32>
    %282 = vector.broadcast %280 : vector<1x16xf32> to vector<8x16xf32>
    %283 = arith.mulf %281, %282 : vector<8x16xf32>
    %284 = vector.extract_strided_slice %263 {offsets = [0, 4], sizes = [8, 1], strides = [1, 1]} : vector<8x8xf32> to vector<8x1xf32>
    %285 = vector.extract_strided_slice %5 {offsets = [4, 0], sizes = [1, 16], strides = [1, 1]} : vector<8x16xf32> to vector<1x16xf32>
    %286 = vector.broadcast %284 : vector<8x1xf32> to vector<8x16xf32>
    %287 = vector.broadcast %285 : vector<1x16xf32> to vector<8x16xf32>
    %288 = arith.mulf %286, %287 : vector<8x16xf32>
    %289 = vector.extract_strided_slice %263 {offsets = [0, 5], sizes = [8, 1], strides = [1, 1]} : vector<8x8xf32> to vector<8x1xf32>
    %290 = vector.extract_strided_slice %5 {offsets = [5, 0], sizes = [1, 16], strides = [1, 1]} : vector<8x16xf32> to vector<1x16xf32>
    %291 = vector.broadcast %289 : vector<8x1xf32> to vector<8x16xf32>
    %292 = vector.broadcast %290 : vector<1x16xf32> to vector<8x16xf32>
    %293 = arith.mulf %291, %292 : vector<8x16xf32>
    %294 = vector.extract_strided_slice %263 {offsets = [0, 6], sizes = [8, 1], strides = [1, 1]} : vector<8x8xf32> to vector<8x1xf32>
    %295 = vector.extract_strided_slice %5 {offsets = [6, 0], sizes = [1, 16], strides = [1, 1]} : vector<8x16xf32> to vector<1x16xf32>
    %296 = vector.broadcast %294 : vector<8x1xf32> to vector<8x16xf32>
    %297 = vector.broadcast %295 : vector<1x16xf32> to vector<8x16xf32>
    %298 = arith.mulf %296, %297 : vector<8x16xf32>
    %299 = vector.extract_strided_slice %263 {offsets = [0, 7], sizes = [8, 1], strides = [1, 1]} : vector<8x8xf32> to vector<8x1xf32>
    %300 = vector.extract_strided_slice %5 {offsets = [7, 0], sizes = [1, 16], strides = [1, 1]} : vector<8x16xf32> to vector<1x16xf32>
    %301 = vector.broadcast %299 : vector<8x1xf32> to vector<8x16xf32>
    %302 = vector.broadcast %300 : vector<1x16xf32> to vector<8x16xf32>
    %303 = arith.mulf %301, %302 : vector<8x16xf32>
    %304 = arith.addf %268, %273 : vector<8x16xf32>
    %305 = arith.addf %278, %283 : vector<8x16xf32>
    %306 = arith.addf %288, %293 : vector<8x16xf32>
    %307 = arith.addf %298, %303 : vector<8x16xf32>
    %308 = arith.addf %304, %305 : vector<8x16xf32>
    %309 = arith.addf %306, %307 : vector<8x16xf32>
    %310 = arith.addf %308, %309 : vector<8x16xf32>
    %311 = vector.broadcast %6 : vector<1x16xf32> to vector<8x16xf32>
    %312 = arith.addf %310, %311 : vector<8x16xf32>
    %313 = vector.extract_strided_slice %166 {offsets = [0, 0], sizes = [1, 16], strides = [1, 1]} : vector<8x16xf32> to vector<1x16xf32>
    %314 = vector.extract_strided_slice %312 {offsets = [0, 0], sizes = [1, 16], strides = [1, 1]} : vector<8x16xf32> to vector<1x16xf32>
    %315 = tpu.concatenate %313, %314 in 0 : vector<1x16xf32>, vector<1x16xf32> -> vector<2x16xf32>
    %316 = vector.extract_strided_slice %166 {offsets = [1, 0], sizes = [1, 16], strides = [1, 1]} : vector<8x16xf32> to vector<1x16xf32>
    %317 = vector.extract_strided_slice %312 {offsets = [1, 0], sizes = [1, 16], strides = [1, 1]} : vector<8x16xf32> to vector<1x16xf32>
    %318 = tpu.concatenate %316, %317 in 0 : vector<1x16xf32>, vector<1x16xf32> -> vector<2x16xf32>
    %319 = vector.extract_strided_slice %166 {offsets = [2, 0], sizes = [1, 16], strides = [1, 1]} : vector<8x16xf32> to vector<1x16xf32>
    %320 = vector.extract_strided_slice %312 {offsets = [2, 0], sizes = [1, 16], strides = [1, 1]} : vector<8x16xf32> to vector<1x16xf32>
    %321 = tpu.concatenate %319, %320 in 0 : vector<1x16xf32>, vector<1x16xf32> -> vector<2x16xf32>
    %322 = vector.extract_strided_slice %166 {offsets = [3, 0], sizes = [1, 16], strides = [1, 1]} : vector<8x16xf32> to vector<1x16xf32>
    %323 = vector.extract_strided_slice %312 {offsets = [3, 0], sizes = [1, 16], strides = [1, 1]} : vector<8x16xf32> to vector<1x16xf32>
    %324 = tpu.concatenate %322, %323 in 0 : vector<1x16xf32>, vector<1x16xf32> -> vector<2x16xf32>
    %325 = vector.extract_strided_slice %166 {offsets = [4, 0], sizes = [1, 16], strides = [1, 1]} : vector<8x16xf32> to vector<1x16xf32>
    %326 = vector.extract_strided_slice %312 {offsets = [4, 0], sizes = [1, 16], strides = [1, 1]} : vector<8x16xf32> to vector<1x16xf32>
    %327 = tpu.concatenate %325, %326 in 0 : vector<1x16xf32>, vector<1x16xf32> -> vector<2x16xf32>
    %328 = vector.extract_strided_slice %166 {offsets = [5, 0], sizes = [1, 16], strides = [1, 1]} : vector<8x16xf32> to vector<1x16xf32>
    %329 = vector.extract_strided_slice %312 {offsets = [5, 0], sizes = [1, 16], strides = [1, 1]} : vector<8x16xf32> to vector<1x16xf32>
    %330 = tpu.concatenate %328, %329 in 0 : vector<1x16xf32>, vector<1x16xf32> -> vector<2x16xf32>
    %331 = vector.extract_strided_slice %166 {offsets = [6, 0], sizes = [1, 16], strides = [1, 1]} : vector<8x16xf32> to vector<1x16xf32>
    %332 = vector.extract_strided_slice %312 {offsets = [6, 0], sizes = [1, 16], strides = [1, 1]} : vector<8x16xf32> to vector<1x16xf32>
    %333 = tpu.concatenate %331, %332 in 0 : vector<1x16xf32>, vector<1x16xf32> -> vector<2x16xf32>
    %334 = vector.extract_strided_slice %166 {offsets = [7, 0], sizes = [1, 16], strides = [1, 1]} : vector<8x16xf32> to vector<1x16xf32>
    %335 = vector.extract_strided_slice %312 {offsets = [7, 0], sizes = [1, 16], strides = [1, 1]} : vector<8x16xf32> to vector<1x16xf32>
    %336 = tpu.concatenate %334, %335 in 0 : vector<1x16xf32>, vector<1x16xf32> -> vector<2x16xf32>
    %cst_50 = arith.constant 0.000000e+00 : f32
    %337 = vector.broadcast %cst_50 : f32 to vector<2x4xf32>
    %cst_51 = arith.constant 0.000000e+00 : f32
    %338 = vector.broadcast %cst_51 : f32 to vector<2x4xf32>
    %cst_52 = arith.constant 0.000000e+00 : f32
    %339 = vector.broadcast %cst_52 : f32 to vector<2x4xf32>
    %cst_53 = arith.constant 0.000000e+00 : f32
    %340 = vector.broadcast %cst_53 : f32 to vector<2x4xf32>
    %341 = vector.extract_strided_slice %337 {offsets = [0, 0], sizes = [2, 1], strides = [1, 1]} : vector<2x4xf32> to vector<2x1xf32>
    %342 = vector.extract_strided_slice %7 {offsets = [0, 0], sizes = [1, 16], strides = [1, 1]} : vector<4x16xf32> to vector<1x16xf32>
    %343 = vector.broadcast %341 : vector<2x1xf32> to vector<2x16xf32>
    %344 = vector.broadcast %342 : vector<1x16xf32> to vector<2x16xf32>
    %345 = arith.mulf %343, %344 : vector<2x16xf32>
    %346 = vector.extract_strided_slice %337 {offsets = [0, 1], sizes = [2, 1], strides = [1, 1]} : vector<2x4xf32> to vector<2x1xf32>
    %347 = vector.extract_strided_slice %7 {offsets = [1, 0], sizes = [1, 16], strides = [1, 1]} : vector<4x16xf32> to vector<1x16xf32>
    %348 = vector.broadcast %346 : vector<2x1xf32> to vector<2x16xf32>
    %349 = vector.broadcast %347 : vector<1x16xf32> to vector<2x16xf32>
    %350 = arith.mulf %348, %349 : vector<2x16xf32>
    %351 = vector.extract_strided_slice %337 {offsets = [0, 2], sizes = [2, 1], strides = [1, 1]} : vector<2x4xf32> to vector<2x1xf32>
    %352 = vector.extract_strided_slice %7 {offsets = [2, 0], sizes = [1, 16], strides = [1, 1]} : vector<4x16xf32> to vector<1x16xf32>
    %353 = vector.broadcast %351 : vector<2x1xf32> to vector<2x16xf32>
    %354 = vector.broadcast %352 : vector<1x16xf32> to vector<2x16xf32>
    %355 = arith.mulf %353, %354 : vector<2x16xf32>
    %356 = vector.extract_strided_slice %337 {offsets = [0, 3], sizes = [2, 1], strides = [1, 1]} : vector<2x4xf32> to vector<2x1xf32>
    %357 = vector.extract_strided_slice %7 {offsets = [3, 0], sizes = [1, 16], strides = [1, 1]} : vector<4x16xf32> to vector<1x16xf32>
    %358 = vector.broadcast %356 : vector<2x1xf32> to vector<2x16xf32>
    %359 = vector.broadcast %357 : vector<1x16xf32> to vector<2x16xf32>
    %360 = arith.mulf %358, %359 : vector<2x16xf32>
    %361 = arith.addf %345, %350 : vector<2x16xf32>
    %362 = arith.addf %355, %360 : vector<2x16xf32>
    %363 = arith.addf %361, %362 : vector<2x16xf32>
    %364 = arith.addf %315, %363 : vector<2x16xf32>
    %365 = vector.extract_strided_slice %364 {offsets = [0, 0], sizes = [2, 4], strides = [1, 1]} : vector<2x16xf32> to vector<2x4xf32>
    %366 = vector.extract_strided_slice %364 {offsets = [0, 4], sizes = [2, 4], strides = [1, 1]} : vector<2x16xf32> to vector<2x4xf32>
    %367 = vector.extract_strided_slice %364 {offsets = [0, 8], sizes = [2, 4], strides = [1, 1]} : vector<2x16xf32> to vector<2x4xf32>
    %368 = vector.extract_strided_slice %364 {offsets = [0, 12], sizes = [2, 4], strides = [1, 1]} : vector<2x16xf32> to vector<2x4xf32>
    %cst_54 = arith.constant 0.000000e+00 : f32
    %369 = vector.broadcast %cst_54 : f32 to vector<2x4xf32>
    %370 = arith.minimumf %366, %369 : vector<2x4xf32>
    %371 = math.absf %366 : vector<2x4xf32>
    %cst_55 = arith.constant 0.000000e+00 : f32
    %372 = vector.broadcast %cst_55 : f32 to vector<2x4xf32>
    %373 = arith.subf %372, %371 : vector<2x4xf32>
    %374 = math.exp %373 : vector<2x4xf32>
    %cst_56 = arith.constant 1.000000e+00 : f32
    %375 = vector.broadcast %cst_56 : f32 to vector<2x4xf32>
    %376 = arith.addf %375, %374 : vector<2x4xf32>
    %377 = math.log %376 : vector<2x4xf32>
    %378 = arith.subf %370, %377 : vector<2x4xf32>
    %379 = arith.addf %340, %378 : vector<2x4xf32>
    %380 = arith.subf %365, %365 : vector<2x4xf32>
    %381 = math.exp %380 : vector<2x4xf32>
    %382 = arith.subf %379, %365 : vector<2x4xf32>
    %383 = math.exp %382 : vector<2x4xf32>
    %384 = arith.mulf %383, %338 : vector<2x4xf32>
    %385 = math.tanh %367 : vector<2x4xf32>
    %386 = arith.mulf %381, %385 : vector<2x4xf32>
    %387 = arith.addf %384, %386 : vector<2x4xf32>
    %388 = arith.mulf %383, %339 : vector<2x4xf32>
    %389 = arith.addf %388, %381 : vector<2x4xf32>
    %390 = arith.negf %368 : vector<2x4xf32>
    %391 = math.exp %390 : vector<2x4xf32>
    %cst_57 = arith.constant 1.000000e+00 : f32
    %392 = vector.broadcast %cst_57 : f32 to vector<2x4xf32>
    %393 = arith.addf %392, %391 : vector<2x4xf32>
    %394 = arith.divf %392, %393 : vector<2x4xf32>
    %395 = arith.mulf %394, %387 : vector<2x4xf32>
    %396 = tpu.reciprocal %389 {approx = true} : vector<2x4xf32> -> vector<2x4xf32>
    %397 = arith.mulf %395, %396 : vector<2x4xf32>
    %398 = vector.extract_strided_slice %397 {offsets = [0, 0], sizes = [2, 1], strides = [1, 1]} : vector<2x4xf32> to vector<2x1xf32>
    %399 = vector.extract_strided_slice %7 {offsets = [0, 0], sizes = [1, 16], strides = [1, 1]} : vector<4x16xf32> to vector<1x16xf32>
    %400 = vector.broadcast %398 : vector<2x1xf32> to vector<2x16xf32>
    %401 = vector.broadcast %399 : vector<1x16xf32> to vector<2x16xf32>
    %402 = arith.mulf %400, %401 : vector<2x16xf32>
    %403 = vector.extract_strided_slice %397 {offsets = [0, 1], sizes = [2, 1], strides = [1, 1]} : vector<2x4xf32> to vector<2x1xf32>
    %404 = vector.extract_strided_slice %7 {offsets = [1, 0], sizes = [1, 16], strides = [1, 1]} : vector<4x16xf32> to vector<1x16xf32>
    %405 = vector.broadcast %403 : vector<2x1xf32> to vector<2x16xf32>
    %406 = vector.broadcast %404 : vector<1x16xf32> to vector<2x16xf32>
    %407 = arith.mulf %405, %406 : vector<2x16xf32>
    %408 = vector.extract_strided_slice %397 {offsets = [0, 2], sizes = [2, 1], strides = [1, 1]} : vector<2x4xf32> to vector<2x1xf32>
    %409 = vector.extract_strided_slice %7 {offsets = [2, 0], sizes = [1, 16], strides = [1, 1]} : vector<4x16xf32> to vector<1x16xf32>
    %410 = vector.broadcast %408 : vector<2x1xf32> to vector<2x16xf32>
    %411 = vector.broadcast %409 : vector<1x16xf32> to vector<2x16xf32>
    %412 = arith.mulf %410, %411 : vector<2x16xf32>
    %413 = vector.extract_strided_slice %397 {offsets = [0, 3], sizes = [2, 1], strides = [1, 1]} : vector<2x4xf32> to vector<2x1xf32>
    %414 = vector.extract_strided_slice %7 {offsets = [3, 0], sizes = [1, 16], strides = [1, 1]} : vector<4x16xf32> to vector<1x16xf32>
    %415 = vector.broadcast %413 : vector<2x1xf32> to vector<2x16xf32>
    %416 = vector.broadcast %414 : vector<1x16xf32> to vector<2x16xf32>
    %417 = arith.mulf %415, %416 : vector<2x16xf32>
    %418 = arith.addf %402, %407 : vector<2x16xf32>
    %419 = arith.addf %412, %417 : vector<2x16xf32>
    %420 = arith.addf %418, %419 : vector<2x16xf32>
    %421 = arith.addf %318, %420 : vector<2x16xf32>
    %422 = vector.extract_strided_slice %421 {offsets = [0, 0], sizes = [2, 4], strides = [1, 1]} : vector<2x16xf32> to vector<2x4xf32>
    %423 = vector.extract_strided_slice %421 {offsets = [0, 4], sizes = [2, 4], strides = [1, 1]} : vector<2x16xf32> to vector<2x4xf32>
    %424 = vector.extract_strided_slice %421 {offsets = [0, 8], sizes = [2, 4], strides = [1, 1]} : vector<2x16xf32> to vector<2x4xf32>
    %425 = vector.extract_strided_slice %421 {offsets = [0, 12], sizes = [2, 4], strides = [1, 1]} : vector<2x16xf32> to vector<2x4xf32>
    %cst_58 = arith.constant 0.000000e+00 : f32
    %426 = vector.broadcast %cst_58 : f32 to vector<2x4xf32>
    %427 = arith.minimumf %423, %426 : vector<2x4xf32>
    %428 = math.absf %423 : vector<2x4xf32>
    %cst_59 = arith.constant 0.000000e+00 : f32
    %429 = vector.broadcast %cst_59 : f32 to vector<2x4xf32>
    %430 = arith.subf %429, %428 : vector<2x4xf32>
    %431 = math.exp %430 : vector<2x4xf32>
    %cst_60 = arith.constant 1.000000e+00 : f32
    %432 = vector.broadcast %cst_60 : f32 to vector<2x4xf32>
    %433 = arith.addf %432, %431 : vector<2x4xf32>
    %434 = math.log %433 : vector<2x4xf32>
    %435 = arith.subf %427, %434 : vector<2x4xf32>
    %436 = arith.addf %365, %435 : vector<2x4xf32>
    %437 = arith.maximumf %422, %436 : vector<2x4xf32>
    %438 = arith.subf %422, %437 : vector<2x4xf32>
    %439 = math.exp %438 : vector<2x4xf32>
    %440 = arith.subf %436, %437 : vector<2x4xf32>
    %441 = math.exp %440 : vector<2x4xf32>
    %442 = arith.mulf %441, %387 : vector<2x4xf32>
    %443 = math.tanh %424 : vector<2x4xf32>
    %444 = arith.mulf %439, %443 : vector<2x4xf32>
    %445 = arith.addf %442, %444 : vector<2x4xf32>
    %446 = arith.mulf %441, %389 : vector<2x4xf32>
    %447 = arith.addf %446, %439 : vector<2x4xf32>
    %448 = arith.negf %425 : vector<2x4xf32>
    %449 = math.exp %448 : vector<2x4xf32>
    %cst_61 = arith.constant 1.000000e+00 : f32
    %450 = vector.broadcast %cst_61 : f32 to vector<2x4xf32>
    %451 = arith.addf %450, %449 : vector<2x4xf32>
    %452 = arith.divf %450, %451 : vector<2x4xf32>
    %453 = arith.mulf %452, %445 : vector<2x4xf32>
    %454 = tpu.reciprocal %447 {approx = true} : vector<2x4xf32> -> vector<2x4xf32>
    %455 = arith.mulf %453, %454 : vector<2x4xf32>
    %456 = vector.extract_strided_slice %455 {offsets = [0, 0], sizes = [2, 1], strides = [1, 1]} : vector<2x4xf32> to vector<2x1xf32>
    %457 = vector.extract_strided_slice %7 {offsets = [0, 0], sizes = [1, 16], strides = [1, 1]} : vector<4x16xf32> to vector<1x16xf32>
    %458 = vector.broadcast %456 : vector<2x1xf32> to vector<2x16xf32>
    %459 = vector.broadcast %457 : vector<1x16xf32> to vector<2x16xf32>
    %460 = arith.mulf %458, %459 : vector<2x16xf32>
    %461 = vector.extract_strided_slice %455 {offsets = [0, 1], sizes = [2, 1], strides = [1, 1]} : vector<2x4xf32> to vector<2x1xf32>
    %462 = vector.extract_strided_slice %7 {offsets = [1, 0], sizes = [1, 16], strides = [1, 1]} : vector<4x16xf32> to vector<1x16xf32>
    %463 = vector.broadcast %461 : vector<2x1xf32> to vector<2x16xf32>
    %464 = vector.broadcast %462 : vector<1x16xf32> to vector<2x16xf32>
    %465 = arith.mulf %463, %464 : vector<2x16xf32>
    %466 = vector.extract_strided_slice %455 {offsets = [0, 2], sizes = [2, 1], strides = [1, 1]} : vector<2x4xf32> to vector<2x1xf32>
    %467 = vector.extract_strided_slice %7 {offsets = [2, 0], sizes = [1, 16], strides = [1, 1]} : vector<4x16xf32> to vector<1x16xf32>
    %468 = vector.broadcast %466 : vector<2x1xf32> to vector<2x16xf32>
    %469 = vector.broadcast %467 : vector<1x16xf32> to vector<2x16xf32>
    %470 = arith.mulf %468, %469 : vector<2x16xf32>
    %471 = vector.extract_strided_slice %455 {offsets = [0, 3], sizes = [2, 1], strides = [1, 1]} : vector<2x4xf32> to vector<2x1xf32>
    %472 = vector.extract_strided_slice %7 {offsets = [3, 0], sizes = [1, 16], strides = [1, 1]} : vector<4x16xf32> to vector<1x16xf32>
    %473 = vector.broadcast %471 : vector<2x1xf32> to vector<2x16xf32>
    %474 = vector.broadcast %472 : vector<1x16xf32> to vector<2x16xf32>
    %475 = arith.mulf %473, %474 : vector<2x16xf32>
    %476 = arith.addf %460, %465 : vector<2x16xf32>
    %477 = arith.addf %470, %475 : vector<2x16xf32>
    %478 = arith.addf %476, %477 : vector<2x16xf32>
    %479 = arith.addf %321, %478 : vector<2x16xf32>
    %480 = vector.extract_strided_slice %479 {offsets = [0, 0], sizes = [2, 4], strides = [1, 1]} : vector<2x16xf32> to vector<2x4xf32>
    %481 = vector.extract_strided_slice %479 {offsets = [0, 4], sizes = [2, 4], strides = [1, 1]} : vector<2x16xf32> to vector<2x4xf32>
    %482 = vector.extract_strided_slice %479 {offsets = [0, 8], sizes = [2, 4], strides = [1, 1]} : vector<2x16xf32> to vector<2x4xf32>
    %483 = vector.extract_strided_slice %479 {offsets = [0, 12], sizes = [2, 4], strides = [1, 1]} : vector<2x16xf32> to vector<2x4xf32>
    %cst_62 = arith.constant 0.000000e+00 : f32
    %484 = vector.broadcast %cst_62 : f32 to vector<2x4xf32>
    %485 = arith.minimumf %481, %484 : vector<2x4xf32>
    %486 = math.absf %481 : vector<2x4xf32>
    %cst_63 = arith.constant 0.000000e+00 : f32
    %487 = vector.broadcast %cst_63 : f32 to vector<2x4xf32>
    %488 = arith.subf %487, %486 : vector<2x4xf32>
    %489 = math.exp %488 : vector<2x4xf32>
    %cst_64 = arith.constant 1.000000e+00 : f32
    %490 = vector.broadcast %cst_64 : f32 to vector<2x4xf32>
    %491 = arith.addf %490, %489 : vector<2x4xf32>
    %492 = math.log %491 : vector<2x4xf32>
    %493 = arith.subf %485, %492 : vector<2x4xf32>
    %494 = arith.addf %437, %493 : vector<2x4xf32>
    %495 = arith.maximumf %480, %494 : vector<2x4xf32>
    %496 = arith.subf %480, %495 : vector<2x4xf32>
    %497 = math.exp %496 : vector<2x4xf32>
    %498 = arith.subf %494, %495 : vector<2x4xf32>
    %499 = math.exp %498 : vector<2x4xf32>
    %500 = arith.mulf %499, %445 : vector<2x4xf32>
    %501 = math.tanh %482 : vector<2x4xf32>
    %502 = arith.mulf %497, %501 : vector<2x4xf32>
    %503 = arith.addf %500, %502 : vector<2x4xf32>
    %504 = arith.mulf %499, %447 : vector<2x4xf32>
    %505 = arith.addf %504, %497 : vector<2x4xf32>
    %506 = arith.negf %483 : vector<2x4xf32>
    %507 = math.exp %506 : vector<2x4xf32>
    %cst_65 = arith.constant 1.000000e+00 : f32
    %508 = vector.broadcast %cst_65 : f32 to vector<2x4xf32>
    %509 = arith.addf %508, %507 : vector<2x4xf32>
    %510 = arith.divf %508, %509 : vector<2x4xf32>
    %511 = arith.mulf %510, %503 : vector<2x4xf32>
    %512 = tpu.reciprocal %505 {approx = true} : vector<2x4xf32> -> vector<2x4xf32>
    %513 = arith.mulf %511, %512 : vector<2x4xf32>
    %514 = vector.extract_strided_slice %513 {offsets = [0, 0], sizes = [2, 1], strides = [1, 1]} : vector<2x4xf32> to vector<2x1xf32>
    %515 = vector.extract_strided_slice %7 {offsets = [0, 0], sizes = [1, 16], strides = [1, 1]} : vector<4x16xf32> to vector<1x16xf32>
    %516 = vector.broadcast %514 : vector<2x1xf32> to vector<2x16xf32>
    %517 = vector.broadcast %515 : vector<1x16xf32> to vector<2x16xf32>
    %518 = arith.mulf %516, %517 : vector<2x16xf32>
    %519 = vector.extract_strided_slice %513 {offsets = [0, 1], sizes = [2, 1], strides = [1, 1]} : vector<2x4xf32> to vector<2x1xf32>
    %520 = vector.extract_strided_slice %7 {offsets = [1, 0], sizes = [1, 16], strides = [1, 1]} : vector<4x16xf32> to vector<1x16xf32>
    %521 = vector.broadcast %519 : vector<2x1xf32> to vector<2x16xf32>
    %522 = vector.broadcast %520 : vector<1x16xf32> to vector<2x16xf32>
    %523 = arith.mulf %521, %522 : vector<2x16xf32>
    %524 = vector.extract_strided_slice %513 {offsets = [0, 2], sizes = [2, 1], strides = [1, 1]} : vector<2x4xf32> to vector<2x1xf32>
    %525 = vector.extract_strided_slice %7 {offsets = [2, 0], sizes = [1, 16], strides = [1, 1]} : vector<4x16xf32> to vector<1x16xf32>
    %526 = vector.broadcast %524 : vector<2x1xf32> to vector<2x16xf32>
    %527 = vector.broadcast %525 : vector<1x16xf32> to vector<2x16xf32>
    %528 = arith.mulf %526, %527 : vector<2x16xf32>
    %529 = vector.extract_strided_slice %513 {offsets = [0, 3], sizes = [2, 1], strides = [1, 1]} : vector<2x4xf32> to vector<2x1xf32>
    %530 = vector.extract_strided_slice %7 {offsets = [3, 0], sizes = [1, 16], strides = [1, 1]} : vector<4x16xf32> to vector<1x16xf32>
    %531 = vector.broadcast %529 : vector<2x1xf32> to vector<2x16xf32>
    %532 = vector.broadcast %530 : vector<1x16xf32> to vector<2x16xf32>
    %533 = arith.mulf %531, %532 : vector<2x16xf32>
    %534 = arith.addf %518, %523 : vector<2x16xf32>
    %535 = arith.addf %528, %533 : vector<2x16xf32>
    %536 = arith.addf %534, %535 : vector<2x16xf32>
    %537 = arith.addf %324, %536 : vector<2x16xf32>
    %538 = vector.extract_strided_slice %537 {offsets = [0, 0], sizes = [2, 4], strides = [1, 1]} : vector<2x16xf32> to vector<2x4xf32>
    %539 = vector.extract_strided_slice %537 {offsets = [0, 4], sizes = [2, 4], strides = [1, 1]} : vector<2x16xf32> to vector<2x4xf32>
    %540 = vector.extract_strided_slice %537 {offsets = [0, 8], sizes = [2, 4], strides = [1, 1]} : vector<2x16xf32> to vector<2x4xf32>
    %541 = vector.extract_strided_slice %537 {offsets = [0, 12], sizes = [2, 4], strides = [1, 1]} : vector<2x16xf32> to vector<2x4xf32>
    %cst_66 = arith.constant 0.000000e+00 : f32
    %542 = vector.broadcast %cst_66 : f32 to vector<2x4xf32>
    %543 = arith.minimumf %539, %542 : vector<2x4xf32>
    %544 = math.absf %539 : vector<2x4xf32>
    %cst_67 = arith.constant 0.000000e+00 : f32
    %545 = vector.broadcast %cst_67 : f32 to vector<2x4xf32>
    %546 = arith.subf %545, %544 : vector<2x4xf32>
    %547 = math.exp %546 : vector<2x4xf32>
    %cst_68 = arith.constant 1.000000e+00 : f32
    %548 = vector.broadcast %cst_68 : f32 to vector<2x4xf32>
    %549 = arith.addf %548, %547 : vector<2x4xf32>
    %550 = math.log %549 : vector<2x4xf32>
    %551 = arith.subf %543, %550 : vector<2x4xf32>
    %552 = arith.addf %495, %551 : vector<2x4xf32>
    %553 = arith.maximumf %538, %552 : vector<2x4xf32>
    %554 = arith.subf %538, %553 : vector<2x4xf32>
    %555 = math.exp %554 : vector<2x4xf32>
    %556 = arith.subf %552, %553 : vector<2x4xf32>
    %557 = math.exp %556 : vector<2x4xf32>
    %558 = arith.mulf %557, %503 : vector<2x4xf32>
    %559 = math.tanh %540 : vector<2x4xf32>
    %560 = arith.mulf %555, %559 : vector<2x4xf32>
    %561 = arith.addf %558, %560 : vector<2x4xf32>
    %562 = arith.mulf %557, %505 : vector<2x4xf32>
    %563 = arith.addf %562, %555 : vector<2x4xf32>
    %564 = arith.negf %541 : vector<2x4xf32>
    %565 = math.exp %564 : vector<2x4xf32>
    %cst_69 = arith.constant 1.000000e+00 : f32
    %566 = vector.broadcast %cst_69 : f32 to vector<2x4xf32>
    %567 = arith.addf %566, %565 : vector<2x4xf32>
    %568 = arith.divf %566, %567 : vector<2x4xf32>
    %569 = arith.mulf %568, %561 : vector<2x4xf32>
    %570 = tpu.reciprocal %563 {approx = true} : vector<2x4xf32> -> vector<2x4xf32>
    %571 = arith.mulf %569, %570 : vector<2x4xf32>
    %572 = vector.extract_strided_slice %571 {offsets = [0, 0], sizes = [2, 1], strides = [1, 1]} : vector<2x4xf32> to vector<2x1xf32>
    %573 = vector.extract_strided_slice %7 {offsets = [0, 0], sizes = [1, 16], strides = [1, 1]} : vector<4x16xf32> to vector<1x16xf32>
    %574 = vector.broadcast %572 : vector<2x1xf32> to vector<2x16xf32>
    %575 = vector.broadcast %573 : vector<1x16xf32> to vector<2x16xf32>
    %576 = arith.mulf %574, %575 : vector<2x16xf32>
    %577 = vector.extract_strided_slice %571 {offsets = [0, 1], sizes = [2, 1], strides = [1, 1]} : vector<2x4xf32> to vector<2x1xf32>
    %578 = vector.extract_strided_slice %7 {offsets = [1, 0], sizes = [1, 16], strides = [1, 1]} : vector<4x16xf32> to vector<1x16xf32>
    %579 = vector.broadcast %577 : vector<2x1xf32> to vector<2x16xf32>
    %580 = vector.broadcast %578 : vector<1x16xf32> to vector<2x16xf32>
    %581 = arith.mulf %579, %580 : vector<2x16xf32>
    %582 = vector.extract_strided_slice %571 {offsets = [0, 2], sizes = [2, 1], strides = [1, 1]} : vector<2x4xf32> to vector<2x1xf32>
    %583 = vector.extract_strided_slice %7 {offsets = [2, 0], sizes = [1, 16], strides = [1, 1]} : vector<4x16xf32> to vector<1x16xf32>
    %584 = vector.broadcast %582 : vector<2x1xf32> to vector<2x16xf32>
    %585 = vector.broadcast %583 : vector<1x16xf32> to vector<2x16xf32>
    %586 = arith.mulf %584, %585 : vector<2x16xf32>
    %587 = vector.extract_strided_slice %571 {offsets = [0, 3], sizes = [2, 1], strides = [1, 1]} : vector<2x4xf32> to vector<2x1xf32>
    %588 = vector.extract_strided_slice %7 {offsets = [3, 0], sizes = [1, 16], strides = [1, 1]} : vector<4x16xf32> to vector<1x16xf32>
    %589 = vector.broadcast %587 : vector<2x1xf32> to vector<2x16xf32>
    %590 = vector.broadcast %588 : vector<1x16xf32> to vector<2x16xf32>
    %591 = arith.mulf %589, %590 : vector<2x16xf32>
    %592 = arith.addf %576, %581 : vector<2x16xf32>
    %593 = arith.addf %586, %591 : vector<2x16xf32>
    %594 = arith.addf %592, %593 : vector<2x16xf32>
    %595 = arith.addf %327, %594 : vector<2x16xf32>
    %596 = vector.extract_strided_slice %595 {offsets = [0, 0], sizes = [2, 4], strides = [1, 1]} : vector<2x16xf32> to vector<2x4xf32>
    %597 = vector.extract_strided_slice %595 {offsets = [0, 4], sizes = [2, 4], strides = [1, 1]} : vector<2x16xf32> to vector<2x4xf32>
    %598 = vector.extract_strided_slice %595 {offsets = [0, 8], sizes = [2, 4], strides = [1, 1]} : vector<2x16xf32> to vector<2x4xf32>
    %599 = vector.extract_strided_slice %595 {offsets = [0, 12], sizes = [2, 4], strides = [1, 1]} : vector<2x16xf32> to vector<2x4xf32>
    %cst_70 = arith.constant 0.000000e+00 : f32
    %600 = vector.broadcast %cst_70 : f32 to vector<2x4xf32>
    %601 = arith.minimumf %597, %600 : vector<2x4xf32>
    %602 = math.absf %597 : vector<2x4xf32>
    %cst_71 = arith.constant 0.000000e+00 : f32
    %603 = vector.broadcast %cst_71 : f32 to vector<2x4xf32>
    %604 = arith.subf %603, %602 : vector<2x4xf32>
    %605 = math.exp %604 : vector<2x4xf32>
    %cst_72 = arith.constant 1.000000e+00 : f32
    %606 = vector.broadcast %cst_72 : f32 to vector<2x4xf32>
    %607 = arith.addf %606, %605 : vector<2x4xf32>
    %608 = math.log %607 : vector<2x4xf32>
    %609 = arith.subf %601, %608 : vector<2x4xf32>
    %610 = arith.addf %553, %609 : vector<2x4xf32>
    %611 = arith.maximumf %596, %610 : vector<2x4xf32>
    %612 = arith.subf %596, %611 : vector<2x4xf32>
    %613 = math.exp %612 : vector<2x4xf32>
    %614 = arith.subf %610, %611 : vector<2x4xf32>
    %615 = math.exp %614 : vector<2x4xf32>
    %616 = arith.mulf %615, %561 : vector<2x4xf32>
    %617 = math.tanh %598 : vector<2x4xf32>
    %618 = arith.mulf %613, %617 : vector<2x4xf32>
    %619 = arith.addf %616, %618 : vector<2x4xf32>
    %620 = arith.mulf %615, %563 : vector<2x4xf32>
    %621 = arith.addf %620, %613 : vector<2x4xf32>
    %622 = arith.negf %599 : vector<2x4xf32>
    %623 = math.exp %622 : vector<2x4xf32>
    %cst_73 = arith.constant 1.000000e+00 : f32
    %624 = vector.broadcast %cst_73 : f32 to vector<2x4xf32>
    %625 = arith.addf %624, %623 : vector<2x4xf32>
    %626 = arith.divf %624, %625 : vector<2x4xf32>
    %627 = arith.mulf %626, %619 : vector<2x4xf32>
    %628 = tpu.reciprocal %621 {approx = true} : vector<2x4xf32> -> vector<2x4xf32>
    %629 = arith.mulf %627, %628 : vector<2x4xf32>
    %630 = vector.extract_strided_slice %629 {offsets = [0, 0], sizes = [2, 1], strides = [1, 1]} : vector<2x4xf32> to vector<2x1xf32>
    %631 = vector.extract_strided_slice %7 {offsets = [0, 0], sizes = [1, 16], strides = [1, 1]} : vector<4x16xf32> to vector<1x16xf32>
    %632 = vector.broadcast %630 : vector<2x1xf32> to vector<2x16xf32>
    %633 = vector.broadcast %631 : vector<1x16xf32> to vector<2x16xf32>
    %634 = arith.mulf %632, %633 : vector<2x16xf32>
    %635 = vector.extract_strided_slice %629 {offsets = [0, 1], sizes = [2, 1], strides = [1, 1]} : vector<2x4xf32> to vector<2x1xf32>
    %636 = vector.extract_strided_slice %7 {offsets = [1, 0], sizes = [1, 16], strides = [1, 1]} : vector<4x16xf32> to vector<1x16xf32>
    %637 = vector.broadcast %635 : vector<2x1xf32> to vector<2x16xf32>
    %638 = vector.broadcast %636 : vector<1x16xf32> to vector<2x16xf32>
    %639 = arith.mulf %637, %638 : vector<2x16xf32>
    %640 = vector.extract_strided_slice %629 {offsets = [0, 2], sizes = [2, 1], strides = [1, 1]} : vector<2x4xf32> to vector<2x1xf32>
    %641 = vector.extract_strided_slice %7 {offsets = [2, 0], sizes = [1, 16], strides = [1, 1]} : vector<4x16xf32> to vector<1x16xf32>
    %642 = vector.broadcast %640 : vector<2x1xf32> to vector<2x16xf32>
    %643 = vector.broadcast %641 : vector<1x16xf32> to vector<2x16xf32>
    %644 = arith.mulf %642, %643 : vector<2x16xf32>
    %645 = vector.extract_strided_slice %629 {offsets = [0, 3], sizes = [2, 1], strides = [1, 1]} : vector<2x4xf32> to vector<2x1xf32>
    %646 = vector.extract_strided_slice %7 {offsets = [3, 0], sizes = [1, 16], strides = [1, 1]} : vector<4x16xf32> to vector<1x16xf32>
    %647 = vector.broadcast %645 : vector<2x1xf32> to vector<2x16xf32>
    %648 = vector.broadcast %646 : vector<1x16xf32> to vector<2x16xf32>
    %649 = arith.mulf %647, %648 : vector<2x16xf32>
    %650 = arith.addf %634, %639 : vector<2x16xf32>
    %651 = arith.addf %644, %649 : vector<2x16xf32>
    %652 = arith.addf %650, %651 : vector<2x16xf32>
    %653 = arith.addf %330, %652 : vector<2x16xf32>
    %654 = vector.extract_strided_slice %653 {offsets = [0, 0], sizes = [2, 4], strides = [1, 1]} : vector<2x16xf32> to vector<2x4xf32>
    %655 = vector.extract_strided_slice %653 {offsets = [0, 4], sizes = [2, 4], strides = [1, 1]} : vector<2x16xf32> to vector<2x4xf32>
    %656 = vector.extract_strided_slice %653 {offsets = [0, 8], sizes = [2, 4], strides = [1, 1]} : vector<2x16xf32> to vector<2x4xf32>
    %657 = vector.extract_strided_slice %653 {offsets = [0, 12], sizes = [2, 4], strides = [1, 1]} : vector<2x16xf32> to vector<2x4xf32>
    %cst_74 = arith.constant 0.000000e+00 : f32
    %658 = vector.broadcast %cst_74 : f32 to vector<2x4xf32>
    %659 = arith.minimumf %655, %658 : vector<2x4xf32>
    %660 = math.absf %655 : vector<2x4xf32>
    %cst_75 = arith.constant 0.000000e+00 : f32
    %661 = vector.broadcast %cst_75 : f32 to vector<2x4xf32>
    %662 = arith.subf %661, %660 : vector<2x4xf32>
    %663 = math.exp %662 : vector<2x4xf32>
    %cst_76 = arith.constant 1.000000e+00 : f32
    %664 = vector.broadcast %cst_76 : f32 to vector<2x4xf32>
    %665 = arith.addf %664, %663 : vector<2x4xf32>
    %666 = math.log %665 : vector<2x4xf32>
    %667 = arith.subf %659, %666 : vector<2x4xf32>
    %668 = arith.addf %611, %667 : vector<2x4xf32>
    %669 = arith.maximumf %654, %668 : vector<2x4xf32>
    %670 = arith.subf %654, %669 : vector<2x4xf32>
    %671 = math.exp %670 : vector<2x4xf32>
    %672 = arith.subf %668, %669 : vector<2x4xf32>
    %673 = math.exp %672 : vector<2x4xf32>
    %674 = arith.mulf %673, %619 : vector<2x4xf32>
    %675 = math.tanh %656 : vector<2x4xf32>
    %676 = arith.mulf %671, %675 : vector<2x4xf32>
    %677 = arith.addf %674, %676 : vector<2x4xf32>
    %678 = arith.mulf %673, %621 : vector<2x4xf32>
    %679 = arith.addf %678, %671 : vector<2x4xf32>
    %680 = arith.negf %657 : vector<2x4xf32>
    %681 = math.exp %680 : vector<2x4xf32>
    %cst_77 = arith.constant 1.000000e+00 : f32
    %682 = vector.broadcast %cst_77 : f32 to vector<2x4xf32>
    %683 = arith.addf %682, %681 : vector<2x4xf32>
    %684 = arith.divf %682, %683 : vector<2x4xf32>
    %685 = arith.mulf %684, %677 : vector<2x4xf32>
    %686 = tpu.reciprocal %679 {approx = true} : vector<2x4xf32> -> vector<2x4xf32>
    %687 = arith.mulf %685, %686 : vector<2x4xf32>
    %688 = vector.extract_strided_slice %687 {offsets = [0, 0], sizes = [2, 1], strides = [1, 1]} : vector<2x4xf32> to vector<2x1xf32>
    %689 = vector.extract_strided_slice %7 {offsets = [0, 0], sizes = [1, 16], strides = [1, 1]} : vector<4x16xf32> to vector<1x16xf32>
    %690 = vector.broadcast %688 : vector<2x1xf32> to vector<2x16xf32>
    %691 = vector.broadcast %689 : vector<1x16xf32> to vector<2x16xf32>
    %692 = arith.mulf %690, %691 : vector<2x16xf32>
    %693 = vector.extract_strided_slice %687 {offsets = [0, 1], sizes = [2, 1], strides = [1, 1]} : vector<2x4xf32> to vector<2x1xf32>
    %694 = vector.extract_strided_slice %7 {offsets = [1, 0], sizes = [1, 16], strides = [1, 1]} : vector<4x16xf32> to vector<1x16xf32>
    %695 = vector.broadcast %693 : vector<2x1xf32> to vector<2x16xf32>
    %696 = vector.broadcast %694 : vector<1x16xf32> to vector<2x16xf32>
    %697 = arith.mulf %695, %696 : vector<2x16xf32>
    %698 = vector.extract_strided_slice %687 {offsets = [0, 2], sizes = [2, 1], strides = [1, 1]} : vector<2x4xf32> to vector<2x1xf32>
    %699 = vector.extract_strided_slice %7 {offsets = [2, 0], sizes = [1, 16], strides = [1, 1]} : vector<4x16xf32> to vector<1x16xf32>
    %700 = vector.broadcast %698 : vector<2x1xf32> to vector<2x16xf32>
    %701 = vector.broadcast %699 : vector<1x16xf32> to vector<2x16xf32>
    %702 = arith.mulf %700, %701 : vector<2x16xf32>
    %703 = vector.extract_strided_slice %687 {offsets = [0, 3], sizes = [2, 1], strides = [1, 1]} : vector<2x4xf32> to vector<2x1xf32>
    %704 = vector.extract_strided_slice %7 {offsets = [3, 0], sizes = [1, 16], strides = [1, 1]} : vector<4x16xf32> to vector<1x16xf32>
    %705 = vector.broadcast %703 : vector<2x1xf32> to vector<2x16xf32>
    %706 = vector.broadcast %704 : vector<1x16xf32> to vector<2x16xf32>
    %707 = arith.mulf %705, %706 : vector<2x16xf32>
    %708 = arith.addf %692, %697 : vector<2x16xf32>
    %709 = arith.addf %702, %707 : vector<2x16xf32>
    %710 = arith.addf %708, %709 : vector<2x16xf32>
    %711 = arith.addf %333, %710 : vector<2x16xf32>
    %712 = vector.extract_strided_slice %711 {offsets = [0, 0], sizes = [2, 4], strides = [1, 1]} : vector<2x16xf32> to vector<2x4xf32>
    %713 = vector.extract_strided_slice %711 {offsets = [0, 4], sizes = [2, 4], strides = [1, 1]} : vector<2x16xf32> to vector<2x4xf32>
    %714 = vector.extract_strided_slice %711 {offsets = [0, 8], sizes = [2, 4], strides = [1, 1]} : vector<2x16xf32> to vector<2x4xf32>
    %715 = vector.extract_strided_slice %711 {offsets = [0, 12], sizes = [2, 4], strides = [1, 1]} : vector<2x16xf32> to vector<2x4xf32>
    %cst_78 = arith.constant 0.000000e+00 : f32
    %716 = vector.broadcast %cst_78 : f32 to vector<2x4xf32>
    %717 = arith.minimumf %713, %716 : vector<2x4xf32>
    %718 = math.absf %713 : vector<2x4xf32>
    %cst_79 = arith.constant 0.000000e+00 : f32
    %719 = vector.broadcast %cst_79 : f32 to vector<2x4xf32>
    %720 = arith.subf %719, %718 : vector<2x4xf32>
    %721 = math.exp %720 : vector<2x4xf32>
    %cst_80 = arith.constant 1.000000e+00 : f32
    %722 = vector.broadcast %cst_80 : f32 to vector<2x4xf32>
    %723 = arith.addf %722, %721 : vector<2x4xf32>
    %724 = math.log %723 : vector<2x4xf32>
    %725 = arith.subf %717, %724 : vector<2x4xf32>
    %726 = arith.addf %669, %725 : vector<2x4xf32>
    %727 = arith.maximumf %712, %726 : vector<2x4xf32>
    %728 = arith.subf %712, %727 : vector<2x4xf32>
    %729 = math.exp %728 : vector<2x4xf32>
    %730 = arith.subf %726, %727 : vector<2x4xf32>
    %731 = math.exp %730 : vector<2x4xf32>
    %732 = arith.mulf %731, %677 : vector<2x4xf32>
    %733 = math.tanh %714 : vector<2x4xf32>
    %734 = arith.mulf %729, %733 : vector<2x4xf32>
    %735 = arith.addf %732, %734 : vector<2x4xf32>
    %736 = arith.mulf %731, %679 : vector<2x4xf32>
    %737 = arith.addf %736, %729 : vector<2x4xf32>
    %738 = arith.negf %715 : vector<2x4xf32>
    %739 = math.exp %738 : vector<2x4xf32>
    %cst_81 = arith.constant 1.000000e+00 : f32
    %740 = vector.broadcast %cst_81 : f32 to vector<2x4xf32>
    %741 = arith.addf %740, %739 : vector<2x4xf32>
    %742 = arith.divf %740, %741 : vector<2x4xf32>
    %743 = arith.mulf %742, %735 : vector<2x4xf32>
    %744 = tpu.reciprocal %737 {approx = true} : vector<2x4xf32> -> vector<2x4xf32>
    %745 = arith.mulf %743, %744 : vector<2x4xf32>
    %746 = vector.extract_strided_slice %745 {offsets = [0, 0], sizes = [2, 1], strides = [1, 1]} : vector<2x4xf32> to vector<2x1xf32>
    %747 = vector.extract_strided_slice %7 {offsets = [0, 0], sizes = [1, 16], strides = [1, 1]} : vector<4x16xf32> to vector<1x16xf32>
    %748 = vector.broadcast %746 : vector<2x1xf32> to vector<2x16xf32>
    %749 = vector.broadcast %747 : vector<1x16xf32> to vector<2x16xf32>
    %750 = arith.mulf %748, %749 : vector<2x16xf32>
    %751 = vector.extract_strided_slice %745 {offsets = [0, 1], sizes = [2, 1], strides = [1, 1]} : vector<2x4xf32> to vector<2x1xf32>
    %752 = vector.extract_strided_slice %7 {offsets = [1, 0], sizes = [1, 16], strides = [1, 1]} : vector<4x16xf32> to vector<1x16xf32>
    %753 = vector.broadcast %751 : vector<2x1xf32> to vector<2x16xf32>
    %754 = vector.broadcast %752 : vector<1x16xf32> to vector<2x16xf32>
    %755 = arith.mulf %753, %754 : vector<2x16xf32>
    %756 = vector.extract_strided_slice %745 {offsets = [0, 2], sizes = [2, 1], strides = [1, 1]} : vector<2x4xf32> to vector<2x1xf32>
    %757 = vector.extract_strided_slice %7 {offsets = [2, 0], sizes = [1, 16], strides = [1, 1]} : vector<4x16xf32> to vector<1x16xf32>
    %758 = vector.broadcast %756 : vector<2x1xf32> to vector<2x16xf32>
    %759 = vector.broadcast %757 : vector<1x16xf32> to vector<2x16xf32>
    %760 = arith.mulf %758, %759 : vector<2x16xf32>
    %761 = vector.extract_strided_slice %745 {offsets = [0, 3], sizes = [2, 1], strides = [1, 1]} : vector<2x4xf32> to vector<2x1xf32>
    %762 = vector.extract_strided_slice %7 {offsets = [3, 0], sizes = [1, 16], strides = [1, 1]} : vector<4x16xf32> to vector<1x16xf32>
    %763 = vector.broadcast %761 : vector<2x1xf32> to vector<2x16xf32>
    %764 = vector.broadcast %762 : vector<1x16xf32> to vector<2x16xf32>
    %765 = arith.mulf %763, %764 : vector<2x16xf32>
    %766 = arith.addf %750, %755 : vector<2x16xf32>
    %767 = arith.addf %760, %765 : vector<2x16xf32>
    %768 = arith.addf %766, %767 : vector<2x16xf32>
    %769 = arith.addf %336, %768 : vector<2x16xf32>
    %770 = vector.extract_strided_slice %769 {offsets = [0, 0], sizes = [2, 4], strides = [1, 1]} : vector<2x16xf32> to vector<2x4xf32>
    %771 = vector.extract_strided_slice %769 {offsets = [0, 4], sizes = [2, 4], strides = [1, 1]} : vector<2x16xf32> to vector<2x4xf32>
    %772 = vector.extract_strided_slice %769 {offsets = [0, 8], sizes = [2, 4], strides = [1, 1]} : vector<2x16xf32> to vector<2x4xf32>
    %773 = vector.extract_strided_slice %769 {offsets = [0, 12], sizes = [2, 4], strides = [1, 1]} : vector<2x16xf32> to vector<2x4xf32>
    %cst_82 = arith.constant 0.000000e+00 : f32
    %774 = vector.broadcast %cst_82 : f32 to vector<2x4xf32>
    %775 = arith.minimumf %771, %774 : vector<2x4xf32>
    %776 = math.absf %771 : vector<2x4xf32>
    %cst_83 = arith.constant 0.000000e+00 : f32
    %777 = vector.broadcast %cst_83 : f32 to vector<2x4xf32>
    %778 = arith.subf %777, %776 : vector<2x4xf32>
    %779 = math.exp %778 : vector<2x4xf32>
    %cst_84 = arith.constant 1.000000e+00 : f32
    %780 = vector.broadcast %cst_84 : f32 to vector<2x4xf32>
    %781 = arith.addf %780, %779 : vector<2x4xf32>
    %782 = math.log %781 : vector<2x4xf32>
    %783 = arith.subf %775, %782 : vector<2x4xf32>
    %784 = arith.addf %727, %783 : vector<2x4xf32>
    %785 = arith.maximumf %770, %784 : vector<2x4xf32>
    %786 = arith.subf %770, %785 : vector<2x4xf32>
    %787 = math.exp %786 : vector<2x4xf32>
    %788 = arith.subf %784, %785 : vector<2x4xf32>
    %789 = math.exp %788 : vector<2x4xf32>
    %790 = arith.mulf %789, %735 : vector<2x4xf32>
    %791 = math.tanh %772 : vector<2x4xf32>
    %792 = arith.mulf %787, %791 : vector<2x4xf32>
    %793 = arith.addf %790, %792 : vector<2x4xf32>
    %794 = arith.mulf %789, %737 : vector<2x4xf32>
    %795 = arith.addf %794, %787 : vector<2x4xf32>
    %796 = arith.negf %773 : vector<2x4xf32>
    %797 = math.exp %796 : vector<2x4xf32>
    %cst_85 = arith.constant 1.000000e+00 : f32
    %798 = vector.broadcast %cst_85 : f32 to vector<2x4xf32>
    %799 = arith.addf %798, %797 : vector<2x4xf32>
    %800 = arith.divf %798, %799 : vector<2x4xf32>
    %801 = arith.mulf %800, %793 : vector<2x4xf32>
    %802 = tpu.reciprocal %795 {approx = true} : vector<2x4xf32> -> vector<2x4xf32>
    %803 = arith.mulf %801, %802 : vector<2x4xf32>
    %804 = vector.extract_strided_slice %397 {offsets = [0, 0], sizes = [1, 4], strides = [1, 1]} : vector<2x4xf32> to vector<1x4xf32>
    %805 = vector.extract_strided_slice %455 {offsets = [0, 0], sizes = [1, 4], strides = [1, 1]} : vector<2x4xf32> to vector<1x4xf32>
    %806 = vector.extract_strided_slice %513 {offsets = [0, 0], sizes = [1, 4], strides = [1, 1]} : vector<2x4xf32> to vector<1x4xf32>
    %807 = vector.extract_strided_slice %571 {offsets = [0, 0], sizes = [1, 4], strides = [1, 1]} : vector<2x4xf32> to vector<1x4xf32>
    %808 = vector.extract_strided_slice %629 {offsets = [0, 0], sizes = [1, 4], strides = [1, 1]} : vector<2x4xf32> to vector<1x4xf32>
    %809 = vector.extract_strided_slice %687 {offsets = [0, 0], sizes = [1, 4], strides = [1, 1]} : vector<2x4xf32> to vector<1x4xf32>
    %810 = vector.extract_strided_slice %745 {offsets = [0, 0], sizes = [1, 4], strides = [1, 1]} : vector<2x4xf32> to vector<1x4xf32>
    %811 = vector.extract_strided_slice %803 {offsets = [0, 0], sizes = [1, 4], strides = [1, 1]} : vector<2x4xf32> to vector<1x4xf32>
    %812 = tpu.concatenate %804, %805, %806, %807, %808, %809, %810, %811 in 0 : vector<1x4xf32>, vector<1x4xf32>, vector<1x4xf32>, vector<1x4xf32>, vector<1x4xf32>, vector<1x4xf32>, vector<1x4xf32>, vector<1x4xf32> -> vector<8x4xf32>
    %813 = vector.extract_strided_slice %397 {offsets = [1, 0], sizes = [1, 4], strides = [1, 1]} : vector<2x4xf32> to vector<1x4xf32>
    %814 = vector.extract_strided_slice %455 {offsets = [1, 0], sizes = [1, 4], strides = [1, 1]} : vector<2x4xf32> to vector<1x4xf32>
    %815 = vector.extract_strided_slice %513 {offsets = [1, 0], sizes = [1, 4], strides = [1, 1]} : vector<2x4xf32> to vector<1x4xf32>
    %816 = vector.extract_strided_slice %571 {offsets = [1, 0], sizes = [1, 4], strides = [1, 1]} : vector<2x4xf32> to vector<1x4xf32>
    %817 = vector.extract_strided_slice %629 {offsets = [1, 0], sizes = [1, 4], strides = [1, 1]} : vector<2x4xf32> to vector<1x4xf32>
    %818 = vector.extract_strided_slice %687 {offsets = [1, 0], sizes = [1, 4], strides = [1, 1]} : vector<2x4xf32> to vector<1x4xf32>
    %819 = vector.extract_strided_slice %745 {offsets = [1, 0], sizes = [1, 4], strides = [1, 1]} : vector<2x4xf32> to vector<1x4xf32>
    %820 = vector.extract_strided_slice %803 {offsets = [1, 0], sizes = [1, 4], strides = [1, 1]} : vector<2x4xf32> to vector<1x4xf32>
    %821 = tpu.concatenate %813, %814, %815, %816, %817, %818, %819, %820 in 0 : vector<1x4xf32>, vector<1x4xf32>, vector<1x4xf32>, vector<1x4xf32>, vector<1x4xf32>, vector<1x4xf32>, vector<1x4xf32>, vector<1x4xf32> -> vector<8x4xf32>
    %822 = tpu.concatenate %812, %821 in 0 : vector<8x4xf32>, vector<8x4xf32> -> vector<16x4xf32>
    %823 = tpu.concatenate %58, %204 in 0 : vector<8x4xf32>, vector<8x4xf32> -> vector<16x4xf32>
    %824 = vector.extract_strided_slice %822 {offsets = [0, 0], sizes = [16, 1], strides = [1, 1]} : vector<16x4xf32> to vector<16x1xf32>
    %825 = vector.extract_strided_slice %9 {offsets = [0, 0], sizes = [1, 4], strides = [1, 1]} : vector<4x4xf32> to vector<1x4xf32>
    %826 = vector.broadcast %824 : vector<16x1xf32> to vector<16x4xf32>
    %827 = vector.broadcast %825 : vector<1x4xf32> to vector<16x4xf32>
    %828 = arith.mulf %826, %827 : vector<16x4xf32>
    %829 = vector.extract_strided_slice %822 {offsets = [0, 1], sizes = [16, 1], strides = [1, 1]} : vector<16x4xf32> to vector<16x1xf32>
    %830 = vector.extract_strided_slice %9 {offsets = [1, 0], sizes = [1, 4], strides = [1, 1]} : vector<4x4xf32> to vector<1x4xf32>
    %831 = vector.broadcast %829 : vector<16x1xf32> to vector<16x4xf32>
    %832 = vector.broadcast %830 : vector<1x4xf32> to vector<16x4xf32>
    %833 = arith.mulf %831, %832 : vector<16x4xf32>
    %834 = vector.extract_strided_slice %822 {offsets = [0, 2], sizes = [16, 1], strides = [1, 1]} : vector<16x4xf32> to vector<16x1xf32>
    %835 = vector.extract_strided_slice %9 {offsets = [2, 0], sizes = [1, 4], strides = [1, 1]} : vector<4x4xf32> to vector<1x4xf32>
    %836 = vector.broadcast %834 : vector<16x1xf32> to vector<16x4xf32>
    %837 = vector.broadcast %835 : vector<1x4xf32> to vector<16x4xf32>
    %838 = arith.mulf %836, %837 : vector<16x4xf32>
    %839 = vector.extract_strided_slice %822 {offsets = [0, 3], sizes = [16, 1], strides = [1, 1]} : vector<16x4xf32> to vector<16x1xf32>
    %840 = vector.extract_strided_slice %9 {offsets = [3, 0], sizes = [1, 4], strides = [1, 1]} : vector<4x4xf32> to vector<1x4xf32>
    %841 = vector.broadcast %839 : vector<16x1xf32> to vector<16x4xf32>
    %842 = vector.broadcast %840 : vector<1x4xf32> to vector<16x4xf32>
    %843 = arith.mulf %841, %842 : vector<16x4xf32>
    %844 = arith.addf %828, %833 : vector<16x4xf32>
    %845 = arith.addf %838, %843 : vector<16x4xf32>
    %846 = arith.addf %844, %845 : vector<16x4xf32>
    %847 = arith.subf %822, %846 : vector<16x4xf32>
    %848 = arith.mulf %847, %847 : vector<16x4xf32>
    %849 = vector.extract_strided_slice %848 {offsets = [0, 0], sizes = [16, 1], strides = [1, 1]} : vector<16x4xf32> to vector<16x1xf32>
    %850 = vector.extract_strided_slice %9 {offsets = [0, 0], sizes = [1, 4], strides = [1, 1]} : vector<4x4xf32> to vector<1x4xf32>
    %851 = vector.broadcast %849 : vector<16x1xf32> to vector<16x4xf32>
    %852 = vector.broadcast %850 : vector<1x4xf32> to vector<16x4xf32>
    %853 = arith.mulf %851, %852 : vector<16x4xf32>
    %854 = vector.extract_strided_slice %848 {offsets = [0, 1], sizes = [16, 1], strides = [1, 1]} : vector<16x4xf32> to vector<16x1xf32>
    %855 = vector.extract_strided_slice %9 {offsets = [1, 0], sizes = [1, 4], strides = [1, 1]} : vector<4x4xf32> to vector<1x4xf32>
    %856 = vector.broadcast %854 : vector<16x1xf32> to vector<16x4xf32>
    %857 = vector.broadcast %855 : vector<1x4xf32> to vector<16x4xf32>
    %858 = arith.mulf %856, %857 : vector<16x4xf32>
    %859 = vector.extract_strided_slice %848 {offsets = [0, 2], sizes = [16, 1], strides = [1, 1]} : vector<16x4xf32> to vector<16x1xf32>
    %860 = vector.extract_strided_slice %9 {offsets = [2, 0], sizes = [1, 4], strides = [1, 1]} : vector<4x4xf32> to vector<1x4xf32>
    %861 = vector.broadcast %859 : vector<16x1xf32> to vector<16x4xf32>
    %862 = vector.broadcast %860 : vector<1x4xf32> to vector<16x4xf32>
    %863 = arith.mulf %861, %862 : vector<16x4xf32>
    %864 = vector.extract_strided_slice %848 {offsets = [0, 3], sizes = [16, 1], strides = [1, 1]} : vector<16x4xf32> to vector<16x1xf32>
    %865 = vector.extract_strided_slice %9 {offsets = [3, 0], sizes = [1, 4], strides = [1, 1]} : vector<4x4xf32> to vector<1x4xf32>
    %866 = vector.broadcast %864 : vector<16x1xf32> to vector<16x4xf32>
    %867 = vector.broadcast %865 : vector<1x4xf32> to vector<16x4xf32>
    %868 = arith.mulf %866, %867 : vector<16x4xf32>
    %869 = arith.addf %853, %858 : vector<16x4xf32>
    %870 = arith.addf %863, %868 : vector<16x4xf32>
    %871 = arith.addf %869, %870 : vector<16x4xf32>
    %cst_86 = arith.constant 9.99999974E-6 : f32
    %872 = vector.broadcast %cst_86 : f32 to vector<16x4xf32>
    %873 = arith.addf %871, %872 : vector<16x4xf32>
    %874 = math.rsqrt %873 : vector<16x4xf32>
    %875 = arith.mulf %847, %874 : vector<16x4xf32>
    %876 = vector.broadcast %8 : vector<1x4xf32> to vector<16x4xf32>
    %877 = arith.mulf %875, %876 : vector<16x4xf32>
    %878 = arith.addf %823, %877 : vector<16x4xf32>
    %cst_87 = arith.constant dense<0.000000e+00> : vector<16xf32>
    %879 = vector.multi_reduction <add>, %878, %cst_87 [1] : vector<16x4xf32> to vector<16xf32>
    %880 = vector.shape_cast %879 : vector<16xf32> to vector<16x1xf32>
    %cst_88 = arith.constant 4.000000e+00 : f32
    %881 = vector.broadcast %cst_88 : f32 to vector<16x1xf32>
    %882 = arith.divf %880, %881 : vector<16x1xf32>
    %883 = vector.broadcast %882 : vector<16x1xf32> to vector<16x4xf32>
    %884 = arith.subf %878, %883 : vector<16x4xf32>
    %885 = arith.mulf %884, %884 : vector<16x4xf32>
    %cst_89 = arith.constant dense<0.000000e+00> : vector<16xf32>
    %886 = vector.multi_reduction <add>, %885, %cst_89 [1] : vector<16x4xf32> to vector<16xf32>
    %887 = vector.shape_cast %886 : vector<16xf32> to vector<16x1xf32>
    %cst_90 = arith.constant 4.000000e+00 : f32
    %888 = vector.broadcast %cst_90 : f32 to vector<16x1xf32>
    %889 = arith.divf %887, %888 : vector<16x1xf32>
    %890 = vector.broadcast %882 : vector<16x1xf32> to vector<16x4xf32>
    %891 = arith.subf %878, %890 : vector<16x4xf32>
    %cst_91 = arith.constant 9.99999974E-6 : f32
    %892 = vector.broadcast %cst_91 : f32 to vector<16x1xf32>
    %893 = arith.addf %889, %892 : vector<16x1xf32>
    %894 = math.rsqrt %893 : vector<16x1xf32>
    %895 = vector.broadcast %894 : vector<16x1xf32> to vector<16x4xf32>
    %896 = arith.mulf %891, %895 : vector<16x4xf32>
    %897 = vector.broadcast %10 : vector<1x4xf32> to vector<16x4xf32>
    %898 = arith.mulf %896, %897 : vector<16x4xf32>
    %899 = vector.extract_strided_slice %898 {offsets = [0, 0], sizes = [16, 1], strides = [1, 1]} : vector<16x4xf32> to vector<16x1xf32>
    %900 = vector.extract_strided_slice %11 {offsets = [0, 0], sizes = [1, 128], strides = [1, 1]} : vector<4x128xf32> to vector<1x128xf32>
    %901 = vector.broadcast %899 : vector<16x1xf32> to vector<16x128xf32>
    %902 = vector.broadcast %900 : vector<1x128xf32> to vector<16x128xf32>
    %903 = arith.mulf %901, %902 : vector<16x128xf32>
    %904 = vector.extract_strided_slice %898 {offsets = [0, 1], sizes = [16, 1], strides = [1, 1]} : vector<16x4xf32> to vector<16x1xf32>
    %905 = vector.extract_strided_slice %11 {offsets = [1, 0], sizes = [1, 128], strides = [1, 1]} : vector<4x128xf32> to vector<1x128xf32>
    %906 = vector.broadcast %904 : vector<16x1xf32> to vector<16x128xf32>
    %907 = vector.broadcast %905 : vector<1x128xf32> to vector<16x128xf32>
    %908 = arith.mulf %906, %907 : vector<16x128xf32>
    %909 = vector.extract_strided_slice %898 {offsets = [0, 2], sizes = [16, 1], strides = [1, 1]} : vector<16x4xf32> to vector<16x1xf32>
    %910 = vector.extract_strided_slice %11 {offsets = [2, 0], sizes = [1, 128], strides = [1, 1]} : vector<4x128xf32> to vector<1x128xf32>
    %911 = vector.broadcast %909 : vector<16x1xf32> to vector<16x128xf32>
    %912 = vector.broadcast %910 : vector<1x128xf32> to vector<16x128xf32>
    %913 = arith.mulf %911, %912 : vector<16x128xf32>
    %914 = vector.extract_strided_slice %898 {offsets = [0, 3], sizes = [16, 1], strides = [1, 1]} : vector<16x4xf32> to vector<16x1xf32>
    %915 = vector.extract_strided_slice %11 {offsets = [3, 0], sizes = [1, 128], strides = [1, 1]} : vector<4x128xf32> to vector<1x128xf32>
    %916 = vector.broadcast %914 : vector<16x1xf32> to vector<16x128xf32>
    %917 = vector.broadcast %915 : vector<1x128xf32> to vector<16x128xf32>
    %918 = arith.mulf %916, %917 : vector<16x128xf32>
    %919 = arith.addf %903, %908 : vector<16x128xf32>
    %920 = arith.addf %913, %918 : vector<16x128xf32>
    %921 = arith.addf %919, %920 : vector<16x128xf32>
    %922 = vector.extract_strided_slice %921 {offsets = [0, 0], sizes = [16, 64], strides = [1, 1]} : vector<16x128xf32> to vector<16x64xf32>
    %cst_92 = arith.constant 5.000000e-01 : f32
    %923 = vector.broadcast %cst_92 : f32 to vector<16x64xf32>
    %924 = arith.mulf %923, %922 : vector<16x64xf32>
    %cst_93 = arith.constant 0.707106769 : f32
    %925 = vector.broadcast %cst_93 : f32 to vector<16x64xf32>
    %926 = arith.mulf %922, %925 : vector<16x64xf32>
    %927 = math.absf %926 : vector<16x64xf32>
    %cst_94 = arith.constant 0.327591091 : f32
    %928 = vector.broadcast %cst_94 : f32 to vector<16x64xf32>
    %929 = arith.mulf %928, %927 : vector<16x64xf32>
    %cst_95 = arith.constant 1.000000e+00 : f32
    %930 = vector.broadcast %cst_95 : f32 to vector<16x64xf32>
    %931 = arith.addf %930, %929 : vector<16x64xf32>
    %cst_96 = arith.constant 1.000000e+00 : f32
    %932 = vector.broadcast %cst_96 : f32 to vector<16x64xf32>
    %933 = arith.divf %932, %931 : vector<16x64xf32>
    %cst_97 = arith.constant 1.06140542 : f32
    %934 = vector.broadcast %cst_97 : f32 to vector<16x64xf32>
    %935 = arith.mulf %933, %934 : vector<16x64xf32>
    %cst_98 = arith.constant -1.45315206 : f32
    %936 = vector.broadcast %cst_98 : f32 to vector<16x64xf32>
    %937 = arith.addf %936, %935 : vector<16x64xf32>
    %938 = arith.mulf %933, %937 : vector<16x64xf32>
    %cst_99 = arith.constant 1.42141378 : f32
    %939 = vector.broadcast %cst_99 : f32 to vector<16x64xf32>
    %940 = arith.addf %939, %938 : vector<16x64xf32>
    %941 = arith.mulf %933, %940 : vector<16x64xf32>
    %cst_100 = arith.constant -0.284496725 : f32
    %942 = vector.broadcast %cst_100 : f32 to vector<16x64xf32>
    %943 = arith.addf %942, %941 : vector<16x64xf32>
    %944 = arith.mulf %933, %943 : vector<16x64xf32>
    %cst_101 = arith.constant 0.254829586 : f32
    %945 = vector.broadcast %cst_101 : f32 to vector<16x64xf32>
    %946 = arith.addf %945, %944 : vector<16x64xf32>
    %947 = arith.mulf %933, %946 : vector<16x64xf32>
    %cst_102 = arith.constant 0.000000e+00 : f32
    %948 = vector.broadcast %cst_102 : f32 to vector<16x64xf32>
    %949 = arith.subf %948, %927 : vector<16x64xf32>
    %950 = arith.mulf %949, %927 : vector<16x64xf32>
    %951 = math.exp %950 : vector<16x64xf32>
    %952 = arith.mulf %947, %951 : vector<16x64xf32>
    %cst_103 = arith.constant 1.000000e+00 : f32
    %953 = vector.broadcast %cst_103 : f32 to vector<16x64xf32>
    %954 = arith.subf %953, %952 : vector<16x64xf32>
    %cst_104 = arith.constant 0.000000e+00 : f32
    %955 = vector.broadcast %cst_104 : f32 to vector<16x64xf32>
    %956 = arith.cmpf olt, %926, %955 : vector<16x64xf32>
    %cst_105 = arith.constant 0.000000e+00 : f32
    %957 = vector.broadcast %cst_105 : f32 to vector<16x64xf32>
    %958 = arith.subf %957, %954 : vector<16x64xf32>
    %959 = arith.select %956, %958, %954 : vector<16x64xi1>, vector<16x64xf32>
    %cst_106 = arith.constant 1.000000e+00 : f32
    %960 = vector.broadcast %cst_106 : f32 to vector<16x64xf32>
    %961 = arith.addf %960, %959 : vector<16x64xf32>
    %962 = arith.mulf %924, %961 : vector<16x64xf32>
    %963 = vector.extract_strided_slice %921 {offsets = [0, 64], sizes = [16, 64], strides = [1, 1]} : vector<16x128xf32> to vector<16x64xf32>
    %964 = arith.mulf %962, %963 : vector<16x64xf32>
    %cst_107 = arith.constant 0.000000e+00 : f32
    %965 = vector.broadcast %cst_107 : f32 to vector<16x64xf32>
    %966 = tpu.concatenate %964, %965 in 1 : vector<16x64xf32>, vector<16x64xf32> -> vector<16x128xf32>
    %cst_108 = arith.constant dense<0.000000e+00> : vector<16x128xf32>
    %967 = tpu.matmul %966, %12, %cst_108 {dimension_numbers = #tpu.dot_dimension_numbers<[1], [0], [0], [1], [0, 0, 1, 1], [], []>} : vector<16x128xf32>, vector<128x128xf32>, vector<16x128xf32> -> vector<16x128xf32>
    %968 = vector.extract_strided_slice %967 {offsets = [0, 0], sizes = [16, 4], strides = [1, 1]} : vector<16x128xf32> to vector<16x4xf32>
    %969 = arith.addf %878, %968 : vector<16x4xf32>
    %cst_109 = arith.constant dense<0.000000e+00> : vector<16xf32>
    %970 = vector.multi_reduction <add>, %969, %cst_109 [1] : vector<16x4xf32> to vector<16xf32>
    %971 = vector.shape_cast %970 : vector<16xf32> to vector<16x1xf32>
    %cst_110 = arith.constant 4.000000e+00 : f32
    %972 = vector.broadcast %cst_110 : f32 to vector<16x1xf32>
    %973 = arith.divf %971, %972 : vector<16x1xf32>
    %974 = vector.broadcast %973 : vector<16x1xf32> to vector<16x4xf32>
    %975 = arith.subf %969, %974 : vector<16x4xf32>
    %976 = arith.mulf %975, %975 : vector<16x4xf32>
    %cst_111 = arith.constant dense<0.000000e+00> : vector<16xf32>
    %977 = vector.multi_reduction <add>, %976, %cst_111 [1] : vector<16x4xf32> to vector<16xf32>
    %978 = vector.shape_cast %977 : vector<16xf32> to vector<16x1xf32>
    %cst_112 = arith.constant 4.000000e+00 : f32
    %979 = vector.broadcast %cst_112 : f32 to vector<16x1xf32>
    %980 = arith.divf %978, %979 : vector<16x1xf32>
    %981 = vector.broadcast %973 : vector<16x1xf32> to vector<16x4xf32>
    %982 = arith.subf %969, %981 : vector<16x4xf32>
    %cst_113 = arith.constant 9.99999974E-6 : f32
    %983 = vector.broadcast %cst_113 : f32 to vector<16x1xf32>
    %984 = arith.addf %980, %983 : vector<16x1xf32>
    %985 = math.rsqrt %984 : vector<16x1xf32>
    %986 = vector.broadcast %985 : vector<16x1xf32> to vector<16x4xf32>
    %987 = arith.mulf %982, %986 : vector<16x4xf32>
    %988 = vector.broadcast %13 : vector<1x4xf32> to vector<16x4xf32>
    %989 = arith.mulf %987, %988 : vector<16x4xf32>
    %990 = vector.extract_strided_slice %989 {offsets = [0, 0], sizes = [16, 1], strides = [1, 1]} : vector<16x4xf32> to vector<16x1xf32>
    %991 = vector.extract_strided_slice %14 {offsets = [0, 0], sizes = [1, 128], strides = [1, 1]} : vector<4x128xf32> to vector<1x128xf32>
    %992 = vector.broadcast %990 : vector<16x1xf32> to vector<16x128xf32>
    %993 = vector.broadcast %991 : vector<1x128xf32> to vector<16x128xf32>
    %994 = arith.mulf %992, %993 : vector<16x128xf32>
    %995 = vector.extract_strided_slice %989 {offsets = [0, 1], sizes = [16, 1], strides = [1, 1]} : vector<16x4xf32> to vector<16x1xf32>
    %996 = vector.extract_strided_slice %14 {offsets = [1, 0], sizes = [1, 128], strides = [1, 1]} : vector<4x128xf32> to vector<1x128xf32>
    %997 = vector.broadcast %995 : vector<16x1xf32> to vector<16x128xf32>
    %998 = vector.broadcast %996 : vector<1x128xf32> to vector<16x128xf32>
    %999 = arith.mulf %997, %998 : vector<16x128xf32>
    %1000 = vector.extract_strided_slice %989 {offsets = [0, 2], sizes = [16, 1], strides = [1, 1]} : vector<16x4xf32> to vector<16x1xf32>
    %1001 = vector.extract_strided_slice %14 {offsets = [2, 0], sizes = [1, 128], strides = [1, 1]} : vector<4x128xf32> to vector<1x128xf32>
    %1002 = vector.broadcast %1000 : vector<16x1xf32> to vector<16x128xf32>
    %1003 = vector.broadcast %1001 : vector<1x128xf32> to vector<16x128xf32>
    %1004 = arith.mulf %1002, %1003 : vector<16x128xf32>
    %1005 = vector.extract_strided_slice %989 {offsets = [0, 3], sizes = [16, 1], strides = [1, 1]} : vector<16x4xf32> to vector<16x1xf32>
    %1006 = vector.extract_strided_slice %14 {offsets = [3, 0], sizes = [1, 128], strides = [1, 1]} : vector<4x128xf32> to vector<1x128xf32>
    %1007 = vector.broadcast %1005 : vector<16x1xf32> to vector<16x128xf32>
    %1008 = vector.broadcast %1006 : vector<1x128xf32> to vector<16x128xf32>
    %1009 = arith.mulf %1007, %1008 : vector<16x128xf32>
    %1010 = arith.addf %994, %999 : vector<16x128xf32>
    %1011 = arith.addf %1004, %1009 : vector<16x128xf32>
    %1012 = arith.addf %1010, %1011 : vector<16x128xf32>
    %1013 = vector.broadcast %15 : vector<1x128xf32> to vector<16x128xf32>
    %1014 = arith.addf %1012, %1013 : vector<16x128xf32>
    %cst_114 = arith.constant 0.000000e+00 : f32
    %1015 = vector.broadcast %cst_114 : f32 to vector<16x128xf32>
    %1016 = arith.maximumf %1014, %1015 : vector<16x128xf32>
    %cst_115 = arith.constant dense<0.000000e+00> : vector<16x128xf32>
    %1017 = tpu.matmul %1016, %16, %cst_115 {dimension_numbers = #tpu.dot_dimension_numbers<[1], [0], [0], [1], [0, 0, 1, 1], [], []>} : vector<16x128xf32>, vector<128x128xf32>, vector<16x128xf32> -> vector<16x128xf32>
    %1018 = vector.broadcast %17 : vector<1x128xf32> to vector<16x128xf32>
    %1019 = arith.addf %1017, %1018 : vector<16x128xf32>
    %cst_116 = arith.constant 0.000000e+00 : f32
    %1020 = vector.broadcast %cst_116 : f32 to vector<16x128xf32>
    %1021 = arith.maximumf %1019, %1020 : vector<16x128xf32>
    %1022 = vector.broadcast %18 : vector<1x128xf32> to vector<16x128xf32>
    %1023 = arith.mulf %1021, %1022 : vector<16x128xf32>
    %cst_117 = arith.constant dense<0.000000e+00> : vector<16xf32>
    %1024 = vector.multi_reduction <add>, %1023, %cst_117 [1] : vector<16x128xf32> to vector<16xf32>
    %1025 = vector.shape_cast %1024 : vector<16xf32> to vector<16x1xf32>
    %1026 = vector.broadcast %19 : vector<1x1xf32> to vector<16x1xf32>
    %1027 = arith.addf %1025, %1026 : vector<16x1xf32>
    %1028 = vector.shape_cast %1027 : vector<16x1xf32> to vector<16x1xf32>
    %1029 = vector.broadcast %1028 : vector<16x1xf32> to vector<16x128xf32>
    %c0_118 = arith.constant 0 : index
    %c0_119 = arith.constant 0 : index
    %1030 = vector.load %arg2[%c0_118, %c0_119] : memref<16x128xf32, #tpu.memory_space<vmem>>, vector<16x128xf32>
    tpu.vector_store %arg2[%c0_118, %c0_119], %1029 {strides = array<i32>} : memref<16x128xf32, #tpu.memory_space<vmem>>, vector<16x128xf32>,
    return
  }
}

</mosaic_0001>

<bundles_post_ra>
// kernel: xlstm_forward.1
= control target key start
LH: loop header
LB: loop body
LE: loop exit
PB: predicated region body
PF: predicated region fallthrough
CT: control target
= control target key end

     0   :  { %7 = vsyncpa [#allocation3], 0  ;;  %s2208_s9 = smov [#allocation2]   ;;  %s2731_s0 = inlined_call_operand.vmem [shape: f32[16,6], index: 0, kind: input, shape index: {}]   ;;  %s2732_s1 = inlined_call_operand.hbm [shape: f32[400,128], index: 1, kind: input, shape index: {}]   ;;  %s2733_s2 = inlined_call_operand.vmem [shape: f32[16,128], index: 2, kind: output, shape index: {}]  }
   0x1   :  { %s15_s10 = sshll.u32 %s2208_s9, 4  ;;  %s2184_s13 = scalar_lea.hbm %s2732_s1, 6400  ;;  %s16_s10 = int_to_ptr.vmem [resolvable:$true] %s15_s10 }
   0x2   :  { %p2185_p0 = scmp.ne.s32.totalorder %s2732_s1, %s2184_s13  ;;  %p2188_p1 = scmp.lt.u32.totalorder %s2184_s13, %s2732_s1 }
   0x4   :  { %p2190_p2 = pnand %p2188_p1, %p2185_p0 }
   0x6   :  { %2193 = shalt.err (!%p2190_p2)
}
   0x7   :  { %s2194_s18 = scalar_lea.vmem %s16_s10, 6400  ;;  %p2199_p4 = scmp.lt.s32.totalorder %s16_s10, %s16_s10 }
   0x8   :  { %p2195_p3 = scmp.ne.s32.totalorder %s16_s10, %s2194_s18  ;;  %p2200_p5 = scmp.lt.s32.totalorder %s2194_s18, %s2194_s18 }
   0xa   :  { %p2201_p6 = por %p2200_p5, %p2199_p4 }
   0xc   :  { %p2202_p7 = pnand %p2201_p6, %p2195_p3 }
   0xe   :  { %2205 = shalt.err (!%p2202_p7)
}
   0xf   :  { %s2209_s19 = smov 128   ;;  %s2210_s20 = smov 8  }
  0x10   :  { %21 = dma.hbm_to_vmem [thread:$0]  %s2732_s1, 6400, %s16_s10, [#allocation3], %s2209_s19, %s2209_s19, %s2210_s20  }
  0x11   :  { %2206 = dma.done.wait [#allocation3], 6400  }
  0x12   :  { %2207 = vsyncadd [#allocation3], 4294960896  ;;  %v2211_v0 = vmov 2   ;;  %v2212_v1 = vmov 0   ;;  %v297_v2 = vld [vmem:[%s2731_s0 + $0x8] sm:$0xff]  ;;  %v2213_v3 = vmov 3   ;;  %v75_v11 = vlaneseq }
  0x13   :  { %1940 = vset.pattern.permute.xlu1 %v2211_v0  ;;  %1938 = vset.pattern.permute.xlu0 %v2212_v1  ;;  %v2214_v4 = vmov 1   ;;  %v77_v5 = vld [vmem:[%s2731_s0] sm:$0xff]  ;;  %v2215_v6 = vmov 4   ;;  %v2216_v7 = vmov 5   ;;  %v1724_v51 = vld [vmem:[#allocation2 + $0x8] ss:$0 sm:$0xff] }
  0x14   :  { %310 = vperm.xlu1 %1940, %v297_v2   ;;  %300 = vperm.xlu0 %1938, %v297_v2   ;;  %v2275_v13 = vshrl.u32 %v75_v11, 7  ;;  %v25_v19 = vld [vmem:[#allocation2] sm:$0x3f]  ;;  %vm143_vm0 = vcmask 31744   ;;  %s2217_s0 = smov 4   ;;  %vm427_vm4 = vcmask 1040384  }
  0x15   :  { %s2220_s26 = smov 120   ;;  %s2225_s27 = smov 124   ;;  %vm1075_vm5 = vcmask 1041408   ;;  %vm1077_vm6 = vcmask 1042432   ;;  %vm1079_vm7 = vcmask 1043456   ;;  %vm1081_vm8 = vcmask 1044480  }
  0x16   :  { %v2278_v15 = vsub.s32 0, %v2275_v13  ;;  %v2281_v16 = vsub.s32 3, %v2275_v13  ;;  %v2284_v17 = vsub.s32 1, %v2275_v13  ;;  %v2287_v18 = vsub.s32 2, %v2275_v13  ;;  %s2226_s28 = smov 12   ;;  %s2227_s29 = smov 116  }
  0x17   :  { %v121_v26 = vsub.s32 4, %v2275_v13  ;;  %v130_v27 = vsub.s32 5, %v2275_v13  ;;  %vm169_vm1 = vcmp.ge.s32.totalorder %v2275_v13, 1  ;;  %vm178_vm2 = vcmp.ge.s32.totalorder %v2275_v13, 2  ;;  %s2228_s30 = smov 64  }
  0x18   :  { %1941 = vset.pattern.permute.xlu1 %v2213_v3  ;;  %1939 = vset.pattern.permute.xlu0 %v2214_v4  ;;  %v86_v22 = vrot.slane %v25_v19, %v2278_v15  ;;  %v113_v23 = vrot.slane %v25_v19, %v2281_v16  ;;  %v95_v24 = vrot.slane %v25_v19, %v2284_v17  ;;  %vm187_vm3 = vcmp.ge.s32.totalorder %v2275_v13, 3 }
  0x19   :  { %315 = vperm.xlu1 %1941, %v297_v2   ;;  %305 = vperm.xlu0 %1939, %v297_v2   ;;  %v104_v25 = vrot.slane %v25_v19, %v2287_v18  ;;  %v122_v34 = vrot.slane %v25_v19, %v121_v26  ;;  %v131_v35 = vrot.slane %v25_v19, %v130_v27  ;;  %vm1083_vm9 = vcmask 1045504  }
  0x1a   :  { %vm1085_vm10 = vcmask 1046528   ;;  %vm1426_vm12 = vcmask 523264  }
  0x1d   :  { %1942 = vset.pattern.permute.xlu1 %v2212_v1  ;;  %89 = vperm.xlu0 %1939, %v77_v5  }
  0x1e   :  { %80 = vperm.xlu1 %1942, %v77_v5  }
  0x21   :  { %1944 = vset.pattern.permute.xlu0 %v2213_v3 }
  0x22   :  { %1943 = vset.pattern.permute.xlu1 %v2211_v0  ;;  %107 = vperm.xlu0 %1944, %v77_v5  }
  0x23   :  { %98 = vperm.xlu1 %1943, %v77_v5  }
  0x26   :  { %1947 = vset.pattern.permute.xlu0 %v2215_v6 }
  0x27   :  { %1945 = vset.pattern.permute.xlu1 %v2215_v6  ;;  %116 = vperm.xlu0 %1947, %v77_v5  }
  0x28   :  { %320 = vperm.xlu1 %1945, %v297_v2  }
  0x2b   :  { %1949 = vset.pattern.permute.xlu0 %v2214_v4 }
  0x2c   :  { %1946 = vset.pattern.permute.xlu1 %v2216_v7 }
  0x2d   :  { %325 = vperm.xlu1 %1946, %v297_v2  }
  0x31   :  { %125 = vperm.xlu1 %1946, %v77_v5  }
  0x35   :  { %1948 = vset.pattern.permute.xlu1 %v2212_v1 }
  0x93   :  { %v311_v8 = vpop.permute.xlu1 %310  ;;  %v301_v9 = vpop.permute.xlu0 %300 }
  0x94   :  { %v303_v28 = vmul.f32 %v301_v9, %v86_v22  ;;  %v313_v33 = vmul.f32 %v311_v8, %v104_v25 }
  0x98   :  { %v316_v10 = vpop.permute.xlu1 %315  ;;  %v306_v12 = vpop.permute.xlu0 %305 }
  0x99   :  { %v318_v29 = vmul.f32 %v316_v10, %v113_v23  ;;  %v308_v30 = vmul.f32 %v306_v12, %v95_v24 }
  0x9b   :  { %v330_v36 = vadd.f32 %v318_v29, %v313_v33  ;;  %v329_v37 = vadd.f32 %v308_v30, %v303_v28  ;;  %v1725_v28 = vld [vmem:[#allocation2 + $0x10] ss:$0 sm:$0xff] }
  0x9c   :  { %v90_v20 = vpop.permute.xlu0 %89 }
  0x9d   :  { %v81_v14 = vpop.permute.xlu1 %80  ;;  %v96_v42 = vmul.f32 %v95_v24, %v90_v20  ;;  %v332_v46 = vadd.f32 %v330_v36, %v329_v37 }
  0x9e   :  { %v87_v43 = vmul.f32 %v86_v22, %v81_v14 }
  0xa0   :  { %v133_v52 = vadd.f32 %v96_v42, %v87_v43 }
  0xa1   :  { %v108_v32 = vpop.permute.xlu0 %107 }
  0xa2   :  { %v99_v21 = vpop.permute.xlu1 %98  ;;  %v114_v38 = vmul.f32 %v113_v23, %v108_v32 }
  0xa3   :  { %v105_v39 = vmul.f32 %v104_v25, %v99_v21 }
  0xa5   :  { %v134_v47 = vadd.f32 %v114_v38, %v105_v39 }
  0xa6   :  { %v117_v41 = vpop.permute.xlu0 %116 }
  0xa7   :  { %v321_v31 = vpop.permute.xlu1 %320  ;;  %v123_v49 = vmul.f32 %v122_v34, %v117_v41  ;;  %v136_v55 = vadd.f32 %v134_v47, %v133_v52 }
  0xa8   :  { %v323_v44 = vmul.f32 %v321_v31, %v122_v34 }
  0xac   :  { %v326_v40 = vpop.permute.xlu1 %325 }
  0xad   :  { %v328_v45 = vmul.f32 %v326_v40, %v131_v35 }
  0xaf   :  { %v331_v48 = vadd.f32 %v328_v45, %v323_v44 }
  0xb0   :  { %v126_v50 = vpop.permute.xlu1 %125 }
  0xb1   :  { %v333_v53 = vadd.f32 %v332_v46, %v331_v48  ;;  %v132_v54 = vmul.f32 %v131_v35, %v126_v50  ;;  %v28_v35 = vld [vmem:[#allocation2 + $0x18] sm:$0xf] }
  0xb2   :  { %v174_v36 = vrot.slane %v28_v35, %v2284_v17  ;;  %v166_v38 = vrot.slane %v28_v35, %v2278_v15  ;;  %v183_v41 = vrot.slane %v28_v35, %v2287_v18  ;;  %v192_v46 = vrot.slane %v28_v35, %v2281_v16 }
  0xb3   :  { %v135_v56 = vadd.f32 %v132_v54, %v123_v49  ;;  %v2299_v57 = vadd.f32 %v1724_v51, %v333_v53  ;;  %v1726_v54 = vld [vmem:[#allocation2 + $0x20] ss:$0 sm:$0xff] }
  0xb5   :  { %v137_v58 = vadd.f32 %v136_v55, %v135_v56  ;;  %v335_v59 = vsel %vm143_vm0, %v2299_v57, 0.0 }
  0xb6   :  { %336 = vadd.xlane.f32.xlu1 %v335_v59 }
  0xb7   :  { %v2303_v60 = vadd.f32 %v1724_v51, %v137_v58 }
  0xb9   :  { %v144_v61 = vsel %vm143_vm0, %v2303_v60, 0.0 }
  0xba   :  { %145 = vadd.xlane.f32.xlu0 %v144_v61 }
 0x143   :  { %v337_v62 = vpop.xlane.xlu1 %336 }
 0x144   :  { %v338_v63 = vmul.f32 0.25, %v337_v62 }
 0x146   :  { %v339_v2 = vsub.f32 %v2299_v57, %v338_v63 }
 0x147   :  { %v146_v5 = vpop.xlane.xlu0 %145 }
 0x148   :  { %v148_v8 = vmul.f32 0.25, %v146_v5  ;;  %v340_v9 = vmul.f32 %v339_v2, %v339_v2 }
 0x14a   :  { %v149_v10 = vsub.f32 %v2303_v60, %v148_v8  ;;  %v341_v11 = vsel %vm143_vm0, %v340_v9, 0.0 }
 0x14b   :  { %342 = vadd.xlane.f32.xlu0 %v341_v11 }
 0x14c   :  { %v150_v12 = vmul.f32 %v149_v10, %v149_v10 }
 0x14e   :  { %v151_v14 = vsel %vm143_vm0, %v150_v12, 0.0 }
 0x14f   :  { %152 = vadd.xlane.f32.xlu1 %v151_v14 }
 0x1d8   :  { %v343_v19 = vpop.xlane.xlu0 %342 }
 0x1d9   :  { %v344_v20 = vmul.f32 0.25, %v343_v19 }
 0x1db   :  { %v345_v21 = vadd.f32 1e-05, %v344_v20 }
 0x1dc   :  { %v153_v22 = vpop.xlane.xlu1 %152 }
 0x1dd   :  { %2024 = vrsqrt.f32 %v345_v21  ;;  %v154_v23 = vmul.f32 0.25, %v153_v22 }
 0x1df   :  { %v155_v24 = vadd.f32 1e-05, %v154_v23 }
 0x1e1   :  { %2026 = vrsqrt.f32 %v155_v24 }
 0x1e7   :  { %v2025_v25 = vpop.eup %2024 }
 0x1e8   :  { %v347_v29 = vmul.f32 %v2025_v25, %v339_v2 }
 0x1ea   :  { %v348_v30 = vmul.f32 %v1725_v28, %v347_v29 }
 0x1eb   :  { %v2027_v31 = vpop.eup %2026 }
 0x1ec   :  { %v157_v32 = vmul.f32 %v2027_v31, %v149_v10  ;;  %371 = vrot.lane.b32.xlu0 %v348_v30, %s2217_s0  ;;  %v350_v34 = vrot.slane %v348_v30, 7  ;;  %v354_v39 = vrot.slane %v348_v30, 6  ;;  %v349_v42 = vmul.f32 %v348_v30, %v166_v38 }
 0x1ed   :  { %v358_v44 = vrot.slane %v348_v30, 5  ;;  %v2218_v30 = vmov 7  }
 0x1ee   :  { %v162_v33 = vmul.f32 %v1725_v28, %v157_v32  ;;  %v351_v37 = vsel %vm169_vm1, %v350_v34, 0.0  ;;  %v355_v43 = vsel %vm178_vm2, %v354_v39, 0.0  ;;  %v2219_v34 = vmov 6  }
 0x1ef   :  { %v352_v40 = vmul.f32 %v351_v37, %v174_v36  ;;  %v356_v47 = vmul.f32 %v355_v43, %v183_v41  ;;  %v359_v48 = vsel %vm187_vm3, %v358_v44, 0.0  ;;  %v273_v43 = vsub.s32 6, %v2275_v13 }
 0x1f0   :  { %208 = vrot.lane.b32.xlu1 %v162_v33, %s2217_s0  ;;  %v168_v50 = vrot.slane %v162_v33, 7  ;;  %v360_v51 = vmul.f32 %v359_v48, %v192_v46  ;;  %v177_v55 = vrot.slane %v162_v33, 6  ;;  %v167_v59 = vmul.f32 %v166_v38, %v162_v33 }
 0x1f1   :  { %v353_v45 = vadd.f32 %v352_v40, %v349_v42  ;;  %v186_v62 = vrot.slane %v162_v33, 5  ;;  %v282_v44 = vsub.s32 7, %v2275_v13 }
 0x1f2   :  { %v170_v53 = vsel %vm169_vm1, %v168_v50, 0.0  ;;  %v179_v61 = vsel %vm178_vm2, %v177_v55, 0.0 }
 0x1f3   :  { %v357_v49 = vadd.f32 %v356_v47, %v353_v45  ;;  %v175_v56 = vmul.f32 %v174_v36, %v170_v53  ;;  %v184_v5 = vmul.f32 %v183_v41, %v179_v61  ;;  %v188_v8 = vsel %vm187_vm3, %v186_v62, 0.0  ;;  %v30_v45 = vld [vmem:[#allocation2 + $0x28] sm:$0xff] }
 0x1f4   :  { %v193_v10 = vmul.f32 %v192_v46, %v188_v8  ;;  %v274_v46 = vrot.slane %v30_v45, %v273_v43  ;;  %v283_v48 = vrot.slane %v30_v45, %v282_v44  ;;  %v265_v50 = vrot.slane %v30_v45, %v130_v27 }
 0x1f5   :  { %v361_v52 = vadd.f32 %v360_v51, %v357_v49  ;;  %v176_v63 = vadd.f32 %v175_v56, %v167_v59  ;;  %v247_v49 = vrot.slane %v30_v45, %v2281_v16  ;;  %v229_v51 = vrot.slane %v30_v45, %v2284_v17 }
 0x1f6   :  { %v256_v53 = vrot.slane %v30_v45, %v121_v26 }
 0x1f7   :  { %v362_v58 = vadd.f32 %v1726_v54, %v361_v52  ;;  %v185_v9 = vadd.f32 %v184_v5, %v176_v63  ;;  %v220_v52 = vrot.slane %v30_v45, %v2278_v15 }
 0x1f9   :  { %v1729_v2 = vmul.f32 -1.442695, %v362_v58  ;;  %v194_v11 = vadd.f32 %v193_v10, %v185_v9 }
 0x1fb   :  { %2028 = vpow2.f32 %v1729_v2  ;;  %v199_v12 = vadd.f32 %v1726_v54, %v194_v11  ;;  %v238_v54 = vrot.slane %v30_v45, %v2287_v18 }
 0x1fd   :  { %v1727_v19 = vmul.f32 -1.442695, %v199_v12 }
 0x1ff   :  { %2030 = vpow2.f32 %v1727_v19 }
 0x205   :  { %v2029_v14 = vpop.eup %2028 }
 0x206   :  { %v366_v20 = vadd.f32 1.0, %v2029_v14 }
 0x208   :  { %2032 = vrcp.f32 %v366_v20 }
 0x209   :  { %v2031_v21 = vpop.eup %2030 }
 0x20a   :  { %v203_v23 = vadd.f32 1.0, %v2031_v21 }
 0x20c   :  { %2034 = vrcp.f32 %v203_v23 }
 0x212   :  { %v2033_v22 = vpop.eup %2032 }
 0x213   :  { %v369_v24 = vmul.f32 %v2033_v22, %v362_v58  ;;  %v32_v58 = vld [vmem:[#allocation2 + $0x38] sm:$0xf] }
 0x214   :  { %v2355_v10 = vrot.slane %v32_v58, %v2278_v15  ;;  %v2358_v13 = vrot.slane %v32_v58, %v2284_v17  ;;  %v2361_v14 = vrot.slane %v32_v58, %v2287_v18  ;;  %v2364_v19 = vrot.slane %v32_v58, %v2281_v16 }
 0x216   :  { %v2035_v29 = vpop.eup %2034 }
 0x217   :  { %v206_v32 = vmul.f32 %v2035_v29, %v199_v12 }
 0x25e   :  { %v372_v25 = vpop.permute.xlu0 %371 }
 0x25f   :  { %v374_v28 = vsel %vm143_vm0, %v369_v24, %v372_v25  ;;  %v467_v24 = vmul.f32 0.0, %v2355_v10  ;;  %v472_v25 = vmul.f32 0.0, %v2358_v13 }
 0x260   :  { %382 = vperm.xlu0 %1949, %v374_v28   ;;  %377 = vperm.xlu1 %1948, %v374_v28  }
 0x262   :  { %v209_v31 = vpop.permute.xlu1 %208 }
 0x263   :  { %v211_v33 = vsel %vm143_vm0, %v206_v32, %v209_v31 }
 0x264   :  { %1952 = vset.pattern.permute.xlu0 %v2215_v6  ;;  %1950 = vset.pattern.permute.xlu1 %v2211_v0 }
 0x265   :  { %397 = vperm.xlu0 %1952, %v374_v28   ;;  %387 = vperm.xlu1 %1950, %v374_v28  }
 0x269   :  { %1955 = vset.pattern.permute.xlu0 %v2218_v30  ;;  %1951 = vset.pattern.permute.xlu1 %v2213_v3 }
 0x26a   :  { %412 = vperm.xlu0 %1955, %v374_v28   ;;  %392 = vperm.xlu1 %1951, %v374_v28  }
 0x26e   :  { %1958 = vset.pattern.permute.xlu0 %v2211_v0  ;;  %1953 = vset.pattern.permute.xlu1 %v2216_v7 }
 0x26f   :  { %232 = vperm.xlu0 %1958, %v211_v33   ;;  %402 = vperm.xlu1 %1953, %v374_v28  }
 0x273   :  { %1961 = vset.pattern.permute.xlu0 %v2216_v7  ;;  %1954 = vset.pattern.permute.xlu1 %v2219_v34 }
 0x274   :  { %259 = vperm.xlu0 %1961, %v211_v33   ;;  %407 = vperm.xlu1 %1954, %v374_v28  }
 0x278   :  { %1956 = vset.pattern.permute.xlu1 %v2212_v1 }
 0x279   :  { %214 = vperm.xlu1 %1956, %v211_v33  }
 0x27d   :  { %1957 = vset.pattern.permute.xlu1 %v2214_v4 }
 0x27e   :  { %223 = vperm.xlu1 %1957, %v211_v33  }
 0x282   :  { %1959 = vset.pattern.permute.xlu1 %v2213_v3 }
 0x283   :  { %241 = vperm.xlu1 %1959, %v211_v33  }
 0x287   :  { %1960 = vset.pattern.permute.xlu1 %v2215_v6 }
 0x288   :  { %250 = vperm.xlu1 %1960, %v211_v33  }
 0x28c   :  { %1962 = vset.pattern.permute.xlu1 %v2219_v34 }
 0x28d   :  { %268 = vperm.xlu1 %1962, %v211_v33  }
 0x291   :  { %1963 = vset.pattern.permute.xlu1 %v2218_v30 }
 0x292   :  { %277 = vperm.xlu1 %1963, %v211_v33  }
 0x2df   :  { %v378_v7 = vpop.permute.xlu1 %377  ;;  %v383_v39 = vpop.permute.xlu0 %382 }
 0x2e0   :  { %v385_v2 = vmul.f32 %v383_v39, %v229_v51  ;;  %v380_v5 = vmul.f32 %v378_v7, %v220_v52  ;;  %v477_v7 = vmul.f32 0.0, %v2361_v14 }
 0x2e2   :  { %v416_v20 = vadd.f32 %v385_v2, %v380_v5 }
 0x2e4   :  { %v388_v35 = vpop.permute.xlu1 %387  ;;  %v398_v41 = vpop.permute.xlu0 %397 }
 0x2e5   :  { %v400_v8 = vmul.f32 %v398_v41, %v256_v53  ;;  %v390_v27 = vmul.f32 %v388_v35, %v238_v54  ;;  %v482_v35 = vmul.f32 0.0, %v2364_v19  ;;  %v1728_v41 = vld [vmem:[#allocation2 + $0x30] ss:$0 sm:$0xff] }
 0x2e9   :  { %v393_v36 = vpop.permute.xlu1 %392  ;;  %v413_v6 = vpop.permute.xlu0 %412 }
 0x2ea   :  { %v415_v59 = vmul.f32 %v413_v6, %v283_v48  ;;  %v395_v61 = vmul.f32 %v393_v36, %v247_v49  ;;  %v483_v6 = vadd.f32 %v472_v25, %v467_v24 }
 0x2ec   :  { %v417_v26 = vadd.f32 %v395_v61, %v390_v27 }
 0x2ee   :  { %v403_v37 = vpop.permute.xlu1 %402  ;;  %v233_v62 = vpop.permute.xlu0 %232  ;;  %v420_v28 = vadd.f32 %v417_v26, %v416_v20 }
 0x2ef   :  { %v405_v63 = vmul.f32 %v403_v37, %v265_v50  ;;  %v239_v29 = vmul.f32 %v238_v54, %v233_v62 }
 0x2f1   :  { %v418_v11 = vadd.f32 %v405_v63, %v400_v8 }
 0x2f3   :  { %v408_v38 = vpop.permute.xlu1 %407  ;;  %v260_v21 = vpop.permute.xlu0 %259 }
 0x2f4   :  { %v410_v55 = vmul.f32 %v408_v38, %v274_v46  ;;  %v266_v32 = vmul.f32 %v265_v50, %v260_v21 }
 0x2f6   :  { %v419_v9 = vadd.f32 %v415_v59, %v410_v55 }
 0x2f8   :  { %v215_v40 = vpop.permute.xlu1 %214  ;;  %v421_v22 = vadd.f32 %v419_v9, %v418_v11 }
 0x2f9   :  { %v221_v33 = vmul.f32 %v220_v52, %v215_v40 }
 0x2fa   :  { %v422_v36 = vadd.f32 %v421_v22, %v420_v28 }
 0x2fd   :  { %v224_v42 = vpop.permute.xlu1 %223 }
 0x2fe   :  { %v230_v30 = vmul.f32 %v229_v51, %v224_v42 }
 0x300   :  { %v285_v43 = vadd.f32 %v230_v30, %v221_v33 }
 0x302   :  { %v242_v47 = vpop.permute.xlu1 %241 }
 0x303   :  { %v248_v23 = vmul.f32 %v247_v49, %v242_v47  ;;  %v484_v47 = vadd.f32 %v482_v35, %v477_v7  ;;  %v423_v49 = vadd.f32 %v1728_v41, %v422_v36 }
 0x305   :  { %v286_v37 = vadd.f32 %v248_v23, %v239_v29  ;;  %v485_v40 = vadd.f32 %v484_v47, %v483_v6  ;;  %v435_v54 = vrot.slane %v423_v49, 1  ;;  %v440_v55 = vrot.slane %v423_v49, 2 }
 0x306   :  { %v450_v58 = vrot.slane %v423_v49, 4  ;;  %v460_v20 = vrot.slane %v423_v49, 6 }
 0x307   :  { %v251_v56 = vpop.permute.xlu1 %250  ;;  %v289_v42 = vadd.f32 %v286_v37, %v285_v43 }
 0x308   :  { %v257_v31 = vmul.f32 %v256_v53, %v251_v56  ;;  %v425_v53 = vrot.slane %v423_v49, 7  ;;  %v445_v56 = vrot.slane %v423_v49, 3 }
 0x30a   :  { %v287_v44 = vadd.f32 %v266_v32, %v257_v31 }
 0x30c   :  { %v269_v12 = vpop.permute.xlu1 %268 }
 0x30d   :  { %v275_v38 = vmul.f32 %v274_v46, %v269_v12  ;;  %v455_v46 = vrot.slane %v423_v49, 5 }
 0x311   :  { %v278_v34 = vpop.permute.xlu1 %277 }
 0x312   :  { %v284_v39 = vmul.f32 %v283_v48, %v278_v34 }
 0x314   :  { %v288_v45 = vadd.f32 %v284_v39, %v275_v38 }
 0x316   :  { %v290_v51 = vadd.f32 %v288_v45, %v287_v44 }
 0x318   :  { %v291_v50 = vadd.f32 %v290_v51, %v289_v42  ;;  %v2221_v51 = vmov 12  }
 0x319   :  { %1964 = vset.pattern.permute.xlu0 %v2221_v51 }
 0x31a   :  { %v296_v52 = vadd.f32 %v1728_v41, %v291_v50  ;;  %v2222_v50 = vmov 13  }
 0x31b   :  { %1965 = vset.pattern.permute.xlu1 %v2222_v50 }
 0x31c   :  { %v428_v48 = vsel %vm427_vm4, %v296_v52, %v425_v53  ;;  %v430_v59 = vrot.slane %v296_v52, 1  ;;  %v433_v61 = vrot.slane %v296_v52, 2  ;;  %v438_v62 = vrot.slane %v296_v52, 3 }
 0x31d   :  { %v2371_v63 = vadd.f32 %v485_v40, %v428_v48  ;;  %v443_v2 = vrot.slane %v296_v52, 4  ;;  %v448_v5 = vrot.slane %v296_v52, 5  ;;  %v453_v8 = vrot.slane %v296_v52, 6 }
 0x31e   :  { %v2374_v27 = vsel %vm427_vm4, %v430_v59, %v423_v49  ;;  %v2377_v9 = vsel %vm427_vm4, %v433_v61, %v435_v54  ;;  %v2380_v26 = vsel %vm427_vm4, %v438_v62, %v440_v55  ;;  %v458_v11 = vrot.slane %v296_v52, 7 }
 0x31f   :  { %501 = vrot.lane.b32.xlu1 %v2371_v63, %s2217_s0  ;;  %2036 = vtanh.f32 %v2371_v63  ;;  %v497_v12 = vsub.f32 %v2371_v63, %v2371_v63  ;;  %v2388_v21 = vsel %vm427_vm4, %v443_v2, %v445_v56  ;;  %v2391_v22 = vsel %vm427_vm4, %v448_v5, %v450_v58 }
 0x320   :  { %v2394_v23 = vsel %vm427_vm4, %v453_v8, %v455_v46  ;;  %v2397_v25 = vsel %vm427_vm4, %v458_v11, %v460_v20  ;;  %v488_v30 = vand.u32 2147483647, %v2371_v63  ;;  %v487_v36 = vmin.f32 %v2371_v63, 0.0 }
 0x321   :  { %v498_v24 = vmul.f32 1.442695, %v497_v12  ;;  %v1730_v53 = vmul.f32 -1.442695, %v2371_v63  ;;  %v2223_v61 = vmov 14   ;;  %v2224_v62 = vmov 15  }
 0x322   :  { %v489_v31 = vsub.f32 0.0, %v488_v30 }
 0x323   :  { %2038 = vpow2.f32 %v498_v24 }
 0x324   :  { %v490_v32 = vmul.f32 1.442695, %v489_v31 }
 0x326   :  { %2040 = vpow2.f32 %v490_v32 }
 0x329   :  { %v2037_v28 = vpop.eup %2036 }
 0x32a   :  { %510 = vrot.lane.b32.xlu0 %v2037_v28, %s2220_s26 }
 0x32d   :  { %v2039_v29 = vpop.eup %2038 }
 0x32e   :  { %520 = vrot.lane.b32.xlu0 %v2039_v29, %s2217_s0 }
 0x330   :  { %v2041_v33 = vpop.eup %2040 }
 0x331   :  { %v492_v34 = vadd.f32 1.0, %v2041_v33 }
 0x333   :  { %2042 = vlog2.f32 %v492_v34 }
 0x33d   :  { %v2043_v7 = vpop.eup %2042 }
 0x33e   :  { %v494_v35 = vmul.f32 0.6931472, %v2043_v7 }
 0x340   :  { %v495_v37 = vsub.f32 %v487_v36, %v494_v35 }
 0x391   :  { %v502_v38 = vpop.permute.xlu1 %501 }
 0x392   :  { %v504_v39 = vsub.f32 %v495_v37, %v502_v38 }
 0x394   :  { %v505_v41 = vmul.f32 1.442695, %v504_v39 }
 0x396   :  { %2044 = vpow2.f32 %v505_v41 }
 0x39c   :  { %v511_v43 = vpop.permute.xlu0 %510 }
 0x39d   :  { %v513_v44 = vmul.f32 %v2039_v29, %v511_v43 }
 0x39f   :  { %515 = vrot.lane.b32.xlu1 %v513_v44, %s2217_s0 }
 0x3a0   :  { %v2045_v45 = vpop.eup %2044  ;;  %v521_v47 = vpop.permute.xlu0 %520 }
 0x3a1   :  { %v507_v6 = vmul.f32 0.0, %v2045_v45 }
 0x3a3   :  { %v523_v49 = vadd.f32 %v521_v47, %v507_v6 }
 0x3a5   :  { %2046 = vrcp.f32 %v523_v49 }
 0x3a6   :  { %2048 = vpow2.f32 %v1730_v53 }
 0x3af   :  { %v2047_v42 = vpop.eup %2046 }
 0x3b0   :  { %537 = vrot.lane.b32.xlu1 %v2047_v42, %s2210_s20  ;;  %v2049_v54 = vpop.eup %2048 }
 0x3b1   :  { %v527_v55 = vadd.f32 1.0, %v2049_v54 }
 0x3b3   :  { %2050 = vrcp.f32 %v527_v55 }
 0x3bd   :  { %v2051_v56 = vpop.eup %2050 }
 0x411   :  { %v516_v40 = vpop.permute.xlu1 %515 }
 0x412   :  { %v518_v52 = vadd.f32 %v516_v40, %v507_v6 }
 0x414   :  { %531 = vrot.lane.b32.xlu0 %v518_v52, %s2210_s20 }
 0x422   :  { %v538_v48 = vpop.permute.xlu1 %537 }
 0x486   :  { %v532_v58 = vpop.permute.xlu0 %531 }
 0x487   :  { %v534_v46 = vmul.f32 %v2051_v56, %v532_v58 }
 0x489   :  { %v2409_v59 = vmul.f32 %v538_v48, %v534_v46 }
 0x48b   :  { %548 = vperm.xlu1 %1965, %v2409_v59   ;;  %543 = vperm.xlu0 %1964, %v2409_v59  }
 0x48f   :  { %1966 = vset.pattern.permute.xlu1 %v2223_v61  ;;  %1967 = vset.pattern.permute.xlu0 %v2224_v62 }
 0x490   :  { %553 = vperm.xlu1 %1966, %v2409_v59   ;;  %558 = vperm.xlu0 %1967, %v2409_v59  }
 0x494   :  { %587 = vrot.lane.b32.xlu0 %v518_v52, %s2225_s27  ;;  %1969 = vset.pattern.permute.xlu1 %v2222_v50 }
 0x495   :  { %1968 = vset.pattern.permute.xlu0 %v2221_v51 }
 0x50a   :  { %v549_v2 = vpop.permute.xlu1 %548  ;;  %v544_v5 = vpop.permute.xlu0 %543 }
 0x50b   :  { %v551_v8 = vmul.f32 %v549_v2, %v2358_v13  ;;  %v546_v11 = vmul.f32 %v544_v5, %v2355_v10 }
 0x50d   :  { %v562_v29 = vadd.f32 %v551_v8, %v546_v11 }
 0x50f   :  { %v554_v12 = vpop.permute.xlu1 %553  ;;  %v559_v20 = vpop.permute.xlu0 %558 }
 0x510   :  { %v556_v24 = vmul.f32 %v554_v12, %v2361_v14  ;;  %v561_v28 = vmul.f32 %v559_v20, %v2364_v19 }
 0x512   :  { %v563_v30 = vadd.f32 %v561_v28, %v556_v24 }
 0x513   :  { %v588_v55 = vpop.permute.xlu0 %587 }
 0x514   :  { %v564_v31 = vadd.f32 %v563_v30, %v562_v29 }
 0x516   :  { %v565_v32 = vadd.f32 %v564_v31, %v2374_v27 }
 0x518   :  { %v567_v33 = vand.u32 2147483647, %v565_v32  ;;  %v566_v38 = vmin.f32 %v565_v32, 0.0  ;;  %v1731_v5 = vmul.f32 -1.442695, %v565_v32 }
 0x51a   :  { %v568_v34 = vsub.f32 0.0, %v567_v33 }
 0x51c   :  { %v569_v7 = vmul.f32 1.442695, %v568_v34 }
 0x51e   :  { %2052 = vpow2.f32 %v569_v7 }
 0x528   :  { %v2053_v35 = vpop.eup %2052 }
 0x529   :  { %v571_v36 = vadd.f32 1.0, %v2053_v35 }
 0x52b   :  { %2054 = vlog2.f32 %v571_v36 }
 0x52c   :  { %2056 = vtanh.f32 %v565_v32 }
 0x535   :  { %v2055_v37 = vpop.eup %2054 }
 0x536   :  { %v573_v39 = vmul.f32 0.6931472, %v2055_v37  ;;  %v2057_v43 = vpop.eup %2056 }
 0x538   :  { %v574_v41 = vsub.f32 %v566_v38, %v573_v39 }
 0x53a   :  { %576 = vrot.lane.b32.xlu1 %v574_v41, %s2225_s27 }
 0x53e   :  { %599 = vrot.lane.b32.xlu1 %v523_v49, %s2225_s27 }
 0x542   :  { %593 = vrot.lane.b32.xlu1 %v2057_v43, %s2220_s26 }
 0x5ac   :  { %v577_v27 = vpop.permute.xlu1 %576 }
 0x5ad   :  { %v579_v44 = vadd.f32 %v577_v27, %v2371_v63 }
 0x5af   :  { %v2429_v45 = vmax.f32 %v565_v32, %v579_v44 }
 0x5b0   :  { %v600_v52 = vpop.permute.xlu1 %599 }
 0x5b1   :  { %v581_v6 = vsub.f32 %v565_v32, %v2429_v45  ;;  %v584_v47 = vsub.f32 %v579_v44, %v2429_v45 }
 0x5b3   :  { %v582_v42 = vmul.f32 1.442695, %v581_v6  ;;  %v585_v40 = vmul.f32 1.442695, %v584_v47 }
 0x5b4   :  { %v594_v54 = vpop.permute.xlu1 %593 }
 0x5b5   :  { %2058 = vpow2.f32 %v582_v42 }
 0x5b6   :  { %2060 = vpow2.f32 %v585_v40 }
 0x5bf   :  { %v2059_v53 = vpop.eup %2058 }
 0x5c0   :  { %v2061_v49 = vpop.eup %2060  ;;  %v596_v56 = vmul.f32 %v2059_v53, %v594_v54 }
 0x5c1   :  { %v602_v58 = vmul.f32 %v2061_v49, %v600_v52  ;;  %v590_v46 = vmul.f32 %v2061_v49, %v588_v55 }
 0x5c3   :  { %v2433_v48 = vadd.f32 %v2059_v53, %v602_v58  ;;  %v2435_v63 = vadd.f32 %v596_v56, %v590_v46 }
 0x5c5   :  { %2062 = vrcp.f32 %v2433_v48  ;;  %611 = vrot.lane.b32.xlu0 %v2435_v63, %s2226_s28 }
 0x5c6   :  { %2064 = vpow2.f32 %v1731_v5 }
 0x5cf   :  { %v2063_v2 = vpop.eup %2062 }
 0x5d0   :  { %617 = vrot.lane.b32.xlu1 %v2063_v2, %s2226_s28  ;;  %v2065_v8 = vpop.eup %2064 }
 0x5d1   :  { %v607_v11 = vadd.f32 1.0, %v2065_v8 }
 0x5d3   :  { %2066 = vrcp.f32 %v607_v11 }
 0x5dd   :  { %v2067_v20 = vpop.eup %2066 }
 0x637   :  { %v612_v12 = vpop.permute.xlu0 %611 }
 0x638   :  { %v614_v24 = vmul.f32 %v2067_v20, %v612_v12 }
 0x642   :  { %v618_v28 = vpop.permute.xlu1 %617 }
 0x643   :  { %v2441_v29 = vmul.f32 %v618_v28, %v614_v24 }
 0x645   :  { %628 = vperm.xlu1 %1969, %v2441_v29   ;;  %623 = vperm.xlu0 %1968, %v2441_v29  }
 0x649   :  { %1970 = vset.pattern.permute.xlu1 %v2223_v61  ;;  %1971 = vset.pattern.permute.xlu0 %v2224_v62 }
 0x64a   :  { %633 = vperm.xlu1 %1970, %v2441_v29   ;;  %638 = vperm.xlu0 %1971, %v2441_v29  }
 0x64e   :  { %1973 = vset.pattern.permute.xlu1 %v2222_v50  ;;  %1972 = vset.pattern.permute.xlu0 %v2221_v51 }
 0x6c4   :  { %v629_v30 = vpop.permute.xlu1 %628  ;;  %v624_v31 = vpop.permute.xlu0 %623 }
 0x6c5   :  { %v631_v32 = vmul.f32 %v629_v30, %v2358_v13  ;;  %v626_v33 = vmul.f32 %v624_v31, %v2355_v10 }
 0x6c7   :  { %v642_v37 = vadd.f32 %v631_v32, %v626_v33 }
 0x6c9   :  { %v634_v34 = vpop.permute.xlu1 %633  ;;  %v639_v7 = vpop.permute.xlu0 %638 }
 0x6ca   :  { %v636_v35 = vmul.f32 %v634_v34, %v2361_v14  ;;  %v641_v36 = vmul.f32 %v639_v7, %v2364_v19  ;;  %v1059_v7 = vrot.slane %v2441_v29, 7 }
 0x6cc   :  { %v643_v38 = vadd.f32 %v641_v36, %v636_v35 }
 0x6ce   :  { %v644_v39 = vadd.f32 %v643_v38, %v642_v37  ;;  %v1087_v37 = vrot.slane %v2409_v59, 1 }
 0x6d0   :  { %v645_v41 = vadd.f32 %v644_v39, %v2377_v9 }
 0x6d2   :  { %v647_v43 = vand.u32 2147483647, %v645_v41  ;;  %v646_v40 = vmin.f32 %v645_v41, 0.0  ;;  %v1732_v31 = vmul.f32 -1.442695, %v645_v41 }
 0x6d4   :  { %v648_v27 = vsub.f32 0.0, %v647_v43  ;;  %v1101_v43 = vsel %vm427_vm4, %v1087_v37, %v2441_v29 }
 0x6d6   :  { %v649_v44 = vmul.f32 1.442695, %v648_v27 }
 0x6d8   :  { %2068 = vpow2.f32 %v649_v44 }
 0x6e2   :  { %v2069_v6 = vpop.eup %2068 }
 0x6e3   :  { %v651_v47 = vadd.f32 1.0, %v2069_v6 }
 0x6e5   :  { %2070 = vlog2.f32 %v651_v47 }
 0x6e6   :  { %2072 = vtanh.f32 %v645_v41 }
 0x6ef   :  { %v2071_v42 = vpop.eup %2070 }
 0x6f0   :  { %v653_v52 = vmul.f32 0.6931472, %v2071_v42  ;;  %v2073_v54 = vpop.eup %2072 }
 0x6f2   :  { %v654_v53 = vsub.f32 %v646_v40, %v653_v52 }
 0x6f4   :  { %656 = vrot.lane.b32.xlu1 %v654_v53, %s2225_s27 }
 0x6f8   :  { %670 = vrot.lane.b32.xlu1 %v2073_v54, %s2220_s26 }
 0x766   :  { %v657_v49 = vpop.permute.xlu1 %656 }
 0x767   :  { %v659_v9 = vadd.f32 %v657_v49, %v2429_v45 }
 0x769   :  { %v2459_v55 = vmax.f32 %v645_v41, %v659_v9 }
 0x76a   :  { %v671_v8 = vpop.permute.xlu1 %670 }
 0x76b   :  { %v661_v56 = vsub.f32 %v645_v41, %v2459_v55  ;;  %v664_v58 = vsub.f32 %v659_v9, %v2459_v55  ;;  %v1074_v41 = vsel %vm427_vm4, %v2409_v59, %v1059_v7 }
 0x76d   :  { %v662_v46 = vmul.f32 1.442695, %v661_v56  ;;  %v665_v2 = vmul.f32 1.442695, %v664_v58 }
 0x76f   :  { %2074 = vpow2.f32 %v662_v46 }
 0x770   :  { %2076 = vpow2.f32 %v665_v2 }
 0x779   :  { %v2075_v5 = vpop.eup %2074 }
 0x77a   :  { %v2077_v11 = vpop.eup %2076  ;;  %v673_v12 = vmul.f32 %v2075_v5, %v671_v8 }
 0x77b   :  { %v675_v20 = vmul.f32 %v2077_v11, %v2433_v48  ;;  %v667_v24 = vmul.f32 %v2077_v11, %v2435_v63 }
 0x77d   :  { %v2465_v28 = vadd.f32 %v2075_v5, %v675_v20  ;;  %v2467_v45 = vadd.f32 %v673_v12, %v667_v24 }
 0x77f   :  { %2078 = vrcp.f32 %v2465_v28  ;;  %684 = vrot.lane.b32.xlu0 %v2467_v45, %s2226_s28 }
 0x780   :  { %2080 = vpow2.f32 %v1732_v31 }
 0x789   :  { %v2079_v30 = vpop.eup %2078 }
 0x78a   :  { %690 = vrot.lane.b32.xlu1 %v2079_v30, %s2226_s28  ;;  %v2081_v32 = vpop.eup %2080 }
 0x78b   :  { %v680_v33 = vadd.f32 1.0, %v2081_v32 }
 0x78d   :  { %2082 = vrcp.f32 %v680_v33 }
 0x797   :  { %v2083_v34 = vpop.eup %2082 }
 0x7f1   :  { %v685_v48 = vpop.permute.xlu0 %684 }
 0x7f2   :  { %v687_v63 = vmul.f32 %v2083_v34, %v685_v48 }
 0x7fc   :  { %v691_v35 = vpop.permute.xlu1 %690 }
 0x7fd   :  { %v693_v36 = vmul.f32 %v691_v35, %v687_v63 }
 0x7ff   :  { %v1061_v38 = vrot.slane %v693_v36, 6  ;;  %v1089_v39 = vrot.slane %v693_v36, 7  ;;  %701 = vperm.xlu1 %1973, %v693_v36   ;;  %696 = vperm.xlu0 %1972, %v693_v36  }
 0x801   :  { %v2479_v27 = vsel %vm1075_vm5, %v1074_v41, %v1061_v38  ;;  %v2481_v44 = vsel %vm1075_vm5, %v1101_v43, %v1089_v39 }
 0x803   :  { %1974 = vset.pattern.permute.xlu1 %v2223_v61  ;;  %1975 = vset.pattern.permute.xlu0 %v2224_v62 }
 0x804   :  { %706 = vperm.xlu1 %1974, %v693_v36   ;;  %711 = vperm.xlu0 %1975, %v693_v36  }
 0x808   :  { %1977 = vset.pattern.permute.xlu1 %v2222_v50  ;;  %1976 = vset.pattern.permute.xlu0 %v2221_v51 }
 0x87e   :  { %v702_v6 = vpop.permute.xlu1 %701  ;;  %v697_v47 = vpop.permute.xlu0 %696 }
 0x87f   :  { %v704_v59 = vmul.f32 %v702_v6, %v2358_v13  ;;  %v699_v29 = vmul.f32 %v697_v47, %v2355_v10 }
 0x881   :  { %v715_v54 = vadd.f32 %v704_v59, %v699_v29 }
 0x883   :  { %v707_v42 = vpop.permute.xlu1 %706  ;;  %v712_v40 = vpop.permute.xlu0 %711 }
 0x884   :  { %v709_v52 = vmul.f32 %v707_v42, %v2361_v14  ;;  %v714_v53 = vmul.f32 %v712_v40, %v2364_v19 }
 0x886   :  { %v716_v49 = vadd.f32 %v714_v53, %v709_v52 }
 0x888   :  { %v717_v9 = vadd.f32 %v716_v49, %v715_v54 }
 0x88a   :  { %v718_v56 = vadd.f32 %v717_v9, %v2380_v26 }
 0x88c   :  { %v720_v58 = vand.u32 2147483647, %v718_v56  ;;  %v719_v12 = vmin.f32 %v718_v56, 0.0  ;;  %v1733_v6 = vmul.f32 -1.442695, %v718_v56 }
 0x88e   :  { %v721_v46 = vsub.f32 0.0, %v720_v58 }
 0x890   :  { %v722_v2 = vmul.f32 1.442695, %v721_v46 }
 0x892   :  { %2084 = vpow2.f32 %v722_v2 }
 0x89c   :  { %v2085_v5 = vpop.eup %2084 }
 0x89d   :  { %v724_v8 = vadd.f32 1.0, %v2085_v5 }
 0x89f   :  { %2086 = vlog2.f32 %v724_v8 }
 0x8a0   :  { %2088 = vtanh.f32 %v718_v56 }
 0x8a9   :  { %v2087_v11 = vpop.eup %2086 }
 0x8aa   :  { %v726_v20 = vmul.f32 0.6931472, %v2087_v11  ;;  %v2089_v30 = vpop.eup %2088 }
 0x8ac   :  { %v727_v24 = vsub.f32 %v719_v12, %v726_v20 }
 0x8ae   :  { %729 = vrot.lane.b32.xlu1 %v727_v24, %s2225_s27 }
 0x8b2   :  { %743 = vrot.lane.b32.xlu1 %v2089_v30, %s2220_s26 }
 0x920   :  { %v730_v31 = vpop.permute.xlu1 %729 }
 0x921   :  { %v732_v26 = vadd.f32 %v730_v31, %v2459_v55 }
 0x923   :  { %v2495_v32 = vmax.f32 %v718_v56, %v732_v26 }
 0x924   :  { %v744_v35 = vpop.permute.xlu1 %743 }
 0x925   :  { %v734_v33 = vsub.f32 %v718_v56, %v2495_v32  ;;  %v737_v48 = vsub.f32 %v732_v26, %v2495_v32 }
 0x927   :  { %v735_v34 = vmul.f32 1.442695, %v734_v33  ;;  %v738_v63 = vmul.f32 1.442695, %v737_v48 }
 0x929   :  { %2090 = vpow2.f32 %v735_v34 }
 0x92a   :  { %2092 = vpow2.f32 %v738_v63 }
 0x933   :  { %v2091_v7 = vpop.eup %2090 }
 0x934   :  { %v2093_v36 = vpop.eup %2092  ;;  %v746_v37 = vmul.f32 %v2091_v7, %v744_v35 }
 0x935   :  { %v748_v38 = vmul.f32 %v2093_v36, %v2465_v28  ;;  %v740_v39 = vmul.f32 %v2093_v36, %v2467_v45 }
 0x937   :  { %v2501_v41 = vadd.f32 %v2091_v7, %v748_v38  ;;  %v2503_v55 = vadd.f32 %v746_v37, %v740_v39 }
 0x939   :  { %2094 = vrcp.f32 %v2501_v41  ;;  %757 = vrot.lane.b32.xlu0 %v2503_v55, %s2226_s28 }
 0x93a   :  { %2096 = vpow2.f32 %v1733_v6 }
 0x943   :  { %v2095_v43 = vpop.eup %2094 }
 0x944   :  { %763 = vrot.lane.b32.xlu1 %v2095_v43, %s2226_s28  ;;  %v2097_v47 = vpop.eup %2096 }
 0x945   :  { %v753_v59 = vadd.f32 1.0, %v2097_v47 }
 0x947   :  { %2098 = vrcp.f32 %v753_v59 }
 0x951   :  { %v2099_v29 = vpop.eup %2098 }
 0x9ab   :  { %v758_v28 = vpop.permute.xlu0 %757 }
 0x9ac   :  { %v760_v45 = vmul.f32 %v2099_v29, %v758_v28 }
 0x9b6   :  { %v764_v42 = vpop.permute.xlu1 %763 }
 0x9b7   :  { %v766_v40 = vmul.f32 %v764_v42, %v760_v45 }
 0x9b9   :  { %774 = vperm.xlu1 %1977, %v766_v40   ;;  %769 = vperm.xlu0 %1976, %v766_v40   ;;  %v1063_v52 = vrot.slane %v766_v40, 5  ;;  %v1091_v53 = vrot.slane %v766_v40, 6 }
 0x9bb   :  { %v2510_v54 = vsel %vm1077_vm6, %v2479_v27, %v1063_v52  ;;  %v2513_v49 = vsel %vm1077_vm6, %v2481_v44, %v1091_v53 }
 0x9bd   :  { %1978 = vset.pattern.permute.xlu1 %v2223_v61  ;;  %1979 = vset.pattern.permute.xlu0 %v2224_v62 }
 0x9be   :  { %779 = vperm.xlu1 %1978, %v766_v40   ;;  %784 = vperm.xlu0 %1979, %v766_v40  }
 0x9c2   :  { %1981 = vset.pattern.permute.xlu1 %v2222_v50  ;;  %1980 = vset.pattern.permute.xlu0 %v2221_v51 }
 0xa38   :  { %v775_v9 = vpop.permute.xlu1 %774  ;;  %v770_v56 = vpop.permute.xlu0 %769 }
 0xa39   :  { %v777_v58 = vmul.f32 %v775_v9, %v2358_v13  ;;  %v772_v27 = vmul.f32 %v770_v56, %v2355_v10 }
 0xa3b   :  { %v788_v8 = vadd.f32 %v777_v58, %v772_v27 }
 0xa3d   :  { %v780_v46 = vpop.permute.xlu1 %779  ;;  %v785_v2 = vpop.permute.xlu0 %784 }
 0xa3e   :  { %v782_v44 = vmul.f32 %v780_v46, %v2361_v14  ;;  %v787_v5 = vmul.f32 %v785_v2, %v2364_v19 }
 0xa40   :  { %v789_v11 = vadd.f32 %v787_v5, %v782_v44 }
 0xa42   :  { %v790_v12 = vadd.f32 %v789_v11, %v788_v8 }
 0xa44   :  { %v791_v20 = vadd.f32 %v790_v12, %v2388_v21 }
 0xa46   :  { %v793_v24 = vand.u32 2147483647, %v791_v20  ;;  %v792_v34 = vmin.f32 %v791_v20, 0.0  ;;  %v1734_v53 = vmul.f32 -1.442695, %v791_v20 }
 0xa48   :  { %v794_v30 = vsub.f32 0.0, %v793_v24 }
 0xa4a   :  { %v795_v31 = vmul.f32 1.442695, %v794_v30 }
 0xa4c   :  { %2100 = vpow2.f32 %v795_v31 }
 0xa56   :  { %v2101_v26 = vpop.eup %2100 }
 0xa57   :  { %v797_v33 = vadd.f32 1.0, %v2101_v26 }
 0xa59   :  { %2102 = vlog2.f32 %v797_v33 }
 0xa5a   :  { %2104 = vtanh.f32 %v791_v20 }
 0xa63   :  { %v2103_v48 = vpop.eup %2102 }
 0xa64   :  { %v799_v63 = vmul.f32 0.6931472, %v2103_v48  ;;  %v2105_v35 = vpop.eup %2104 }
 0xa66   :  { %v800_v7 = vsub.f32 %v792_v34, %v799_v63 }
 0xa68   :  { %802 = vrot.lane.b32.xlu1 %v800_v7, %s2225_s27 }
 0xa6c   :  { %816 = vrot.lane.b32.xlu1 %v2105_v35, %s2220_s26 }
 0xada   :  { %v803_v36 = vpop.permute.xlu1 %802 }
 0xadb   :  { %v805_v21 = vadd.f32 %v803_v36, %v2495_v32 }
 0xadd   :  { %v2527_v37 = vmax.f32 %v791_v20, %v805_v21 }
 0xade   :  { %v817_v59 = vpop.permute.xlu1 %816 }
 0xadf   :  { %v807_v38 = vsub.f32 %v791_v20, %v2527_v37  ;;  %v810_v39 = vsub.f32 %v805_v21, %v2527_v37 }
 0xae1   :  { %v808_v43 = vmul.f32 1.442695, %v807_v38  ;;  %v811_v6 = vmul.f32 1.442695, %v810_v39 }
 0xae3   :  { %2106 = vpow2.f32 %v808_v43 }
 0xae4   :  { %2108 = vpow2.f32 %v811_v6 }
 0xaed   :  { %v2107_v47 = vpop.eup %2106 }
 0xaee   :  { %v2109_v28 = vpop.eup %2108  ;;  %v819_v29 = vmul.f32 %v2107_v47, %v817_v59 }
 0xaef   :  { %v821_v45 = vmul.f32 %v2109_v28, %v2501_v41  ;;  %v813_v42 = vmul.f32 %v2109_v28, %v2503_v55 }
 0xaf1   :  { %v2533_v40 = vadd.f32 %v2107_v47, %v821_v45  ;;  %v2535_v32 = vadd.f32 %v819_v29, %v813_v42 }
 0xaf3   :  { %2110 = vrcp.f32 %v2533_v40  ;;  %830 = vrot.lane.b32.xlu0 %v2535_v32, %s2226_s28 }
 0xaf4   :  { %2112 = vpow2.f32 %v1734_v53 }
 0xafd   :  { %v2111_v52 = vpop.eup %2110 }
 0xafe   :  { %836 = vrot.lane.b32.xlu1 %v2111_v52, %s2226_s28  ;;  %v2113_v9 = vpop.eup %2112 }
 0xaff   :  { %v826_v56 = vadd.f32 1.0, %v2113_v9 }
 0xb01   :  { %2114 = vrcp.f32 %v826_v56 }
 0xb0b   :  { %v2115_v58 = vpop.eup %2114 }
 0xb65   :  { %v831_v41 = vpop.permute.xlu0 %830 }
 0xb66   :  { %v833_v55 = vmul.f32 %v2115_v58, %v831_v41 }
 0xb70   :  { %v837_v27 = vpop.permute.xlu1 %836 }
 0xb71   :  { %v839_v46 = vmul.f32 %v837_v27, %v833_v55 }
 0xb73   :  { %847 = vperm.xlu1 %1981, %v839_v46   ;;  %842 = vperm.xlu0 %1980, %v839_v46   ;;  %v1065_v2 = vrot.slane %v839_v46, 4  ;;  %v1093_v44 = vrot.slane %v839_v46, 5 }
 0xb75   :  { %v2542_v5 = vsel %vm1079_vm7, %v2510_v54, %v1065_v2  ;;  %v2545_v8 = vsel %vm1079_vm7, %v2513_v49, %v1093_v44 }
 0xb77   :  { %1982 = vset.pattern.permute.xlu1 %v2223_v61  ;;  %1983 = vset.pattern.permute.xlu0 %v2224_v62 }
 0xb78   :  { %852 = vperm.xlu1 %1982, %v839_v46   ;;  %857 = vperm.xlu0 %1983, %v839_v46  }
 0xb7c   :  { %1985 = vset.pattern.permute.xlu1 %v2222_v50  ;;  %1984 = vset.pattern.permute.xlu0 %v2221_v51 }
 0xbf2   :  { %v848_v11 = vpop.permute.xlu1 %847  ;;  %v843_v12 = vpop.permute.xlu0 %842 }
 0xbf3   :  { %v850_v20 = vmul.f32 %v848_v11, %v2358_v13  ;;  %v845_v54 = vmul.f32 %v843_v12, %v2355_v10 }
 0xbf5   :  { %v861_v26 = vadd.f32 %v850_v20, %v845_v54 }
 0xbf7   :  { %v853_v24 = vpop.permute.xlu1 %852  ;;  %v858_v30 = vpop.permute.xlu0 %857 }
 0xbf8   :  { %v855_v49 = vmul.f32 %v853_v24, %v2361_v14  ;;  %v860_v31 = vmul.f32 %v858_v30, %v2364_v19 }
 0xbfa   :  { %v862_v33 = vadd.f32 %v860_v31, %v855_v49 }
 0xbfc   :  { %v863_v48 = vadd.f32 %v862_v33, %v861_v26 }
 0xbfe   :  { %v864_v34 = vadd.f32 %v863_v48, %v2391_v22 }
 0xc00   :  { %v866_v63 = vand.u32 2147483647, %v864_v34  ;;  %v865_v39 = vmin.f32 %v864_v34, 0.0  ;;  %v1735_v2 = vmul.f32 -1.442695, %v864_v34 }
 0xc02   :  { %v867_v7 = vsub.f32 0.0, %v866_v63 }
 0xc04   :  { %v868_v35 = vmul.f32 1.442695, %v867_v7 }
 0xc06   :  { %2116 = vpow2.f32 %v868_v35 }
 0xc10   :  { %v2117_v36 = vpop.eup %2116 }
 0xc11   :  { %v870_v21 = vadd.f32 1.0, %v2117_v36 }
 0xc13   :  { %2118 = vlog2.f32 %v870_v21 }
 0xc14   :  { %2120 = vtanh.f32 %v864_v34 }
 0xc1d   :  { %v2119_v38 = vpop.eup %2118 }
 0xc1e   :  { %v872_v43 = vmul.f32 0.6931472, %v2119_v38  ;;  %v2121_v47 = vpop.eup %2120 }
 0xc20   :  { %v873_v6 = vsub.f32 %v865_v39, %v872_v43 }
 0xc22   :  { %875 = vrot.lane.b32.xlu1 %v873_v6, %s2225_s27 }
 0xc26   :  { %889 = vrot.lane.b32.xlu1 %v2121_v47, %s2220_s26 }
 0xc94   :  { %v876_v59 = vpop.permute.xlu1 %875 }
 0xc95   :  { %v878_v22 = vadd.f32 %v876_v59, %v2527_v37 }
 0xc97   :  { %v2559_v28 = vmax.f32 %v864_v34, %v878_v22 }
 0xc98   :  { %v890_v9 = vpop.permute.xlu1 %889 }
 0xc99   :  { %v880_v29 = vsub.f32 %v864_v34, %v2559_v28  ;;  %v883_v45 = vsub.f32 %v878_v22, %v2559_v28 }
 0xc9b   :  { %v881_v42 = vmul.f32 1.442695, %v880_v29  ;;  %v884_v52 = vmul.f32 1.442695, %v883_v45 }
 0xc9d   :  { %2122 = vpow2.f32 %v881_v42 }
 0xc9e   :  { %2124 = vpow2.f32 %v884_v52 }
 0xca7   :  { %v2123_v53 = vpop.eup %2122 }
 0xca8   :  { %v2125_v56 = vpop.eup %2124  ;;  %v892_v41 = vmul.f32 %v2123_v53, %v890_v9 }
 0xca9   :  { %v894_v58 = vmul.f32 %v2125_v56, %v2533_v40  ;;  %v886_v55 = vmul.f32 %v2125_v56, %v2535_v32 }
 0xcab   :  { %v2565_v27 = vadd.f32 %v2123_v53, %v894_v58  ;;  %v2567_v37 = vadd.f32 %v892_v41, %v886_v55 }
 0xcad   :  { %2126 = vrcp.f32 %v2565_v27  ;;  %903 = vrot.lane.b32.xlu0 %v2567_v37, %s2226_s28 }
 0xcae   :  { %2128 = vpow2.f32 %v1735_v2 }
 0xcb7   :  { %v2127_v46 = vpop.eup %2126 }
 0xcb8   :  { %909 = vrot.lane.b32.xlu1 %v2127_v46, %s2226_s28  ;;  %v2129_v44 = vpop.eup %2128 }
 0xcb9   :  { %v899_v11 = vadd.f32 1.0, %v2129_v44 }
 0xcbb   :  { %2130 = vrcp.f32 %v899_v11 }
 0xcc5   :  { %v2131_v12 = vpop.eup %2130 }
 0xd1f   :  { %v904_v40 = vpop.permute.xlu0 %903 }
 0xd20   :  { %v906_v32 = vmul.f32 %v2131_v12, %v904_v40 }
 0xd2a   :  { %v910_v20 = vpop.permute.xlu1 %909 }
 0xd2b   :  { %v912_v54 = vmul.f32 %v910_v20, %v906_v32 }
 0xd2d   :  { %920 = vperm.xlu1 %1985, %v912_v54   ;;  %915 = vperm.xlu0 %1984, %v912_v54   ;;  %v1067_v24 = vrot.slane %v912_v54, 3  ;;  %v1095_v30 = vrot.slane %v912_v54, 4 }
 0xd2f   :  { %v2574_v49 = vsel %vm1081_vm8, %v2542_v5, %v1067_v24  ;;  %v2577_v31 = vsel %vm1081_vm8, %v2545_v8, %v1095_v30 }
 0xd31   :  { %1986 = vset.pattern.permute.xlu1 %v2223_v61  ;;  %1987 = vset.pattern.permute.xlu0 %v2224_v62 }
 0xd32   :  { %925 = vperm.xlu1 %1986, %v912_v54   ;;  %930 = vperm.xlu0 %1987, %v912_v54  }
 0xd36   :  { %1989 = vset.pattern.permute.xlu1 %v2222_v50  ;;  %1988 = vset.pattern.permute.xlu0 %v2221_v51 }
 0xdac   :  { %v921_v26 = vpop.permute.xlu1 %920  ;;  %v916_v33 = vpop.permute.xlu0 %915 }
 0xdad   :  { %v923_v48 = vmul.f32 %v921_v26, %v2358_v13  ;;  %v918_v5 = vmul.f32 %v916_v33, %v2355_v10 }
 0xdaf   :  { %v934_v35 = vadd.f32 %v923_v48, %v918_v5 }
 0xdb1   :  { %v926_v34 = vpop.permute.xlu1 %925  ;;  %v931_v63 = vpop.permute.xlu0 %930 }
 0xdb2   :  { %v928_v8 = vmul.f32 %v926_v34, %v2361_v14  ;;  %v933_v7 = vmul.f32 %v931_v63, %v2364_v19 }
 0xdb4   :  { %v935_v36 = vadd.f32 %v933_v7, %v928_v8 }
 0xdb6   :  { %v936_v21 = vadd.f32 %v935_v36, %v934_v35 }
 0xdb8   :  { %v937_v38 = vadd.f32 %v936_v21, %v2394_v23 }
 0xdba   :  { %v939_v39 = vand.u32 2147483647, %v937_v38  ;;  %v938_v29 = vmin.f32 %v937_v38, 0.0  ;;  %v1736_v54 = vmul.f32 -1.442695, %v937_v38 }
 0xdbc   :  { %v940_v43 = vsub.f32 0.0, %v939_v39 }
 0xdbe   :  { %v941_v6 = vmul.f32 1.442695, %v940_v43 }
 0xdc0   :  { %2132 = vpow2.f32 %v941_v6 }
 0xdca   :  { %v2133_v47 = vpop.eup %2132 }
 0xdcb   :  { %v943_v59 = vadd.f32 1.0, %v2133_v47 }
 0xdcd   :  { %2134 = vlog2.f32 %v943_v59 }
 0xdce   :  { %2136 = vtanh.f32 %v937_v38 }
 0xdd7   :  { %v2135_v22 = vpop.eup %2134 }
 0xdd8   :  { %v945_v45 = vmul.f32 0.6931472, %v2135_v22  ;;  %v2137_v52 = vpop.eup %2136 }
 0xdda   :  { %v946_v42 = vsub.f32 %v938_v29, %v945_v45 }
 0xddc   :  { %948 = vrot.lane.b32.xlu1 %v946_v42, %s2225_s27 }
 0xde0   :  { %962 = vrot.lane.b32.xlu1 %v2137_v52, %s2220_s26 }
 0xe4e   :  { %v949_v53 = vpop.permute.xlu1 %948 }
 0xe4f   :  { %v951_v23 = vadd.f32 %v949_v53, %v2559_v28 }
 0xe51   :  { %v2591_v9 = vmax.f32 %v937_v38, %v951_v23 }
 0xe52   :  { %v963_v2 = vpop.permute.xlu1 %962 }
 0xe53   :  { %v953_v56 = vsub.f32 %v937_v38, %v2591_v9  ;;  %v956_v41 = vsub.f32 %v951_v23, %v2591_v9 }
 0xe55   :  { %v954_v58 = vmul.f32 1.442695, %v953_v56  ;;  %v957_v55 = vmul.f32 1.442695, %v956_v41 }
 0xe57   :  { %2138 = vpow2.f32 %v954_v58 }
 0xe58   :  { %2140 = vpow2.f32 %v957_v55 }
 0xe61   :  { %v2139_v46 = vpop.eup %2138 }
 0xe62   :  { %v2141_v44 = vpop.eup %2140  ;;  %v965_v11 = vmul.f32 %v2139_v46, %v963_v2 }
 0xe63   :  { %v967_v40 = vmul.f32 %v2141_v44, %v2565_v27  ;;  %v959_v12 = vmul.f32 %v2141_v44, %v2567_v37 }
 0xe65   :  { %v2597_v32 = vadd.f32 %v2139_v46, %v967_v40  ;;  %v2599_v28 = vadd.f32 %v965_v11, %v959_v12 }
 0xe67   :  { %2142 = vrcp.f32 %v2597_v32  ;;  %976 = vrot.lane.b32.xlu0 %v2599_v28, %s2226_s28 }
 0xe68   :  { %2144 = vpow2.f32 %v1736_v54 }
 0xe71   :  { %v2143_v20 = vpop.eup %2142 }
 0xe72   :  { %982 = vrot.lane.b32.xlu1 %v2143_v20, %s2226_s28  ;;  %v2145_v24 = vpop.eup %2144 }
 0xe73   :  { %v972_v30 = vadd.f32 1.0, %v2145_v24 }
 0xe75   :  { %2146 = vrcp.f32 %v972_v30 }
 0xe7f   :  { %v2147_v26 = vpop.eup %2146 }
 0xed9   :  { %v977_v27 = vpop.permute.xlu0 %976 }
 0xeda   :  { %v979_v37 = vmul.f32 %v2147_v26, %v977_v27 }
 0xee4   :  { %v983_v33 = vpop.permute.xlu1 %982 }
 0xee5   :  { %v985_v48 = vmul.f32 %v983_v33, %v979_v37 }
 0xee7   :  { %993 = vperm.xlu1 %1989, %v985_v48   ;;  %988 = vperm.xlu0 %1988, %v985_v48   ;;  %v1069_v5 = vrot.slane %v985_v48, 2  ;;  %v1097_v34 = vrot.slane %v985_v48, 3 }
 0xee9   :  { %v2606_v63 = vsel %vm1083_vm9, %v2574_v49, %v1069_v5  ;;  %v2609_v8 = vsel %vm1083_vm9, %v2577_v31, %v1097_v34 }
 0xeeb   :  { %1990 = vset.pattern.permute.xlu1 %v2223_v61  ;;  %1991 = vset.pattern.permute.xlu0 %v2224_v62 }
 0xeec   :  { %998 = vperm.xlu1 %1990, %v985_v48   ;;  %1003 = vperm.xlu0 %1991, %v985_v48  }
 0xef0   :  { %1993 = vset.pattern.permute.xlu1 %v2222_v50  ;;  %1992 = vset.pattern.permute.xlu0 %v2221_v51 }
 0xf66   :  { %v994_v7 = vpop.permute.xlu1 %993  ;;  %v989_v35 = vpop.permute.xlu0 %988 }
 0xf67   :  { %v996_v36 = vmul.f32 %v994_v7, %v2358_v13  ;;  %v991_v49 = vmul.f32 %v989_v35, %v2355_v10 }
 0xf69   :  { %v1007_v43 = vadd.f32 %v996_v36, %v991_v49 }
 0xf6b   :  { %v999_v21 = vpop.permute.xlu1 %998  ;;  %v1004_v38 = vpop.permute.xlu0 %1003 }
 0xf6c   :  { %v1001_v31 = vmul.f32 %v999_v21, %v2361_v14  ;;  %v1006_v39 = vmul.f32 %v1004_v38, %v2364_v19 }
 0xf6e   :  { %v1008_v6 = vadd.f32 %v1006_v39, %v1001_v31 }
 0xf70   :  { %v1009_v47 = vadd.f32 %v1008_v6, %v1007_v43 }
 0xf72   :  { %v1010_v59 = vadd.f32 %v1009_v47, %v2397_v25 }
 0xf74   :  { %v1012_v22 = vand.u32 2147483647, %v1010_v59  ;;  %v1011_v13 = vmin.f32 %v1010_v59, 0.0  ;;  %v1737_v30 = vmul.f32 -1.442695, %v1010_v59 }
 0xf76   :  { %v1013_v29 = vsub.f32 0.0, %v1012_v22 }
 0xf78   :  { %v1014_v45 = vmul.f32 1.442695, %v1013_v29 }
 0xf7a   :  { %2148 = vpow2.f32 %v1014_v45 }
 0xf84   :  { %v2149_v42 = vpop.eup %2148 }
 0xf85   :  { %v1016_v52 = vadd.f32 1.0, %v2149_v42 }
 0xf87   :  { %2150 = vlog2.f32 %v1016_v52 }
 0xf88   :  { %2152 = vtanh.f32 %v1010_v59 }
 0xf91   :  { %v2151_v10 = vpop.eup %2150 }
 0xf92   :  { %v1018_v53 = vmul.f32 0.6931472, %v2151_v10  ;;  %v2153_v14 = vpop.eup %2152 }
 0xf94   :  { %v1019_v23 = vsub.f32 %v1011_v13, %v1018_v53 }
 0xf96   :  { %1021 = vrot.lane.b32.xlu1 %v1019_v23, %s2225_s27 }
 0xf9a   :  { %1035 = vrot.lane.b32.xlu1 %v2153_v14, %s2220_s26 }
0x1008   :  { %v1022_v19 = vpop.permute.xlu1 %1021 }
0x1009   :  { %v1024_v25 = vadd.f32 %v1022_v19, %v2591_v9 }
0x100b   :  { %v1025_v56 = vmax.f32 %v1010_v59, %v1024_v25 }
0x100c   :  { %v1036_v44 = vpop.permute.xlu1 %1035 }
0x100d   :  { %v1026_v41 = vsub.f32 %v1010_v59, %v1025_v56  ;;  %v1029_v58 = vsub.f32 %v1024_v25, %v1025_v56 }
0x100f   :  { %v1027_v55 = vmul.f32 1.442695, %v1026_v41  ;;  %v1030_v46 = vmul.f32 1.442695, %v1029_v58 }
0x1011   :  { %2154 = vpow2.f32 %v1027_v55 }
0x1012   :  { %2156 = vpow2.f32 %v1030_v46 }
0x101b   :  { %v2155_v2 = vpop.eup %2154 }
0x101c   :  { %v2157_v11 = vpop.eup %2156  ;;  %v1038_v40 = vmul.f32 %v2155_v2, %v1036_v44 }
0x101d   :  { %v1040_v12 = vmul.f32 %v2157_v11, %v2597_v32  ;;  %v1032_v20 = vmul.f32 %v2157_v11, %v2599_v28 }
0x101f   :  { %v1041_v54 = vadd.f32 %v2155_v2, %v1040_v12  ;;  %v1039_v24 = vadd.f32 %v1038_v40, %v1032_v20 }
0x1021   :  { %2158 = vrcp.f32 %v1041_v54  ;;  %1049 = vrot.lane.b32.xlu0 %v1039_v24, %s2226_s28 }
0x1022   :  { %2160 = vpow2.f32 %v1737_v30 }
0x102b   :  { %v2159_v9 = vpop.eup %2158 }
0x102c   :  { %1055 = vrot.lane.b32.xlu1 %v2159_v9, %s2226_s28  ;;  %v2161_v27 = vpop.eup %2160 }
0x102d   :  { %v1045_v26 = vadd.f32 1.0, %v2161_v27 }
0x102f   :  { %2162 = vrcp.f32 %v1045_v26 }
0x1039   :  { %v2163_v33 = vpop.eup %2162 }
0x1093   :  { %v1050_v37 = vpop.permute.xlu0 %1049 }
0x1094   :  { %v1052_v48 = vmul.f32 %v2163_v33, %v1050_v37 }
0x109e   :  { %v1056_v5 = vpop.permute.xlu1 %1055 }
0x109f   :  { %v1058_v32 = vmul.f32 %v1056_v5, %v1052_v48 }
0x10a1   :  { %v1072_v28 = vrot.slane %v1058_v32, 1  ;;  %v1099_v7 = vrot.slane %v1058_v32, 2 }
0x10a3   :  { %v1086_v34 = vsel %vm1085_vm10, %v2606_v63, %v1072_v28  ;;  %v1107_v35 = vsel %vm1085_vm10, %v2609_v8, %v1099_v7  ;;  %v34_v63 = vld [vmem:[#allocation2 + $0x48] sm:$0xf] }
0x10a4   :  { %1125 = vperm.xlu1 %1993, %v1086_v34   ;;  %1110 = vperm.xlu0 %1992, %v1086_v34   ;;  %v2638_v36 = vrot.slane %v34_v63, %v2284_v17  ;;  %v2641_v21 = vrot.slane %v34_v63, %v2278_v15  ;;  %v2644_v38 = vrot.slane %v34_v63, %v2287_v18 }
0x10a5   :  { %v2647_v31 = vrot.slane %v34_v63, %v2281_v16 }
0x10a8   :  { %1994 = vset.pattern.permute.xlu1 %v2223_v61  ;;  %1995 = vset.pattern.permute.xlu0 %v2224_v62 }
0x10a9   :  { %1139 = vperm.xlu1 %1994, %v1086_v34   ;;  %1153 = vperm.xlu0 %1995, %v1086_v34  }
0x10ad   :  { %1996 = vset.pattern.permute.xlu1 %v2221_v51  ;;  %1998 = vset.pattern.permute.xlu0 %v2223_v61 }
0x10ae   :  { %1143 = vperm.xlu0 %1998, %v1107_v35   ;;  %1115 = vperm.xlu1 %1996, %v1107_v35  }
0x10b2   :  { %1997 = vset.pattern.permute.xlu1 %v2222_v50  ;;  %2001 = vset.pattern.permute.xlu0 %v2222_v50 }
0x10b3   :  { %1129 = vperm.xlu1 %1997, %v1107_v35  }
0x10b7   :  { %1999 = vset.pattern.permute.xlu1 %v2224_v62 }
0x10b8   :  { %1157 = vperm.xlu1 %1999, %v1107_v35  }
0x10bc   :  { %2000 = vset.pattern.permute.xlu1 %v2221_v51 }
0x1123   :  { %v1126_v49 = vpop.permute.xlu1 %1125  ;;  %v1111_v8 = vpop.permute.xlu0 %1110 }
0x1124   :  { %v1136_v39 = vmul.f32 %v2638_v36, %v1126_v49  ;;  %v1122_v43 = vmul.f32 %v2641_v21, %v1111_v8 }
0x1126   :  { %v1166_v29 = vadd.f32 %v1136_v39, %v1122_v43 }
0x1128   :  { %v1140_v6 = vpop.permute.xlu1 %1139  ;;  %v1154_v47 = vpop.permute.xlu0 %1153 }
0x1129   :  { %v1150_v59 = vmul.f32 %v2644_v38, %v1140_v6  ;;  %v1164_v22 = vmul.f32 %v2647_v31, %v1154_v47 }
0x112b   :  { %v1168_v45 = vadd.f32 %v1164_v22, %v1150_v59 }
0x112d   :  { %v1170_v42 = vadd.f32 %v1168_v45, %v1166_v29  ;;  %v1116_v52 = vpop.permute.xlu1 %1115  ;;  %v1144_v13 = vpop.permute.xlu0 %1143 }
0x112e   :  { %v1151_v14 = vmul.f32 %v2644_v38, %v1144_v13  ;;  %v1123_v19 = vmul.f32 %v2641_v21, %v1116_v52 }
0x112f   :  { %1174 = vrot.lane.b32.xlu1 %v1170_v42, %s2226_s28 }
0x1132   :  { %v1130_v10 = vpop.permute.xlu1 %1129 }
0x1133   :  { %v1137_v53 = vmul.f32 %v2638_v36, %v1130_v10 }
0x1135   :  { %v1167_v56 = vadd.f32 %v1137_v53, %v1123_v19 }
0x1137   :  { %v1158_v23 = vpop.permute.xlu1 %1157 }
0x1138   :  { %v1165_v25 = vmul.f32 %v2647_v31, %v1158_v23 }
0x113a   :  { %v1169_v41 = vadd.f32 %v1165_v25, %v1151_v14 }
0x113c   :  { %v1171_v58 = vadd.f32 %v1169_v41, %v1167_v56 }
0x113e   :  { %1176 = vrot.lane.b32.xlu0 %v1171_v58, %s2226_s28 }
0x11a1   :  { %v1175_v55 = vpop.permute.xlu1 %1174 }
0x11a2   :  { %v1180_v46 = vsub.f32 %v1086_v34, %v1175_v55 }
0x11a4   :  { %v1182_v2 = vmul.f32 %v1180_v46, %v1180_v46 }
0x11a6   :  { %1197 = vperm.xlu0 %2001, %v1182_v2   ;;  %1186 = vperm.xlu1 %2000, %v1182_v2  }
0x11aa   :  { %2002 = vset.pattern.permute.xlu1 %v2223_v61  ;;  %2004 = vset.pattern.permute.xlu0 %v2221_v51  ;;  %v1738_v51 = vld [vmem:[#allocation2 + $0x40] ss:$0 sm:$0xff] }
0x11ab   :  { %1207 = vperm.xlu1 %2002, %v1182_v2  }
0x11af   :  { %2003 = vset.pattern.permute.xlu1 %v2224_v62 }
0x11b0   :  { %v1177_v44 = vpop.permute.xlu0 %1176  ;;  %1217 = vperm.xlu1 %2003, %v1182_v2  }
0x11b1   :  { %v1181_v11 = vsub.f32 %v1107_v35, %v1177_v44 }
0x11b3   :  { %v1183_v40 = vmul.f32 %v1181_v11, %v1181_v11 }
0x11b4   :  { %2005 = vset.pattern.permute.xlu1 %v2222_v50 }
0x11b5   :  { %1191 = vperm.xlu0 %2004, %v1183_v40   ;;  %1201 = vperm.xlu1 %2005, %v1183_v40  }
0x11b9   :  { %2007 = vset.pattern.permute.xlu0 %v2224_v62  ;;  %2006 = vset.pattern.permute.xlu1 %v2223_v61 }
0x11ba   :  { %1221 = vperm.xlu0 %2007, %v1183_v40   ;;  %1211 = vperm.xlu1 %2006, %v1183_v40  }
0x11be   :  { %2008 = vset.pattern.permute.xlu0 %v2212_v1  ;;  %2009 = vset.pattern.permute.xlu1 %v2214_v4 }
0x11bf   :  { %1251 = vrot.lane.b32.xlu0 %v1738_v51, %s2226_s28 }
0x1225   :  { %v1187_v12 = vpop.permute.xlu1 %1186  ;;  %v1198_v54 = vpop.permute.xlu0 %1197 }
0x1226   :  { %v1204_v50 = vmul.f32 %v1198_v54, %v2638_v36  ;;  %v1194_v24 = vmul.f32 %v1187_v12, %v2641_v21  ;;  %v1739_v12 = vld [vmem:[#allocation2 + $0x50] ss:$0 sm:$0xff] }
0x1228   :  { %v1226_v30 = vadd.f32 %v1204_v50, %v1194_v24 }
0x122a   :  { %v1208_v20 = vpop.permute.xlu1 %1207 }
0x122b   :  { %v1214_v62 = vmul.f32 %v1208_v20, %v2644_v38 }
0x122f   :  { %v1218_v9 = vpop.permute.xlu1 %1217 }
0x1230   :  { %v1224_v61 = vmul.f32 %v1218_v9, %v2647_v31 }
0x1232   :  { %v1228_v27 = vadd.f32 %v1224_v61, %v1214_v62  ;;  %v37_v62 = vld [vmem:[#allocation2 + $0x60] sm:$0xff]  ;;  %v38_v61 = vld [vmem:[#allocation2 + $0x68] sm:$0xff] }
0x1234   :  { %v1230_v26 = vadd.f32 %v1228_v27, %v1226_v30  ;;  %v1192_v37 = vpop.permute.xlu0 %1191  ;;  %v1202_v33 = vpop.permute.xlu1 %1201  ;;  %v39_v30 = vld [vmem:[#allocation2 + $0x70] sm:$0xff]  ;;  %v1853_v27 = vpack.c.bf16 %v38_v61, %v37_v62 }
0x1235   :  { %v1195_v5 = vmul.f32 %v1192_v37, %v2641_v21  ;;  %v1205_v32 = vmul.f32 %v1202_v33, %v2638_v36  ;;  %v41_v33 = vld [vmem:[#allocation2 + $0x80] sm:$0xff] }
0x1236   :  { %v1232_v48 = vadd.f32 1e-05, %v1230_v26  ;;  %v40_v26 = vld [vmem:[#allocation2 + $0x78] sm:$0xff]  ;;  %1854 = vmatprep.subr.bf16.mxu0 %v1853_v27 }
0x1237   :  { %v1227_v63 = vadd.f32 %v1205_v32, %v1195_v5  ;;  %v1857_v37 = vpack.c.bf16 %v40_v26, %v39_v30  ;;  %1856 = vmatpush3.bf16.msra.mxu0 %v1853_v27 }
0x1238   :  { %2164 = vrsqrt.f32 %v1232_v48  ;;  %v42_v48 = vld [vmem:[#allocation2 + $0x88] sm:$0xff] }
0x1239   :  { %v1222_v28 = vpop.permute.xlu0 %1221  ;;  %v1212_v34 = vpop.permute.xlu1 %1211  ;;  %1858 = vmatprep.subr.bf16.mxu0 %v1857_v37  ;;  %v1861_v5 = vpack.c.bf16 %v42_v48, %v41_v33 }
0x123a   :  { %v1225_v7 = vmul.f32 %v1222_v28, %v2647_v31  ;;  %v1215_v35 = vmul.f32 %v1212_v34, %v2644_v38  ;;  %v36_v28 = vld [vmem:[#allocation2 + $0x58] sm:$0xf]  ;;  %v43_v34 = vld [vmem:[#allocation2 + $0x90] sm:$0xff] }
0x123b   :  { %1860 = vmatpush3.bf16.msra.mxu0 %v1857_v37 }
0x123c   :  { %v1229_v49 = vadd.f32 %v1225_v7, %v1215_v35  ;;  %1862 = vmatprep.subr.bf16.mxu0 %v1861_v5  ;;  %v44_v7 = vld [vmem:[#allocation2 + $0x98] sm:$0xff] }
0x123d   :  { %v1252_v47 = vpop.permute.xlu0 %1251  ;;  %v1865_v35 = vpack.c.bf16 %v44_v7, %v43_v34 }
0x123e   :  { %v1231_v8 = vadd.f32 %v1229_v49, %v1227_v63  ;;  %v1311_v63 = vrot.slane %v36_v28, %v2278_v15  ;;  %v1325_v49 = vrot.slane %v36_v28, %v2284_v17 }
0x123f   :  { %1864 = vmatpush3.bf16.msra.mxu0 %v1861_v5 }
0x1240   :  { %v1233_v39 = vadd.f32 1e-05, %v1231_v8  ;;  %1866 = vmatprep.subr.bf16.mxu0 %v1865_v35 }
0x1242   :  { %v2165_v43 = vpop.eup %2164  ;;  %2166 = vrsqrt.f32 %v1233_v39 }
0x1243   :  { %1238 = vrot.lane.b32.xlu1 %v2165_v43, %s2226_s28  ;;  %v45_v43 = vld [vmem:[#allocation2 + $0xa0] sm:$0xff]  ;;  %1868 = vmatpush3.bf16.msra.mxu0 %v1865_v35 }
0x124c   :  { %v2167_v6 = vpop.eup %2166 }
0x124d   :  { %1240 = vrot.lane.b32.xlu1 %v2167_v6, %s2226_s28  ;;  %v46_v6 = vld [vmem:[#allocation2 + $0xa8] sm:$0xff] }
0x12b5   :  { %v1239_v21 = vpop.permute.xlu1 %1238 }
0x12b6   :  { %v1244_v36 = vmul.f32 %v1239_v21, %v1180_v46  ;;  %v47_v21 = vld [vmem:[#allocation2 + $0xb0] sm:$0xff] }
0x12b8   :  { %v1254_v59 = vmul.f32 %v1252_v47, %v1244_v36  ;;  %v1353_v36 = vrot.slane %v36_v28, %v2281_v16 }
0x12ba   :  { %1258 = vrot.lane.b32.xlu1 %v1254_v59, %s2227_s29  ;;  %v1869_v59 = vpack.c.bf16 %v46_v6, %v45_v43 }
0x12bc   :  { %1870 = vmatprep.subr.bf16.mxu0 %v1869_v59 }
0x12bd   :  { %1872 = vmatpush3.bf16.msra.mxu0 %v1869_v59 }
0x12bf   :  { %v1241_v31 = vpop.permute.xlu1 %1240 }
0x12c0   :  { %v1245_v22 = vmul.f32 %v1241_v31, %v1181_v11  ;;  %v48_v31 = vld [vmem:[#allocation2 + $0xb8] sm:$0xff] }
0x12c2   :  { %v1255_v38 = vmul.f32 %v1252_v47, %v1245_v22  ;;  %v1339_v47 = vrot.slane %v36_v28, %v2287_v18  ;;  %v1873_v22 = vpack.c.bf16 %v48_v31, %v47_v21 }
0x12c4   :  { %1260 = vrot.lane.b32.xlu0 %v1255_v38, %s2227_s29  ;;  %1874 = vmatprep.subr.bf16.mxu0 %v1873_v22 }
0x12c5   :  { %1876 = vmatpush3.bf16.msra.mxu0 %v1873_v22 }
0x132c   :  { %v1259_v29 = vpop.permute.xlu1 %1258 }
0x132d   :  { %v2679_v45 = vadd.f32 %v1259_v29, %v2303_v60 }
0x132f   :  { %v1266_v42 = vsel %vm143_vm0, %v2679_v45, 0.0 }
0x1330   :  { %1267 = vadd.xlane.f32.xlu1 %v1266_v42  ;;  %v49_v42 = vld [vmem:[#allocation2 + $0xc0] sm:$0xff] }
0x1336   :  { %v1261_v52 = vpop.permute.xlu0 %1260 }
0x1337   :  { %v2684_v10 = vadd.f32 %v1261_v52, %v2299_v57  ;;  %v50_v52 = vld [vmem:[#allocation2 + $0xc8] sm:$0xff] }
0x1339   :  { %v1269_v13 = vsel %vm143_vm0, %v2684_v10, 0.0 }
0x133a   :  { %1270 = vadd.xlane.f32.xlu0 %v1269_v13 }
0x13bd   :  { %v1268_v53 = vpop.xlane.xlu1 %1267 }
0x13be   :  { %v1272_v23 = vmul.f32 0.25, %v1268_v53 }
0x13c0   :  { %v1274_v14 = vsub.f32 %v2679_v45, %v1272_v23 }
0x13c2   :  { %v1276_v19 = vmul.f32 %v1274_v14, %v1274_v14 }
0x13c4   :  { %v1278_v60 = vsel %vm143_vm0, %v1276_v19, 0.0 }
0x13c5   :  { %1279 = vadd.xlane.f32.xlu0 %v1278_v60 }
0x13c7   :  { %v1271_v25 = vpop.xlane.xlu0 %1270 }
0x13c8   :  { %v1273_v56 = vmul.f32 0.25, %v1271_v25  ;;  %v51_v25 = vld [vmem:[#allocation2 + $0xd0] sm:$0xff] }
0x13ca   :  { %v1275_v41 = vsub.f32 %v2684_v10, %v1273_v56  ;;  %v52_v56 = vld [vmem:[#allocation2 + $0xd8] sm:$0xff] }
0x13cc   :  { %v1277_v58 = vmul.f32 %v1275_v41, %v1275_v41 }
0x13ce   :  { %v1281_v57 = vsel %vm143_vm0, %v1277_v58, 0.0 }
0x13cf   :  { %1282 = vadd.xlane.f32.xlu1 %v1281_v57  ;;  %v1881_v57 = vpack.c.bf16 %v52_v56, %v51_v25 }
0x1452   :  { %v1280_v55 = vpop.xlane.xlu0 %1279 }
0x1453   :  { %v1284_v46 = vmul.f32 0.25, %v1280_v55 }
0x1455   :  { %v1286_v2 = vadd.f32 1e-05, %v1284_v46 }
0x1457   :  { %2168 = vrsqrt.f32 %v1286_v2 }
0x145c   :  { %v1283_v44 = vpop.xlane.xlu1 %1282 }
0x145d   :  { %v1285_v11 = vmul.f32 0.25, %v1283_v44 }
0x145f   :  { %v1287_v40 = vadd.f32 1e-05, %v1285_v11 }
0x1461   :  { %v2169_v51 = vpop.eup %2168  ;;  %2170 = vrsqrt.f32 %v1287_v40 }
0x1462   :  { %v1290_v20 = vmul.f32 %v2169_v51, %v1274_v14  ;;  %v1877_v14 = vpack.c.bf16 %v50_v52, %v49_v42 }
0x1464   :  { %v1296_v54 = vmul.f32 %v1739_v12, %v1290_v20  ;;  %1878 = vmatprep.subr.bf16.mxu0 %v1877_v14 }
0x1465   :  { %1880 = vmatpush3.bf16.msra.mxu0 %v1877_v14 }
0x1466   :  { %1315 = vperm.xlu1 %2009, %v1296_v54   ;;  %1300 = vperm.xlu0 %2008, %v1296_v54  }
0x1467   :  { %1882 = vmatprep.subr.bf16.mxu0 %v1881_v57 }
0x1469   :  { %1884 = vmatpush3.bf16.msra.mxu0 %v1881_v57 }
0x146a   :  { %2010 = vset.pattern.permute.xlu1 %v2211_v0 }
0x146b   :  { %1329 = vperm.xlu1 %2010, %v1296_v54   ;;  %v2171_v50 = vpop.eup %2170 }
0x146c   :  { %v1291_v24 = vmul.f32 %v2171_v50, %v1275_v41 }
0x146e   :  { %v1297_v9 = vmul.f32 %v1739_v12, %v1291_v24 }
0x146f   :  { %2011 = vset.pattern.permute.xlu1 %v2213_v3 }
0x1470   :  { %1343 = vperm.xlu1 %2011, %v1296_v54  }
0x1474   :  { %2012 = vset.pattern.permute.xlu1 %v2212_v1 }
0x1475   :  { %1305 = vperm.xlu1 %2012, %v1297_v9  }
0x1479   :  { %2013 = vset.pattern.permute.xlu1 %v2214_v4 }
0x147a   :  { %1319 = vperm.xlu1 %2013, %v1297_v9  }
0x147e   :  { %2014 = vset.pattern.permute.xlu1 %v2211_v0 }
0x147f   :  { %1333 = vperm.xlu1 %2014, %v1297_v9  }
0x1483   :  { %2015 = vset.pattern.permute.xlu1 %v2213_v3 }
0x1484   :  { %1347 = vperm.xlu1 %2015, %v1297_v9  }
0x1488   :  { %2016 = vset.pattern.permute.xlu1 %v2212_v1 }
0x14e5   :  { %v1316_v32 = vpop.permute.xlu1 %1315  ;;  %v1301_v39 = vpop.permute.xlu0 %1300 }
0x14e6   :  { %v1312_v38 = vmul.f32 %v1311_v63, %v1301_v39  ;;  %v1326_v29 = vmul.f32 %v1325_v49, %v1316_v32 }
0x14e8   :  { %v1356_v19 = vadd.f32 %v1326_v29, %v1312_v38 }
0x14ea   :  { %v1330_v8 = vpop.permute.xlu1 %1329 }
0x14eb   :  { %v1340_v53 = vmul.f32 %v1339_v47, %v1330_v8 }
0x14ef   :  { %v1344_v13 = vpop.permute.xlu1 %1343 }
0x14f0   :  { %v1354_v23 = vmul.f32 %v1353_v36, %v1344_v13 }
0x14f2   :  { %v1358_v60 = vadd.f32 %v1354_v23, %v1340_v53 }
0x14f4   :  { %v2703_v41 = vadd.f32 %v1358_v60, %v1356_v19  ;;  %v1306_v58 = vpop.permute.xlu1 %1305 }
0x14f5   :  { %v1313_v11 = vmul.f32 %v1311_v63, %v1306_v58 }
0x14f6   :  { %1418 = vrot.lane.b32.xlu1 %v2703_v41, %s2228_s30  ;;  %v1364_v50 = vmul.f32 0.70710677, %v2703_v41  ;;  %v1362_v56 = vmul.f32 0.5, %v2703_v41 }
0x14f8   :  { %v1366_v24 = vand.u32 2147483647, %v1364_v50  ;;  %vm1406_vm11 = vcmp.lt.f32.partialorder %v1364_v50, 0.0 }
0x14f9   :  { %v1320_v55 = vpop.permute.xlu1 %1319 }
0x14fa   :  { %v1327_v2 = vmul.f32 %v1325_v49, %v1320_v55  ;;  %v1368_v9 = vmul.f32 0.3275911, %v1366_v24  ;;  %v1394_v28 = vsub.f32 0.0, %v1366_v24 }
0x14fc   :  { %v1357_v12 = vadd.f32 %v1327_v2, %v1313_v11  ;;  %v1370_v62 = vadd.f32 1.0, %v1368_v9  ;;  %v1396_v35 = vmul.f32 %v1394_v28, %v1366_v24 }
0x14fe   :  { %v1334_v46 = vpop.permute.xlu1 %1333  ;;  %2172 = vrcp.f32 %v1370_v62  ;;  %v1398_v8 = vmul.f32 1.442695, %v1396_v35 }
0x14ff   :  { %v1341_v40 = vmul.f32 %v1339_v47, %v1334_v46 }
0x1503   :  { %v1348_v44 = vpop.permute.xlu1 %1347 }
0x1504   :  { %v1355_v51 = vmul.f32 %v1353_v36, %v1348_v44 }
0x1506   :  { %v1359_v20 = vadd.f32 %v1355_v51, %v1341_v40 }
0x1508   :  { %v1361_v54 = vadd.f32 %v1359_v20, %v1357_v12  ;;  %v2173_v27 = vpop.eup %2172 }
0x1509   :  { %v1376_v37 = vmul.f32 1.0614054, %v2173_v27 }
0x150a   :  { %1420 = vrot.lane.b32.xlu0 %v1361_v54, %s2228_s30  ;;  %v1365_v61 = vmul.f32 0.70710677, %v1361_v54  ;;  %v1363_v12 = vmul.f32 0.5, %v1361_v54 }
0x150b   :  { %v1378_v48 = vadd.f32 -1.4531521, %v1376_v37 }
0x150c   :  { %v1367_v30 = vand.u32 2147483647, %v1365_v61  ;;  %vm1407_vm13 = vcmp.lt.f32.partialorder %v1365_v61, 0.0 }
0x150d   :  { %v1380_v5 = vmul.f32 %v2173_v27, %v1378_v48 }
0x150e   :  { %v1369_v26 = vmul.f32 0.3275911, %v1367_v30  ;;  %v1395_v59 = vsub.f32 0.0, %v1367_v30 }
0x150f   :  { %v1382_v32 = vadd.f32 1.4214138, %v1380_v5 }
0x1510   :  { %v1371_v33 = vadd.f32 1.0, %v1369_v26  ;;  %v1397_v29 = vmul.f32 %v1395_v59, %v1367_v30 }
0x1511   :  { %v1384_v34 = vmul.f32 %v2173_v27, %v1382_v32 }
0x1512   :  { %2174 = vrcp.f32 %v1371_v33  ;;  %v1400_v13 = vmul.f32 1.442695, %v1397_v29  ;;  %v59_v29 = vld [vmem:[#allocation2 + $0x110] sm:$0xff] }
0x1513   :  { %v1386_v63 = vadd.f32 -0.28449672, %v1384_v34  ;;  %2176 = vpow2.f32 %v1398_v8 }
0x1514   :  { %2178 = vpow2.f32 %v1400_v13  ;;  %v60_v13 = vld [vmem:[#allocation2 + $0x118] sm:$0xff] }
0x1515   :  { %v1388_v39 = vmul.f32 %v2173_v27, %v1386_v63 }
0x1517   :  { %v1390_v6 = vadd.f32 0.2548296, %v1388_v39 }
0x1519   :  { %v1392_v47 = vmul.f32 %v2173_v27, %v1390_v6 }
0x151c   :  { %v2175_v7 = vpop.eup %2174 }
0x151d   :  { %v1377_v49 = vmul.f32 1.0614054, %v2175_v7  ;;  %v2177_v31 = vpop.eup %2176 }
0x151e   :  { %v1402_v22 = vmul.f32 %v2177_v31, %v1392_v47  ;;  %v2179_v58 = vpop.eup %2178  ;;  %v1742_v47 = vld [vmem:[#allocation2 + $0xe0] ss:$0 sm:$0xff] }
0x151f   :  { %v1379_v43 = vadd.f32 -1.4531521, %v1377_v49 }
0x1520   :  { %v1404_v42 = vsub.f32 1.0, %v1402_v22 }
0x1521   :  { %v1381_v21 = vmul.f32 %v2175_v7, %v1379_v43 }
0x1522   :  { %v1408_v53 = vsub.f32 0.0, %v1404_v42 }
0x1523   :  { %v1383_v36 = vadd.f32 1.4214138, %v1381_v21 }
0x1524   :  { %v1410_v14 = vsel %vm1406_vm11, %v1408_v53, %v1404_v42  ;;  %v61_v53 = vld [vmem:[#allocation2 + $0x120] sm:$0xff] }
0x1525   :  { %v1385_v38 = vmul.f32 %v2175_v7, %v1383_v36  ;;  %v1412_v60 = vadd.f32 1.0, %v1410_v14  ;;  %v62_v14 = vld [vmem:[#allocation2 + $0x128] sm:$0xff] }
0x1527   :  { %v1387_v52 = vadd.f32 -0.28449672, %v1385_v38  ;;  %v1414_v57 = vmul.f32 %v1412_v60, %v1362_v56  ;;  %v58_v38 = vld [vmem:[#allocation2 + $0x108] sm:$0xff]  ;;  %v65_v56 = vld [vmem:[#allocation2 + $0x140] sm:$0xff] }
0x1529   :  { %v1389_v23 = vmul.f32 %v2175_v7, %v1387_v52  ;;  %v1889_v52 = vpack.c.bf16 %v59_v29, %v58_v38  ;;  %v1746_v38 = vld [vmem:[#allocation2 + $0x188] ss:$0 sm:$0xff] }
0x152b   :  { %v1391_v19 = vadd.f32 0.2548296, %v1389_v23  ;;  %v1893_v23 = vpack.c.bf16 %v61_v53, %v60_v13 }
0x152d   :  { %v1393_v25 = vmul.f32 %v2175_v7, %v1391_v19  ;;  %v57_v7 = vld [vmem:[#allocation2 + $0x100] sm:$0xff]  ;;  %v63_v19 = vld [vmem:[#allocation2 + $0x130] sm:$0xff] }
0x152e   :  { %v1897_v60 = vpack.c.bf16 %v63_v19, %v62_v14 }
0x152f   :  { %v1403_v46 = vmul.f32 %v2179_v58, %v1393_v25  ;;  %v64_v25 = vld [vmem:[#allocation2 + $0x138] sm:$0xff] }
0x1530   :  { %v1901_v58 = vpack.c.bf16 %v65_v56, %v64_v25 }
0x1531   :  { %v1405_v44 = vsub.f32 1.0, %v1403_v46  ;;  %v68_v46 = vld [vmem:[#allocation2 + $0x158] sm:$0xff] }
0x1533   :  { %v1409_v11 = vsub.f32 0.0, %v1405_v44 }
0x1535   :  { %v1411_v40 = vsel %vm1407_vm13, %v1409_v11, %v1405_v44  ;;  %v70_v11 = vld [vmem:[#allocation2 + $0x168] sm:$0xff] }
0x1536   :  { %v1413_v51 = vadd.f32 1.0, %v1411_v40  ;;  %v71_v40 = vld [vmem:[#allocation2 + $0x170] sm:$0xff] }
0x1538   :  { %v1415_v20 = vmul.f32 %v1413_v51, %v1363_v12 }
0x1568   :  { %v1419_v55 = vpop.permute.xlu1 %1418 }
0x1569   :  { %v1424_v2 = vmul.f32 %v1419_v55, %v1414_v57  ;;  %v67_v57 = vld [vmem:[#allocation2 + $0x150] sm:$0xff] }
0x156b   :  { %1815 = vmatprep.mubr.msk.f32.mxu0 %vm1426_vm12, %v1424_v2  ;;  %v69_v2 = vld [vmem:[#allocation2 + $0x160] sm:$0xff] }
0x156c   :  { %v1909_v44 = vpack.c.bf16 %v69_v2, %v68_v46 }
0x157c   :  { %v1421_v50 = vpop.permute.xlu0 %1420 }
0x157d   :  { %v1425_v24 = vmul.f32 %v1421_v50, %v1415_v20  ;;  %v54_v50 = vld [vmem:[#allocation2 + $0xe8] sm:$0xf] }
0x157f   :  { %1816 = vmatmul.mubr.msk.f32.vlgmr.msra.gmra.mrb[0].mxu0 %vm1426_vm12, %v1425_v24 }
0x1652   :  { %v1817_v9 = vpop.f32.mrb[0].mxu0 }
0x1653   :  { %v1505_v41 = vadd.f32 %v1817_v9, %v2684_v10  ;;  %v1495_v62 = vpop.f32.mrb[1].mxu0  ;;  %v1565_v9 = vrot.slane %v54_v50, %v2284_v17 }
0x1654   :  { %v1504_v30 = vadd.f32 %v1495_v62, %v2679_v45  ;;  %v56_v45 = vld [vmem:[#allocation2 + $0xf8] sm:$0xff] }
0x1655   :  { %v1509_v27 = vsel %vm143_vm0, %v1505_v41, 0.0  ;;  %v1885_v35 = vpack.c.bf16 %v57_v7, %v56_v45 }
0x1656   :  { %1510 = vadd.xlane.f32.xlu0 %v1509_v27  ;;  %v1506_v26 = vsel %vm143_vm0, %v1504_v30, 0.0  ;;  %v1579_v27 = vrot.slane %v54_v50, %v2287_v18 }
0x1657   :  { %1507 = vadd.xlane.f32.xlu1 %v1506_v26  ;;  %1886 = vmatprep.subr.bf16.mxu1 %v1885_v35 }
0x1658   :  { %1888 = vmatpush3.bf16.msra.mxu1 %v1885_v35 }
0x1659   :  { %1890 = vmatprep.subr.bf16.mxu1 %v1889_v52 }
0x165c   :  { %1892 = vmatpush3.bf16.msra.mxu1 %v1889_v52 }
0x165d   :  { %1894 = vmatprep.subr.bf16.mxu1 %v1893_v23 }
0x1660   :  { %1896 = vmatpush3.bf16.msra.mxu1 %v1893_v23 }
0x1661   :  { %1898 = vmatprep.subr.bf16.mxu1 %v1897_v60 }
0x1664   :  { %1900 = vmatpush3.bf16.msra.mxu1 %v1897_v60 }
0x1665   :  { %1902 = vmatprep.subr.bf16.mxu1 %v1901_v58 }
0x1668   :  { %1904 = vmatpush3.bf16.msra.mxu1 %v1901_v58 }
0x16e3   :  { %v1511_v61 = vpop.xlane.xlu0 %1510 }
0x16e4   :  { %v1513_v37 = vmul.f32 0.25, %v1511_v61  ;;  %v1508_v33 = vpop.xlane.xlu1 %1507 }
0x16e5   :  { %v1512_v54 = vmul.f32 0.25, %v1508_v33 }
0x16e6   :  { %v1515_v48 = vsub.f32 %v1505_v41, %v1513_v37  ;;  %v1593_v41 = vrot.slane %v54_v50, %v2281_v16 }
0x16e7   :  { %v1514_v5 = vsub.f32 %v1504_v30, %v1512_v54 }
0x16e8   :  { %v1517_v32 = vmul.f32 %v1515_v48, %v1515_v48 }
0x16e9   :  { %v1516_v28 = vmul.f32 %v1514_v5, %v1514_v5 }
0x16ea   :  { %v1521_v34 = vsel %vm143_vm0, %v1517_v32, 0.0  ;;  %v1743_v32 = vld [vmem:[#allocation2 + $0xf0] ss:$0 sm:$0xff] }
0x16eb   :  { %1522 = vadd.xlane.f32.xlu1 %v1521_v34  ;;  %v1518_v10 = vsel %vm143_vm0, %v1516_v28, 0.0 }
0x16ec   :  { %1519 = vadd.xlane.f32.xlu0 %v1518_v10 }
0x1778   :  { %v1523_v63 = vpop.xlane.xlu1 %1522 }
0x1779   :  { %v1525_v49 = vmul.f32 0.25, %v1523_v63  ;;  %v1520_v8 = vpop.xlane.xlu0 %1519 }
0x177a   :  { %v1524_v39 = vmul.f32 0.25, %v1520_v8  ;;  %v1744_v8 = vld [vmem:[#allocation2 + $0x178] ss:$0 sm:$0xff] }
0x177b   :  { %v1527_v43 = vadd.f32 1e-05, %v1525_v49 }
0x177c   :  { %v1526_v6 = vadd.f32 1e-05, %v1524_v39 }
0x177d   :  { %2180 = vrsqrt.f32 %v1527_v43 }
0x177e   :  { %2182 = vrsqrt.f32 %v1526_v6 }
0x1787   :  { %v2181_v21 = vpop.eup %2180 }
0x1788   :  { %v2183_v36 = vpop.eup %2182  ;;  %v1531_v59 = vmul.f32 %v2181_v21, %v1515_v48  ;;  %v1745_v21 = vld [vmem:[#allocation2 + $0x180] ss:$0 sm:$0xff] }
0x1789   :  { %v1530_v31 = vmul.f32 %v2183_v36, %v1514_v5 }
0x178a   :  { %v1537_v22 = vmul.f32 %v1742_v47, %v1531_v59 }
0x178b   :  { %v1536_v42 = vmul.f32 %v1742_v47, %v1530_v31 }
0x178c   :  { %1545 = vperm.xlu1 %2016, %v1537_v22  }
0x178d   :  { %1540 = vperm.xlu0 %2008, %v1536_v42  }
0x1790   :  { %2017 = vset.pattern.permute.xlu1 %v2214_v4  ;;  %v66_v4 = vld [vmem:[#allocation2 + $0x148] sm:$0xff] }
0x1791   :  { %2019 = vset.pattern.permute.xlu0 %v2213_v3  ;;  %1559 = vperm.xlu1 %2017, %v1537_v22   ;;  %v1905_v55 = vpack.c.bf16 %v67_v57, %v66_v4 }
0x1792   :  { %1583 = vperm.xlu0 %2019, %v1536_v42  }
0x1793   :  { %1906 = vmatprep.subr.bf16.mxu1 %v1905_v55 }
0x1794   :  { %1908 = vmatpush3.bf16.msra.mxu1 %v1905_v55 }
0x1795   :  { %1555 = vperm.xlu1 %2017, %v1536_v42   ;;  %1910 = vmatprep.subr.bf16.mxu1 %v1909_v44 }
0x1796   :  { %2020 = vset.pattern.permute.xlu0 %v2211_v0 }
0x1797   :  { %1573 = vperm.xlu0 %2020, %v1537_v22  }
0x1798   :  { %1912 = vmatpush3.bf16.msra.mxu1 %v1909_v44 }
0x1799   :  { %2018 = vset.pattern.permute.xlu1 %v2211_v0  ;;  %v1913_v0 = vpack.c.bf16 %v71_v40, %v70_v11 }
0x179a   :  { %1569 = vperm.xlu1 %2018, %v1536_v42  }
0x179b   :  { %2022 = vset.pattern.permute.xlu0 %v2212_v1  ;;  %1914 = vmatprep.subr.bf16.mxu1 %v1913_v0 }
0x179c   :  { %1916 = vmatpush3.bf16.msra.mxu1 %v1913_v0 }
0x179e   :  { %2021 = vset.pattern.permute.xlu1 %v2213_v3  ;;  %v1551_v3 = vrot.slane %v54_v50, %v2278_v15 }
0x179f   :  { %1587 = vperm.xlu1 %2021, %v1537_v22  }
0x17a3   :  { %2023 = vset.pattern.permute.xlu1 %v2212_v1 }
0x180b   :  { %v1546_v51 = vpop.permute.xlu1 %1545 }
0x180c   :  { %v1541_v12 = vpop.permute.xlu0 %1540  ;;  %v1553_v15 = vmul.f32 %v1551_v3, %v1546_v51 }
0x180d   :  { %v1552_v61 = vmul.f32 %v1551_v3, %v1541_v12 }
0x1810   :  { %v1560_v20 = vpop.permute.xlu1 %1559 }
0x1811   :  { %v1584_v62 = vpop.permute.xlu0 %1583  ;;  %v1567_v5 = vmul.f32 %v1565_v9, %v1560_v20 }
0x1812   :  { %v1594_v1 = vmul.f32 %v1593_v41, %v1584_v62 }
0x1813   :  { %v1597_v16 = vadd.f32 %v1567_v5, %v1553_v15 }
0x1814   :  { %v1556_v24 = vpop.permute.xlu1 %1555 }
0x1815   :  { %v1566_v30 = vmul.f32 %v1565_v9, %v1556_v24 }
0x1816   :  { %v1574_v54 = vpop.permute.xlu0 %1573 }
0x1817   :  { %v1596_v33 = vadd.f32 %v1566_v30, %v1552_v61  ;;  %v1581_v10 = vmul.f32 %v1579_v27, %v1574_v54 }
0x1819   :  { %v1570_v26 = vpop.permute.xlu1 %1569 }
0x181a   :  { %v1580_v37 = vmul.f32 %v1579_v27, %v1570_v26 }
0x181c   :  { %v1598_v48 = vadd.f32 %v1594_v1, %v1580_v37 }
0x181e   :  { %v1588_v28 = vpop.permute.xlu1 %1587  ;;  %v1600_v34 = vadd.f32 %v1598_v48, %v1596_v33 }
0x181f   :  { %v1595_v17 = vmul.f32 %v1593_v41, %v1588_v28 }
0x1820   :  { %v1606_v45 = vadd.f32 %v1743_v32, %v1600_v34 }
0x1821   :  { %v1599_v7 = vadd.f32 %v1595_v17, %v1581_v10 }
0x1822   :  { %v1608_v35 = vmax.f32 %v1606_v45, 0.0 }
0x1823   :  { %v1601_v63 = vadd.f32 %v1599_v7, %v1597_v16 }
0x1824   :  { %1850 = vmatprep.mubr.f32.mxu1 %v1608_v35 }
0x1825   :  { %v1607_v18 = vadd.f32 %v1743_v32, %v1601_v63 }
0x1827   :  { %v1609_v49 = vmax.f32 %v1607_v18, 0.0 }
0x1829   :  { %1851 = vmatmul.mubr.f32.vlgmr.msra.gmra.mrb[0].mxu1 %v1609_v49 }
0x18fc   :  { %v1852_v39 = vpop.f32.mrb[0].mxu1 }
0x18fd   :  { %v1686_v43 = vadd.f32 %v1852_v39, %v1744_v8  ;;  %v1680_v6 = vpop.f32.mrb[1].mxu1 }
0x18fe   :  { %v1681_v47 = vadd.f32 %v1744_v8, %v1680_v6 }
0x18ff   :  { %v1690_v36 = vmax.f32 %v1686_v43, 0.0 }
0x1900   :  { %v1689_v59 = vmax.f32 %v1681_v47, 0.0 }
0x1901   :  { %v1696_v31 = vmul.f32 %v1745_v21, %v1690_v36 }
0x1902   :  { %v1695_v22 = vmul.f32 %v1745_v21, %v1689_v59 }
0x1903   :  { %1699 = vadd.xlane.f32.xlu0 %v1696_v31 }
0x1904   :  { %1697 = vadd.xlane.f32.xlu1 %v1695_v22 }
0x1990   :  { %v1700_v29 = vpop.xlane.xlu0 %1699 }
0x1991   :  { %v1706_v42 = vadd.f32 %v1746_v38, %v1700_v29  ;;  %v1698_v52 = vpop.xlane.xlu1 %1697 }
0x1992   :  { %v1705_v13 = vadd.f32 %v1746_v38, %v1698_v52 }
0x1993   :  { %1714 = vperm.xlu1 %2023, %v1706_v42  }
0x1994   :  { %1709 = vperm.xlu0 %2022, %v1705_v13  }
0x1a12   :  { %v1715_v53 = vpop.permute.xlu1 %1714 }
0x1a13   :  { %1718 = vst [vmem:[%s2733_s2 + $0x8] sm:$0xff] %v1715_v53  ;;  %v1710_v23 = vpop.permute.xlu0 %1709 }
0x1a14   :  { %1717 = vst [vmem:[%s2733_s2] sm:$0xff] %v1710_v23 }
0x1a15   :  { %1723 = vsyncpa [#allocation3], 1 }

</bundles_post_ra>
